<compile_context>
chip_gen: v7x
topology: tpu7x:2x2x1
jax: 0.10.0
libtpu: 0.0.40
codegen_flags: <defaults>
</compile_context>

<pallas_src>
import jax
import jax.numpy as jnp
from jax.experimental import pallas as pl
from jax.experimental.pallas import tpu as pltpu


def _round_up(x, m):
    return (x + m - 1) // m * m


def _make_quantize_kernel(tile_n, dim, n_embed, n_valid, mask_rows):
    def kernel(x_ref, embed_ref, embed_t_ref, e2s_ref, q_ref, ids_ref, diff_ref):
        x = x_ref[...]                                            # (tile, dim) f32

        # Negative half squared distance (||x||^2 dropped): argmax == argmin dist.
        score = jnp.dot(x.astype(jnp.bfloat16), embed_ref[...],
                        preferred_element_type=jnp.float32)       # (tile, n_embed) MXU
        score = score + e2s_ref[...]                              # += -0.5*||e||^2

        # First-index argmax via max + masked-iota min (exactly one hot on ties).
        best = jnp.max(score, axis=1, keepdims=True)              # (tile, 1)
        code_iota = jax.lax.broadcasted_iota(jnp.int32, (tile_n, n_embed), 1)
        ids_col = jnp.min(jnp.where(score >= best, code_iota, n_embed),
                          axis=1, keepdims=True)                  # (tile, 1) int32
        onehot = (code_iota == ids_col).astype(jnp.float32)       # (tile, n_embed)

        # Codebook lookup as an exact f32 one-hot matmul (MXU, no dynamic gather).
        q = jnp.dot(onehot, embed_t_ref[...],
                    preferred_element_type=jnp.float32)           # (tile, dim) MXU

        # Lane-dense index row: code_values @ onehot^T -> (1, tile), exact integers.
        code_row = jax.lax.broadcasted_iota(
            jnp.int32, (1, n_embed), 1).astype(jnp.float32)       # (1, n_embed)
        ids_row = jax.lax.dot_general(code_row, onehot,
                                      (((1,), (1,)), ((), ())),
                                      preferred_element_type=jnp.float32)
        ids_ref[...] = ids_row.astype(jnp.int32)                  # (1, tile)

        # Straight-through forward value: input + (quantize - input) == quantize.
        q_ref[...] = q.astype(q_ref.dtype)

        # Per-tile MSE partial sums; final reduce + 1/(N*dim) done in the wrapper.
        d = q - x
        dsq = d * d
        if mask_rows:  # rows past the true N (padding) must not contribute
            i = pl.program_id(0)
            row = jax.lax.broadcasted_iota(jnp.int32, (tile_n, 1), 0) + i * tile_n
            dsq = dsq * (row < n_valid).astype(jnp.float32)
        diff_ref[...] = jnp.sum(dsq, axis=0, keepdims=True)       # (1, dim)

    return kernel


def quantize_forward(x, embed, *, tile_n=1024):
    """Eval-mode forward of the PyTorch `Quantize` module.

    x:     (..., dim) activations (embedding dim last, as the module expects).
    embed: (dim, n_embed) codebook buffer.
    Returns (quantize, diff, embed_ind) matching the PyTorch forward outputs.
    """
    dim, n_embed = embed.shape
    assert x.shape[-1] == dim, (x.shape, dim)
    lead_shape = x.shape[:-1]

    x_flat = x.reshape(-1, dim).astype(jnp.float32)
    n = x_flat.shape[0]

    tile = _round_up(min(tile_n, _round_up(n, 8)), 8)
    n_pad = _round_up(n, tile)
    if n_pad != n:
        x_flat = jnp.pad(x_flat, ((0, n_pad - n), (0, 0)))
    num_tiles = n_pad // tile

    embed_f = embed.astype(jnp.float32)
    embed_bf = embed_f.astype(jnp.bfloat16)                       # bf16 distance operand
    embed_t = embed_f.T                                           # (n_embed, dim) exact gather
    e2s = -0.5 * jnp.sum(embed_f * embed_f, axis=0, keepdims=True)  # (1, n_embed) f32

    kernel = _make_quantize_kernel(tile, dim, n_embed, n, n_pad != n)

    # VMEM budget: double-buffered x/q blocks + resident codebook + in-kernel temps.
    est = (4 * tile * dim * 4
           + 2 * (dim * n_embed * 6 + n_embed * 4)
           + 8 * tile * n_embed * 4
           + (1 << 20))
    vmem_limit = int(min(max(2 * est, 32 << 20), 48 << 20))

    q_pad, ids_out, diff_part = pl.pallas_call(
        kernel,
        out_shape=(
            jax.ShapeDtypeStruct((n_pad, dim), jnp.float32),      # quantize
            jax.ShapeDtypeStruct((num_tiles, tile), jnp.int32),   # embed_ind (lane-dense)
            jax.ShapeDtypeStruct((num_tiles, dim), jnp.float32),  # per-tile MSE partials
        ),
        grid_spec=pltpu.PrefetchScalarGridSpec(
            num_scalar_prefetch=0,
            grid=(num_tiles,),
            in_specs=[
                pl.BlockSpec((tile, dim), lambda i: (i, 0)),          # x row-tile
                pl.BlockSpec((dim, n_embed), lambda i: (0, 0)),       # codebook bf16 (resident)
                pl.BlockSpec((n_embed, dim), lambda i: (0, 0)),       # codebook^T f32 (resident)
                pl.BlockSpec((1, n_embed), lambda i: (0, 0)),         # -0.5*||e||^2 (resident)
            ],
            out_specs=(
                pl.BlockSpec((tile, dim), lambda i: (i, 0)),          # quantize
                pl.BlockSpec((1, tile), lambda i: (i, 0)),            # embed_ind row
                pl.BlockSpec((1, dim), lambda i: (i, 0)),             # diff partials
            ),
        ),
        compiler_params=pltpu.CompilerParams(
            dimension_semantics=("parallel",),    # no cross-tile accumulator -> megacore OK
            vmem_limit_bytes=vmem_limit,
        ),
    )(x_flat, embed_bf, embed_t, e2s)

    quantize = q_pad[:n].reshape(*lead_shape, dim).astype(x.dtype)
    embed_ind = ids_out.reshape(-1)[:n].reshape(lead_shape)
    diff = jnp.sum(diff_part) * (1.0 / float(n * dim))
    return quantize, diff, embed_ind


if __name__ == "__main__":
    key = jax.random.PRNGKey(0)
    kx, ke = jax.random.split(key)

    # Small but representative VQ-VAE shapes: dim=64 codes, 128-entry codebook,
    # input (2, 16, 16, 64) with the embedding dim last (as the module expects).
    B, H, W, dim, n_embed = 2, 16, 16, 64, 128
    x = jax.random.normal(kx, (B, H, W, dim), jnp.float32)
    embed = jax.random.normal(ke, (dim, n_embed), jnp.float32)  # torch.randn(dim, n_embed)

    fwd = jax.jit(quantize_forward)
    quantize, diff, embed_ind = jax.block_until_ready(fwd(x, embed))

    assert quantize.shape == (B, H, W, dim), quantize.shape
    assert embed_ind.shape == (B, H, W), embed_ind.shape
    assert diff.shape == (), diff.shape
    assert bool(jnp.all(jnp.isfinite(quantize)))
    assert bool(jnp.isfinite(diff))
    assert bool(jnp.all((embed_ind >= 0) & (embed_ind < n_embed)))

    # Internal consistency: quantize rows equal the selected codebook rows, and
    # diff equals the MSE between them and the input.
    codes = embed.T[embed_ind.reshape(-1)].reshape(B, H, W, dim)
    assert bool(jnp.allclose(quantize, codes, atol=1e-5, rtol=1e-5))
    ref_diff = jnp.mean((codes - x) ** 2)
    assert bool(jnp.allclose(diff, ref_diff, atol=1e-5, rtol=1e-4))

    flat = x.reshape(-1, dim)
    e2 = jnp.sum(embed ** 2, axis=0, keepdims=True)

    # Reference using the same bf16 distance matmul as the kernel: agreement should
    # be near-perfect (only MXU-vs-XLA accumulation-order effects on exact ties).
    ref_score_bf16 = (jnp.dot(flat.astype(jnp.bfloat16), embed.astype(jnp.bfloat16),
                              preferred_element_type=jnp.float32) - 0.5 * e2)
    ref_ind_bf16 = jnp.argmax(ref_score_bf16, axis=1).reshape(B, H, W)
    assert float(jnp.mean((ref_ind_bf16 == embed_ind).astype(jnp.float32))) > 0.99

    # Exact f32 reference: bf16 distance rounding may flip rare near-tie
    # assignments (documented, acceptable for VQ-VAE), so use a looser bound.
    ref_dist = jnp.sum(flat ** 2, 1, keepdims=True) - 2.0 * flat @ embed + e2
    ref_ind = jnp.argmin(ref_dist, axis=1).reshape(B, H, W)
    assert float(jnp.mean((ref_ind == embed_ind).astype(jnp.float32))) > 0.95

    print("KERNEL_OK")
</pallas_src>

<mosaic_0001>
module attributes {stable_mosaic.version = 11 : i64} {
  func.func @kernel(%arg0: i32, %arg1: memref<512x64xf32, #tpu.memory_space<vmem>>, %arg2: memref<64x128xbf16, #tpu.memory_space<vmem>>, %arg3: memref<128x64xf32, #tpu.memory_space<vmem>>, %arg4: memref<1x128xf32, #tpu.memory_space<vmem>>, %arg5: memref<512x64xf32, #tpu.memory_space<vmem>>, %arg6: memref<1x512xi32, #tpu.memory_space<vmem>>, %arg7: memref<1x64xf32, #tpu.memory_space<vmem>>) attributes {dimension_semantics = [#tpu.dimension_semantics<parallel>], iteration_bounds = array<i64: 1>, scalar_prefetch = 0 : i64, scratch_operands = 0 : i64, tpu.core_type = #tpu.core_type<tc>, window_params = [{transform_indices = @transform_0, window_bounds = array<i64: 512, 64>}, {pipeline_mode = #tpu.pipeline_mode<synchronous>, transform_indices = @transform_1, window_bounds = array<i64: 64, 128>}, {pipeline_mode = #tpu.pipeline_mode<synchronous>, transform_indices = @transform_2, window_bounds = array<i64: 128, 64>}, {pipeline_mode = #tpu.pipeline_mode<synchronous>, transform_indices = @transform_3, window_bounds = array<i64: 1, 128>}, {transform_indices = @transform_4, window_bounds = array<i64: 512, 64>}, {transform_indices = @transform_5, window_bounds = array<i64: 1, 512>}, {transform_indices = @transform_6, window_bounds = array<i64: 1, 64>}]} {
    %c0 = arith.constant 0 : index
    %c0_0 = arith.constant 0 : index
    %0 = vector.load %arg1[%c0, %c0_0] : memref<512x64xf32, #tpu.memory_space<vmem>>, vector<512x64xf32>
    %1 = arith.truncf %0 : vector<512x64xf32> to vector<512x64xbf16>
    %c0_1 = arith.constant 0 : index
    %c0_2 = arith.constant 0 : index
    %2 = vector.load %arg2[%c0_1, %c0_2] : memref<64x128xbf16, #tpu.memory_space<vmem>>, vector<64x128xbf16>
    %cst = arith.constant dense<0.000000e+00> : vector<512x128xf32>
    %3 = tpu.matmul %1, %2, %cst {dimension_numbers = #tpu.dot_dimension_numbers<[1], [0], [0], [1], [0, 0, 1, 1], [], []>} : vector<512x64xbf16>, vector<64x128xbf16>, vector<512x128xf32> -> vector<512x128xf32>
    %c0_3 = arith.constant 0 : index
    %c0_4 = arith.constant 0 : index
    %4 = vector.load %arg4[%c0_3, %c0_4] : memref<1x128xf32, #tpu.memory_space<vmem>>, vector<1x128xf32>
    %5 = vector.broadcast %4 : vector<1x128xf32> to vector<512x128xf32>
    %6 = arith.addf %3, %5 : vector<512x128xf32>
    %cst_5 = arith.constant dense<0xFF800000> : vector<512xf32>
    %7 = vector.multi_reduction <maximumf>, %6, %cst_5 [1] : vector<512x128xf32> to vector<512xf32>
    %8 = vector.shape_cast %7 : vector<512xf32> to vector<512x1xf32>
    %9 = tpu.iota {dimensions = array<i32: 1>} : vector<512x128xi32>
    %10 = vector.broadcast %8 : vector<512x1xf32> to vector<512x128xf32>
    %11 = arith.cmpf oge, %6, %10 : vector<512x128xf32>
    %c128_i32 = arith.constant 128 : i32
    %12 = vector.broadcast %c128_i32 : i32 to vector<512x128xi32>
    %13 = arith.select %11, %9, %12 : vector<512x128xi1>, vector<512x128xi32>
    %cst_6 = arith.constant dense<2147483647> : vector<512xi32>
    %14 = vector.multi_reduction <minsi>, %13, %cst_6 [1] : vector<512x128xi32> to vector<512xi32>
    %15 = vector.shape_cast %14 : vector<512xi32> to vector<512x1xi32>
    %16 = vector.broadcast %15 : vector<512x1xi32> to vector<512x128xi32>
    %17 = arith.cmpi eq, %9, %16 : vector<512x128xi32>
    %18 = arith.extui %17 : vector<512x128xi1> to vector<512x128xi32>
    %19 = arith.sitofp %18 : vector<512x128xi32> to vector<512x128xf32>
    %c0_7 = arith.constant 0 : index
    %c0_8 = arith.constant 0 : index
    %20 = vector.load %arg3[%c0_7, %c0_8] : memref<128x64xf32, #tpu.memory_space<vmem>>, vector<128x64xf32>
    %cst_9 = arith.constant dense<0.000000e+00> : vector<512x64xf32>
    %21 = tpu.matmul %19, %20, %cst_9 {dimension_numbers = #tpu.dot_dimension_numbers<[1], [0], [0], [1], [0, 0, 1, 1], [], []>} : vector<512x128xf32>, vector<128x64xf32>, vector<512x64xf32> -> vector<512x64xf32>
    %22 = tpu.iota {dimensions = array<i32: 1>} : vector<1x128xi32>
    %23 = arith.sitofp %22 : vector<1x128xi32> to vector<1x128xf32>
    %cst_10 = arith.constant dense<0.000000e+00> : vector<1x512xf32>
    %24 = tpu.matmul %23, %19, %cst_10 {dimension_numbers = #tpu.dot_dimension_numbers<[1], [1], [0], [0], [0, 0, 1, 0], [], []>} : vector<1x128xf32>, vector<512x128xf32>, vector<1x512xf32> -> vector<1x512xf32>
    %25 = arith.fptosi %24 : vector<1x512xf32> to vector<1x512xi32>
    %c0_11 = arith.constant 0 : index
    %c0_12 = arith.constant 0 : index
    %26 = vector.load %arg6[%c0_11, %c0_12] : memref<1x512xi32, #tpu.memory_space<vmem>>, vector<1x512xi32>
    tpu.vector_store %arg6[%c0_11, %c0_12], %25 {strides = array<i32>} : memref<1x512xi32, #tpu.memory_space<vmem>>, vector<1x512xi32>,
    %c0_13 = arith.constant 0 : index
    %c0_14 = arith.constant 0 : index
    %27 = vector.load %arg5[%c0_13, %c0_14] : memref<512x64xf32, #tpu.memory_space<vmem>>, vector<512x64xf32>
    tpu.vector_store %arg5[%c0_13, %c0_14], %21 {strides = array<i32>} : memref<512x64xf32, #tpu.memory_space<vmem>>, vector<512x64xf32>,
    %28 = arith.subf %21, %0 : vector<512x64xf32>
    %29 = arith.mulf %28, %28 : vector<512x64xf32>
    %cst_15 = arith.constant dense<0.000000e+00> : vector<64xf32>
    %30 = vector.multi_reduction <add>, %29, %cst_15 [0] : vector<512x64xf32> to vector<64xf32>
    %31 = vector.shape_cast %30 : vector<64xf32> to vector<1x64xf32>
    %c0_16 = arith.constant 0 : index
    %c0_17 = arith.constant 0 : index
    %32 = vector.load %arg7[%c0_16, %c0_17] : memref<1x64xf32, #tpu.memory_space<vmem>>, vector<1x64xf32>
    tpu.vector_store %arg7[%c0_16, %c0_17], %31 {strides = array<i32>} : memref<1x64xf32, #tpu.memory_space<vmem>>, vector<1x64xf32>,
    return
  }
  func.func @transform_0(%arg0: i32) -> (i32, i32) {
    %c0_i32 = arith.constant 0 : i32
    %c0_i32_0 = arith.constant 0 : i32
    return %arg0, %c0_i32 : i32, i32
  }
  func.func @transform_1(%arg0: i32) -> (i32, i32) {
    %c0_i32 = arith.constant 0 : i32
    %c0_i32_0 = arith.constant 0 : i32
    %c0_i32_1 = arith.constant 0 : i32
    return %c0_i32, %c0_i32_0 : i32, i32
  }
  func.func @transform_2(%arg0: i32) -> (i32, i32) {
    %c0_i32 = arith.constant 0 : i32
    %c0_i32_0 = arith.constant 0 : i32
    %c0_i32_1 = arith.constant 0 : i32
    return %c0_i32, %c0_i32_0 : i32, i32
  }
  func.func @transform_3(%arg0: i32) -> (i32, i32) {
    %c0_i32 = arith.constant 0 : i32
    %c0_i32_0 = arith.constant 0 : i32
    %c0_i32_1 = arith.constant 0 : i32
    return %c0_i32, %c0_i32_0 : i32, i32
  }
  func.func @transform_4(%arg0: i32) -> (i32, i32) {
    %c0_i32 = arith.constant 0 : i32
    %c0_i32_0 = arith.constant 0 : i32
    return %arg0, %c0_i32 : i32, i32
  }
  func.func @transform_5(%arg0: i32) -> (i32, i32) {
    %c0_i32 = arith.constant 0 : i32
    %c0_i32_0 = arith.constant 0 : i32
    return %arg0, %c0_i32 : i32, i32
  }
  func.func @transform_6(%arg0: i32) -> (i32, i32) {
    %c0_i32 = arith.constant 0 : i32
    %c0_i32_0 = arith.constant 0 : i32
    return %arg0, %c0_i32 : i32, i32
  }
}

</mosaic_0001>

<bundles_post_ra>
// kernel: quantize_forward.1
= control target key start
LH: loop header
LB: loop body
LE: loop exit
PB: predicated region body
PF: predicated region fallthrough
CT: control target
= control target key end

     0   :  { %12 = vsyncpa [#allocation3], 0  ;;  %s5687_s0 = inlined_call_operand.hbm [shape: f32[512,64], index: 0, kind: input, shape index: {}]   ;;  %s5688_s1 = inlined_call_operand.vmem [shape: bf16[64,128], index: 1, kind: input, shape index: {}]   ;;  %s5689_s2 = inlined_call_operand.vmem [shape: f32[128,64], index: 2, kind: input, shape index: {}]   ;;  %s5690_s3 = inlined_call_operand.vmem [shape: f32[1,128], index: 3, kind: input, shape index: {}]   ;;  %s5691_s4 = inlined_call_operand.hbm [shape: f32[512,64], index: 4, kind: output, shape index: {0}]   ;;  %s5692_s5 = inlined_call_operand.vmem [shape: s32[1,512], index: 5, kind: output, shape index: {1}]   ;;  %s5693_s6 = inlined_call_operand.vmem [shape: f32[1,64], index: 6, kind: output, shape index: {2}]  }
   0x1   :  { %13 = vsyncpa [#allocation4], 0  ;;  %s3672_s21 = smov [#allocation2]   ;;  %s3624_s25 = scalar_lea.hbm %s5687_s0, 8192 }
   0x2   :  { %s19_s22 = sshll.u32 %s3672_s21, 4  ;;  %p3625_p0 = scmp.ne.s32.totalorder %s5687_s0, %s3624_s25  ;;  %s20_s22 = int_to_ptr.vmem [resolvable:$true] %s19_s22 }
   0x3   :  { %p3628_p1 = scmp.lt.u32.totalorder %s3624_s25, %s5687_s0 }
   0x5   :  { %p3630_p2 = pnand %p3628_p1, %p3625_p0 }
   0x7   :  { %3633 = shalt.err (!%p3630_p2)
}
   0x8   :  { %s3634_s30 = scalar_lea.vmem %s20_s22, 8192  ;;  %p3639_p4 = scmp.lt.s32.totalorder %s20_s22, %s20_s22 }
   0x9   :  { %p3635_p3 = scmp.ne.s32.totalorder %s20_s22, %s3634_s30  ;;  %p3640_p5 = scmp.lt.s32.totalorder %s3634_s30, %s3634_s30 }
   0xb   :  { %p3641_p6 = por %p3640_p5, %p3639_p4 }
   0xd   :  { %p3642_p7 = pnand %p3641_p6, %p3635_p3 }
   0xf   :  { %3645 = shalt.err (!%p3642_p7)
}
  0x10   :  { %s3673_s7 = smov 128   ;;  %s3674_s8 = smov 8  }
  0x11   :  { %25 = dma.hbm_to_vmem [thread:$0]  %s5687_s0, 8192, %s20_s22, [#allocation3], %s3673_s7, %s3673_s7, %s3674_s8  }
  0x12   :  { %3668 = dma.done.wait [#allocation3], 8192  }
  0x13   :  { %3669 = vsyncadd [#allocation3], 4294959104  ;;  %v3556_v0 = vld [vmem:[%s5688_s1] sm:$0xff]   ;;  %v3557_v1 = vld [vmem:[%s5688_s1 + $0x8] sm:$0xff]   ;;  %vm5803_vm0 = vcmask 523264  }
  0x14   :  { %3245 = vmatprep.subr.bf16.mxu0 %v3556_v0  ;;  %v3558_v2 = vld [vmem:[%s5688_s1 + $0x10] sm:$0xff]   ;;  %v36_v3 = vld [vmem:[#allocation2] sm:$0xff]  ;;  %v37_v4 = vld [vmem:[#allocation2 + $0x8] sm:$0xff] }
  0x15   :  { %3246 = vmatpush3.bf16.msra.mxu0 %v3556_v0  ;;  %v100_v5 = vpack.c.bf16 %v37_v4, %v36_v3  ;;  %v3559_v6 = vld [vmem:[%s5688_s1 + $0x18] sm:$0xff]   ;;  %v38_v7 = vld [vmem:[#allocation2 + $0x10] sm:$0xff]  ;;  %v40_v9 = vld [vmem:[#allocation2 + $0x20] sm:$0xff] }
  0x16   :  { %3247 = vmatprep.subr.bf16.mxu0 %v3557_v1  ;;  %v39_v8 = vld [vmem:[#allocation2 + $0x18] sm:$0xff]  ;;  %v41_v10 = vld [vmem:[#allocation2 + $0x28] sm:$0xff]  ;;  %v42_v13 = vld [vmem:[#allocation2 + $0x30] sm:$0xff] }
  0x17   :  { %3253 = vmatprep.mubr.msk.bf16.mxu0 %vm5803_vm0, %v100_v5  ;;  %v101_v11 = vpack.c.bf16 %v39_v8, %v38_v7  ;;  %v102_v12 = vpack.c.bf16 %v41_v10, %v40_v9  ;;  %v43_v14 = vld [vmem:[#allocation2 + $0x38] sm:$0xff]  ;;  %v44_v15 = vld [vmem:[#allocation2 + $0x40] sm:$0xff]  ;;  %v45_v16 = vld [vmem:[#allocation2 + $0x48] sm:$0xff] }
  0x18   :  { %v103_v17 = vpack.c.bf16 %v43_v14, %v42_v13  ;;  %v104_v18 = vpack.c.bf16 %v45_v16, %v44_v15  ;;  %v46_v19 = vld [vmem:[#allocation2 + $0x50] sm:$0xff]  ;;  %v47_v20 = vld [vmem:[#allocation2 + $0x58] sm:$0xff]  ;;  %v48_v21 = vld [vmem:[#allocation2 + $0x60] sm:$0xff] }
  0x19   :  { %3248 = vmatpush3.bf16.msra.mxu0 %v3557_v1  ;;  %v49_v22 = vld [vmem:[#allocation2 + $0x68] sm:$0xff]  ;;  %v105_v23 = vpack.c.bf16 %v47_v20, %v46_v19  ;;  %v50_v25 = vld [vmem:[#allocation2 + $0x70] sm:$0xff]  ;;  %v51_v26 = vld [vmem:[#allocation2 + $0x78] sm:$0xff] }
  0x1a   :  { %3249 = vmatprep.subr.bf16.mxu0 %v3558_v2  ;;  %v106_v24 = vpack.c.bf16 %v49_v22, %v48_v21  ;;  %v52_v27 = vld [vmem:[#allocation2 + $0x80] sm:$0xff]  ;;  %v53_v28 = vld [vmem:[#allocation2 + $0x88] sm:$0xff]  ;;  %v107_v29 = vpack.c.bf16 %v51_v26, %v50_v25  ;;  %v54_v31 = vld [vmem:[#allocation2 + $0x90] sm:$0xff] }
  0x1b   :  { %v108_v30 = vpack.c.bf16 %v53_v28, %v52_v27  ;;  %v55_v32 = vld [vmem:[#allocation2 + $0x98] sm:$0xff]  ;;  %v56_v33 = vld [vmem:[#allocation2 + $0xa0] sm:$0xff]  ;;  %v57_v34 = vld [vmem:[#allocation2 + $0xa8] sm:$0xff] }
  0x1c   :  { %v109_v35 = vpack.c.bf16 %v55_v32, %v54_v31  ;;  %v110_v36 = vpack.c.bf16 %v57_v34, %v56_v33  ;;  %v58_v37 = vld [vmem:[#allocation2 + $0xb0] sm:$0xff]  ;;  %v59_v38 = vld [vmem:[#allocation2 + $0xb8] sm:$0xff]  ;;  %v60_v39 = vld [vmem:[#allocation2 + $0xc0] sm:$0xff] }
  0x1d   :  { %3250 = vmatpush3.bf16.msra.mxu0 %v3558_v2  ;;  %v61_v40 = vld [vmem:[#allocation2 + $0xc8] sm:$0xff]  ;;  %v111_v41 = vpack.c.bf16 %v59_v38, %v58_v37  ;;  %v62_v43 = vld [vmem:[#allocation2 + $0xd0] sm:$0xff]  ;;  %v63_v44 = vld [vmem:[#allocation2 + $0xd8] sm:$0xff] }
  0x1e   :  { %3251 = vmatprep.subr.bf16.mxu0 %v3559_v6  ;;  %v112_v42 = vpack.c.bf16 %v61_v40, %v60_v39  ;;  %v64_v45 = vld [vmem:[#allocation2 + $0xe0] sm:$0xff]  ;;  %v65_v46 = vld [vmem:[#allocation2 + $0xe8] sm:$0xff]  ;;  %v113_v47 = vpack.c.bf16 %v63_v44, %v62_v43  ;;  %v66_v49 = vld [vmem:[#allocation2 + $0xf0] sm:$0xff] }
  0x1f   :  { %v114_v48 = vpack.c.bf16 %v65_v46, %v64_v45  ;;  %v67_v50 = vld [vmem:[#allocation2 + $0xf8] sm:$0xff]  ;;  %v68_v51 = vld [vmem:[#allocation2 + $0x100] sm:$0xff]  ;;  %v69_v52 = vld [vmem:[#allocation2 + $0x108] sm:$0xff] }
  0x20   :  { %v115_v53 = vpack.c.bf16 %v67_v50, %v66_v49  ;;  %v116_v54 = vpack.c.bf16 %v69_v52, %v68_v51  ;;  %v70_v55 = vld [vmem:[#allocation2 + $0x110] sm:$0xff]  ;;  %v71_v56 = vld [vmem:[#allocation2 + $0x118] sm:$0xff]  ;;  %v72_v57 = vld [vmem:[#allocation2 + $0x120] sm:$0xff] }
  0x21   :  { %3252 = vmatpush3.bf16.msra.mxu0 %v3559_v6  ;;  %v73_v58 = vld [vmem:[#allocation2 + $0x128] sm:$0xff]  ;;  %v117_v59 = vpack.c.bf16 %v71_v56, %v70_v55  ;;  %v74_v61 = vld [vmem:[#allocation2 + $0x130] sm:$0xff]  ;;  %v75_v62 = vld [vmem:[#allocation2 + $0x138] sm:$0xff] }
  0x22   :  { %v118_v60 = vpack.c.bf16 %v73_v58, %v72_v57  ;;  %v76_v63 = vld [vmem:[#allocation2 + $0x140] sm:$0xff]  ;;  %v77_v0 = vld [vmem:[#allocation2 + $0x148] sm:$0xff]  ;;  %v119_v1 = vpack.c.bf16 %v75_v62, %v74_v61  ;;  %v78_v3 = vld [vmem:[#allocation2 + $0x150] sm:$0xff] }
  0x23   :  { %v120_v2 = vpack.c.bf16 %v77_v0, %v76_v63  ;;  %v79_v4 = vld [vmem:[#allocation2 + $0x158] sm:$0xff]  ;;  %v80_v5 = vld [vmem:[#allocation2 + $0x160] sm:$0xff]  ;;  %v81_v6 = vld [vmem:[#allocation2 + $0x168] sm:$0xff] }
  0x24   :  { %3254 = vmatmul.mubr.msk.bf16.vlgmr.msra.gmra.mrb[0].mxu0 %vm5803_vm0, %v101_v11  ;;  %v121_v7 = vpack.c.bf16 %v79_v4, %v78_v3  ;;  %v122_v8 = vpack.c.bf16 %v81_v6, %v80_v5  ;;  %v82_v9 = vld [vmem:[#allocation2 + $0x170] sm:$0xff]  ;;  %v83_v10 = vld [vmem:[#allocation2 + $0x178] sm:$0xff]  ;;  %v84_v11 = vld [vmem:[#allocation2 + $0x180] sm:$0xff] }
  0x25   :  { %3257 = vmatprep.mubr.msk.bf16.mxu0 %vm5803_vm0, %v102_v12  ;;  %v85_v12 = vld [vmem:[#allocation2 + $0x188] sm:$0xff]  ;;  %v123_v13 = vpack.c.bf16 %v83_v10, %v82_v9  ;;  %v86_v15 = vld [vmem:[#allocation2 + $0x190] sm:$0xff]  ;;  %v87_v16 = vld [vmem:[#allocation2 + $0x198] sm:$0xff] }
  0x26   :  { %v124_v14 = vpack.c.bf16 %v85_v12, %v84_v11  ;;  %v125_v19 = vpack.c.bf16 %v87_v16, %v86_v15  ;;  %v90_v21 = vld [vmem:[#allocation2 + $0x1b0] sm:$0xff]  ;;  %v91_v22 = vld [vmem:[#allocation2 + $0x1b8] sm:$0xff] }
  0x27   :  { %v127_v25 = vpack.c.bf16 %v91_v22, %v90_v21  ;;  %v94_v27 = vld [vmem:[#allocation2 + $0x1d0] sm:$0xff]  ;;  %v95_v28 = vld [vmem:[#allocation2 + $0x1d8] sm:$0xff] }
  0x28   :  { %v129_v31 = vpack.c.bf16 %v95_v28, %v94_v27  ;;  %v98_v33 = vld [vmem:[#allocation2 + $0x1f0] sm:$0xff]  ;;  %v99_v34 = vld [vmem:[#allocation2 + $0x1f8] sm:$0xff] }
  0x2c   :  { %3258 = vmatmul.mubr.msk.bf16.gmra.mrb[4].mxu0 %vm5803_vm0, %v103_v17  ;;  %v88_v17 = vld [vmem:[#allocation2 + $0x1a0] sm:$0xff] }
  0x2d   :  { %3261 = vmatprep.mubr.msk.bf16.mxu0 %vm5803_vm0, %v104_v18  ;;  %v89_v18 = vld [vmem:[#allocation2 + $0x1a8] sm:$0xff] }
  0x2e   :  { %v126_v20 = vpack.c.bf16 %v89_v18, %v88_v17 }
  0x34   :  { %3262 = vmatmul.mubr.msk.bf16.gmra.mrb[8].mxu0 %vm5803_vm0, %v105_v23  ;;  %v92_v23 = vld [vmem:[#allocation2 + $0x1c0] sm:$0xff] }
  0x35   :  { %3265 = vmatprep.mubr.msk.bf16.mxu0 %vm5803_vm0, %v106_v24  ;;  %v93_v24 = vld [vmem:[#allocation2 + $0x1c8] sm:$0xff] }
  0x36   :  { %v128_v26 = vpack.c.bf16 %v93_v24, %v92_v23 }
  0x3c   :  { %3266 = vmatmul.mubr.msk.bf16.gmra.mrb[12].mxu0 %vm5803_vm0, %v107_v29  ;;  %v96_v29 = vld [vmem:[#allocation2 + $0x1e0] sm:$0xff] }
  0x3d   :  { %3269 = vmatprep.mubr.msk.bf16.mxu0 %vm5803_vm0, %v108_v30  ;;  %v97_v30 = vld [vmem:[#allocation2 + $0x1e8] sm:$0xff] }
  0x3e   :  { %v130_v32 = vpack.c.bf16 %v97_v30, %v96_v29 }
  0x44   :  { %3270 = vmatmul.mubr.msk.bf16.gmra.mrb[16].mxu0 %vm5803_vm0, %v109_v35  ;;  %v131_v35 = vpack.c.bf16 %v99_v34, %v98_v33 }
  0x45   :  { %3273 = vmatprep.mubr.msk.bf16.mxu0 %vm5803_vm0, %v110_v36  ;;  %v3776_v36 = vld [vmem:[%s5690_s3] ss:$0 sm:$0xff] }
  0x4c   :  { %3274 = vmatmul.mubr.msk.bf16.gmra.mrb[20].mxu0 %vm5803_vm0, %v111_v41 }
  0x4d   :  { %3277 = vmatprep.mubr.msk.bf16.mxu0 %vm5803_vm0, %v112_v42 }
  0x54   :  { %3278 = vmatmul.mubr.msk.bf16.gmra.mrb[24].mxu0 %vm5803_vm0, %v113_v47 }
  0x55   :  { %3281 = vmatprep.mubr.msk.bf16.mxu0 %vm5803_vm0, %v114_v48 }
  0x5c   :  { %3282 = vmatmul.mubr.msk.bf16.gmra.mrb[28].mxu0 %vm5803_vm0, %v115_v53 }
  0x5d   :  { %3285 = vmatprep.mubr.msk.bf16.mxu0 %vm5803_vm0, %v116_v54 }
  0x64   :  { %3286 = vmatmul.mubr.msk.bf16.gmra.mrb[32].mxu0 %vm5803_vm0, %v117_v59 }
  0x65   :  { %3289 = vmatprep.mubr.msk.bf16.mxu0 %vm5803_vm0, %v118_v60 }
  0x6c   :  { %3290 = vmatmul.mubr.msk.bf16.gmra.mrb[36].mxu0 %vm5803_vm0, %v119_v1 }
  0x6d   :  { %3293 = vmatprep.mubr.msk.bf16.mxu0 %vm5803_vm0, %v120_v2 }
  0x74   :  { %3294 = vmatmul.mubr.msk.bf16.gmra.mrb[40].mxu0 %vm5803_vm0, %v121_v7 }
  0x75   :  { %3297 = vmatprep.mubr.msk.bf16.mxu0 %vm5803_vm0, %v122_v8 }
  0x7c   :  { %3298 = vmatmul.mubr.msk.bf16.gmra.mrb[44].mxu0 %vm5803_vm0, %v123_v13 }
  0x7d   :  { %3301 = vmatprep.mubr.msk.bf16.mxu0 %vm5803_vm0, %v124_v14 }
  0x84   :  { %3302 = vmatmul.mubr.msk.bf16.gmra.mrb[48].mxu0 %vm5803_vm0, %v125_v19 }
  0x85   :  { %3305 = vmatprep.mubr.msk.bf16.mxu0 %vm5803_vm0, %v126_v20 }
  0x8c   :  { %3306 = vmatmul.mubr.msk.bf16.gmra.mrb[52].mxu0 %vm5803_vm0, %v127_v25 }
  0x8d   :  { %3309 = vmatprep.mubr.msk.bf16.mxu0 %vm5803_vm0, %v128_v26 }
  0x94   :  { %3310 = vmatmul.mubr.msk.bf16.gmra.mrb[56].mxu0 %vm5803_vm0, %v129_v31 }
  0x95   :  { %3313 = vmatprep.mubr.msk.bf16.mxu0 %vm5803_vm0, %v130_v32 }
  0x9c   :  { %3314 = vmatmul.mubr.msk.bf16.gmra.mrb[60].mxu0 %vm5803_vm0, %v131_v35 }
  0xf7   :  { %v3255_v37 = vpop.f32.mrb[0].mxu0 }
  0xf8   :  { %v3779_v38 = vadd.f32 %v3255_v37, %v3776_v36  ;;  %v302_v39 = vpop.f32.mrb[1].mxu0 }
  0xf9   :  { %v3782_v40 = vadd.f32 %v3776_v36, %v302_v39  ;;  %v3256_v41 = vpop.f32.mrb[2].mxu0 }
  0xfa   :  { %561 = vmax.xlane.f32.xlu1 %v3779_v38  ;;  %v305_v42 = vpop.f32.mrb[3].mxu0  ;;  %v3787_v43 = vadd.f32 %v3256_v41, %v3776_v36 }
  0xfb   :  { %557 = vmax.xlane.f32.xlu0 %v3782_v40  ;;  %v3790_v44 = vadd.f32 %v3776_v36, %v305_v42 }
  0xfe   :  { %563 = vmax.xlane.f32.xlu1 %v3787_v43 }
  0xff   :  { %v3259_v45 = vpop.f32.mrb[4].mxu0  ;;  %559 = vmax.xlane.f32.xlu0 %v3790_v44 }
 0x100   :  { %v3795_v46 = vadd.f32 %v3259_v45, %v3776_v36  ;;  %v318_v47 = vpop.f32.mrb[5].mxu0 }
 0x101   :  { %v3260_v48 = vpop.f32.mrb[6].mxu0  ;;  %v3803_v51 = vadd.f32 %v3776_v36, %v318_v47 }
 0x102   :  { %v3798_v49 = vadd.f32 %v3260_v48, %v3776_v36  ;;  %v321_v50 = vpop.f32.mrb[7].mxu0 }
 0x103   :  { %569 = vmax.xlane.f32.xlu0 %v3795_v46  ;;  %v3806_v52 = vadd.f32 %v3776_v36, %v321_v50 }
 0x104   :  { %571 = vmax.xlane.f32.xlu1 %v3798_v49 }
 0x107   :  { %v3263_v53 = vpop.f32.mrb[8].mxu0  ;;  %565 = vmax.xlane.f32.xlu0 %v3803_v51 }
 0x108   :  { %v3810_v54 = vadd.f32 %v3263_v53, %v3776_v36  ;;  %v334_v55 = vpop.f32.mrb[9].mxu0  ;;  %567 = vmax.xlane.f32.xlu1 %v3806_v52 }
 0x109   :  { %v3264_v56 = vpop.f32.mrb[10].mxu0  ;;  %v3819_v59 = vadd.f32 %v3776_v36, %v334_v55 }
 0x10a   :  { %v3814_v57 = vadd.f32 %v3264_v56, %v3776_v36  ;;  %v337_v58 = vpop.f32.mrb[11].mxu0 }
 0x10b   :  { %577 = vmax.xlane.f32.xlu0 %v3810_v54  ;;  %v3822_v60 = vadd.f32 %v3776_v36, %v337_v58 }
 0x10c   :  { %579 = vmax.xlane.f32.xlu1 %v3814_v57 }
 0x10f   :  { %v3267_v61 = vpop.f32.mrb[12].mxu0  ;;  %573 = vmax.xlane.f32.xlu0 %v3819_v59 }
 0x110   :  { %v3826_v62 = vadd.f32 %v3267_v61, %v3776_v36  ;;  %v350_v63 = vpop.f32.mrb[13].mxu0  ;;  %575 = vmax.xlane.f32.xlu1 %v3822_v60 }
 0x111   :  { %v3268_v0 = vpop.f32.mrb[14].mxu0  ;;  %v3835_v3 = vadd.f32 %v3776_v36, %v350_v63 }
 0x112   :  { %v3830_v1 = vadd.f32 %v3268_v0, %v3776_v36  ;;  %v353_v2 = vpop.f32.mrb[15].mxu0 }
 0x113   :  { %585 = vmax.xlane.f32.xlu0 %v3826_v62  ;;  %v3838_v4 = vadd.f32 %v3776_v36, %v353_v2 }
 0x114   :  { %587 = vmax.xlane.f32.xlu1 %v3830_v1 }
 0x117   :  { %v3271_v5 = vpop.f32.mrb[16].mxu0  ;;  %581 = vmax.xlane.f32.xlu0 %v3835_v3 }
 0x118   :  { %v3842_v6 = vadd.f32 %v3271_v5, %v3776_v36  ;;  %v366_v7 = vpop.f32.mrb[17].mxu0  ;;  %583 = vmax.xlane.f32.xlu1 %v3838_v4 }
 0x119   :  { %v3272_v8 = vpop.f32.mrb[18].mxu0  ;;  %v3851_v11 = vadd.f32 %v3776_v36, %v366_v7 }
 0x11a   :  { %v3846_v9 = vadd.f32 %v3272_v8, %v3776_v36  ;;  %v369_v10 = vpop.f32.mrb[19].mxu0 }
 0x11b   :  { %593 = vmax.xlane.f32.xlu0 %v3842_v6  ;;  %v3854_v12 = vadd.f32 %v3776_v36, %v369_v10 }
 0x11c   :  { %595 = vmax.xlane.f32.xlu1 %v3846_v9 }
 0x11f   :  { %v3275_v13 = vpop.f32.mrb[20].mxu0  ;;  %589 = vmax.xlane.f32.xlu0 %v3851_v11 }
 0x120   :  { %v3858_v14 = vadd.f32 %v3275_v13, %v3776_v36  ;;  %v382_v15 = vpop.f32.mrb[21].mxu0  ;;  %591 = vmax.xlane.f32.xlu1 %v3854_v12 }
 0x121   :  { %v3276_v16 = vpop.f32.mrb[22].mxu0  ;;  %v3867_v19 = vadd.f32 %v3776_v36, %v382_v15 }
 0x122   :  { %v3862_v17 = vadd.f32 %v3276_v16, %v3776_v36  ;;  %v385_v18 = vpop.f32.mrb[23].mxu0 }
 0x123   :  { %601 = vmax.xlane.f32.xlu0 %v3858_v14  ;;  %v3870_v20 = vadd.f32 %v3776_v36, %v385_v18 }
 0x124   :  { %603 = vmax.xlane.f32.xlu1 %v3862_v17 }
 0x127   :  { %v3279_v21 = vpop.f32.mrb[24].mxu0  ;;  %597 = vmax.xlane.f32.xlu0 %v3867_v19 }
 0x128   :  { %v3874_v22 = vadd.f32 %v3279_v21, %v3776_v36  ;;  %v398_v23 = vpop.f32.mrb[25].mxu0  ;;  %599 = vmax.xlane.f32.xlu1 %v3870_v20 }
 0x129   :  { %v3280_v24 = vpop.f32.mrb[26].mxu0  ;;  %v3883_v27 = vadd.f32 %v3776_v36, %v398_v23 }
 0x12a   :  { %v3878_v25 = vadd.f32 %v3280_v24, %v3776_v36  ;;  %v401_v26 = vpop.f32.mrb[27].mxu0 }
 0x12b   :  { %609 = vmax.xlane.f32.xlu0 %v3874_v22  ;;  %v3886_v28 = vadd.f32 %v3776_v36, %v401_v26 }
 0x12c   :  { %611 = vmax.xlane.f32.xlu1 %v3878_v25 }
 0x12f   :  { %v3283_v29 = vpop.f32.mrb[28].mxu0  ;;  %605 = vmax.xlane.f32.xlu0 %v3883_v27 }
 0x130   :  { %v3890_v30 = vadd.f32 %v3283_v29, %v3776_v36  ;;  %v414_v31 = vpop.f32.mrb[29].mxu0  ;;  %607 = vmax.xlane.f32.xlu1 %v3886_v28 }
 0x131   :  { %v3284_v32 = vpop.f32.mrb[30].mxu0  ;;  %v3899_v35 = vadd.f32 %v3776_v36, %v414_v31 }
 0x132   :  { %v3894_v33 = vadd.f32 %v3284_v32, %v3776_v36  ;;  %v417_v34 = vpop.f32.mrb[31].mxu0 }
 0x133   :  { %617 = vmax.xlane.f32.xlu0 %v3890_v30  ;;  %v3902_v37 = vadd.f32 %v3776_v36, %v417_v34 }
 0x134   :  { %619 = vmax.xlane.f32.xlu1 %v3894_v33 }
 0x137   :  { %v3287_v39 = vpop.f32.mrb[32].mxu0  ;;  %613 = vmax.xlane.f32.xlu0 %v3899_v35 }
 0x138   :  { %v3906_v41 = vadd.f32 %v3287_v39, %v3776_v36  ;;  %v430_v42 = vpop.f32.mrb[33].mxu0  ;;  %615 = vmax.xlane.f32.xlu1 %v3902_v37 }
 0x139   :  { %v3288_v45 = vpop.f32.mrb[34].mxu0  ;;  %v3915_v50 = vadd.f32 %v3776_v36, %v430_v42 }
 0x13a   :  { %v3910_v47 = vadd.f32 %v3288_v45, %v3776_v36  ;;  %v433_v48 = vpop.f32.mrb[35].mxu0 }
 0x13b   :  { %625 = vmax.xlane.f32.xlu0 %v3906_v41  ;;  %v3918_v53 = vadd.f32 %v3776_v36, %v433_v48 }
 0x13c   :  { %627 = vmax.xlane.f32.xlu1 %v3910_v47 }
 0x13f   :  { %v3291_v55 = vpop.f32.mrb[36].mxu0  ;;  %621 = vmax.xlane.f32.xlu0 %v3915_v50 }
 0x140   :  { %v3922_v56 = vadd.f32 %v3291_v55, %v3776_v36  ;;  %v446_v58 = vpop.f32.mrb[37].mxu0  ;;  %623 = vmax.xlane.f32.xlu1 %v3918_v53 }
 0x141   :  { %v3292_v61 = vpop.f32.mrb[38].mxu0  ;;  %v3931_v2 = vadd.f32 %v3776_v36, %v446_v58 }
 0x142   :  { %v3926_v63 = vadd.f32 %v3292_v61, %v3776_v36  ;;  %v449_v0 = vpop.f32.mrb[39].mxu0 }
 0x143   :  { %633 = vmax.xlane.f32.xlu0 %v3922_v56  ;;  %v3934_v5 = vadd.f32 %v3776_v36, %v449_v0 }
 0x144   :  { %635 = vmax.xlane.f32.xlu1 %v3926_v63 }
 0x147   :  { %v3295_v7 = vpop.f32.mrb[40].mxu0  ;;  %629 = vmax.xlane.f32.xlu0 %v3931_v2 }
 0x148   :  { %v3938_v8 = vadd.f32 %v3295_v7, %v3776_v36  ;;  %v462_v10 = vpop.f32.mrb[41].mxu0  ;;  %631 = vmax.xlane.f32.xlu1 %v3934_v5 }
 0x149   :  { %v3296_v13 = vpop.f32.mrb[42].mxu0  ;;  %v3947_v18 = vadd.f32 %v3776_v36, %v462_v10 }
 0x14a   :  { %v3942_v15 = vadd.f32 %v3296_v13, %v3776_v36  ;;  %v465_v16 = vpop.f32.mrb[43].mxu0 }
 0x14b   :  { %641 = vmax.xlane.f32.xlu0 %v3938_v8  ;;  %v3950_v21 = vadd.f32 %v3776_v36, %v465_v16 }
 0x14c   :  { %643 = vmax.xlane.f32.xlu1 %v3942_v15 }
 0x14f   :  { %v3299_v23 = vpop.f32.mrb[44].mxu0  ;;  %637 = vmax.xlane.f32.xlu0 %v3947_v18 }
 0x150   :  { %v3954_v24 = vadd.f32 %v3299_v23, %v3776_v36  ;;  %v478_v26 = vpop.f32.mrb[45].mxu0  ;;  %639 = vmax.xlane.f32.xlu1 %v3950_v21 }
 0x151   :  { %v3300_v29 = vpop.f32.mrb[46].mxu0  ;;  %v3963_v34 = vadd.f32 %v3776_v36, %v478_v26 }
 0x152   :  { %v3958_v31 = vadd.f32 %v3300_v29, %v3776_v36  ;;  %v481_v32 = vpop.f32.mrb[47].mxu0 }
 0x153   :  { %649 = vmax.xlane.f32.xlu0 %v3954_v24  ;;  %v3966_v39 = vadd.f32 %v3776_v36, %v481_v32 }
 0x154   :  { %651 = vmax.xlane.f32.xlu1 %v3958_v31 }
 0x157   :  { %v3303_v42 = vpop.f32.mrb[48].mxu0  ;;  %645 = vmax.xlane.f32.xlu0 %v3963_v34 }
 0x158   :  { %v3970_v45 = vadd.f32 %v3303_v42, %v3776_v36  ;;  %v494_v48 = vpop.f32.mrb[49].mxu0  ;;  %647 = vmax.xlane.f32.xlu1 %v3966_v39 }
 0x159   :  { %v3304_v55 = vpop.f32.mrb[50].mxu0  ;;  %v3979_v0 = vadd.f32 %v3776_v36, %v494_v48 }
 0x15a   :  { %v3974_v58 = vadd.f32 %v3304_v55, %v3776_v36  ;;  %v497_v61 = vpop.f32.mrb[51].mxu0 }
 0x15b   :  { %657 = vmax.xlane.f32.xlu0 %v3970_v45  ;;  %v3982_v7 = vadd.f32 %v3776_v36, %v497_v61 }
 0x15c   :  { %659 = vmax.xlane.f32.xlu1 %v3974_v58 }
 0x15f   :  { %v3307_v10 = vpop.f32.mrb[52].mxu0  ;;  %653 = vmax.xlane.f32.xlu0 %v3979_v0 }
 0x160   :  { %v3986_v13 = vadd.f32 %v3307_v10, %v3776_v36  ;;  %v510_v16 = vpop.f32.mrb[53].mxu0  ;;  %655 = vmax.xlane.f32.xlu1 %v3982_v7 }
 0x161   :  { %v3308_v23 = vpop.f32.mrb[54].mxu0  ;;  %v3993_v32 = vadd.f32 %v3776_v36, %v510_v16 }
 0x162   :  { %5810 = vst [vmem:[#allocation8_spill] sm:$0xff] %v3986_v13  ;;  %v3990_v26 = vadd.f32 %v3308_v23, %v3776_v36  ;;  %v513_v29 = vpop.f32.mrb[55].mxu0 }
 0x163   :  { %5812 = vst [vmem:[#allocation10_spill] sm:$0xff] %v3993_v32  ;;  %665 = vmax.xlane.f32.xlu0 %v3986_v13  ;;  %v3998_v42 = vadd.f32 %v3776_v36, %v513_v29 }
 0x164   :  { %5811 = vst [vmem:[#allocation9_spill] sm:$0xff] %v3990_v26  ;;  %667 = vmax.xlane.f32.xlu1 %v3990_v26 }
 0x165   :  { %5813 = vst [vmem:[#allocation11_spill] sm:$0xff] %v3998_v42 }
 0x167   :  { %v3311_v48 = vpop.f32.mrb[56].mxu0  ;;  %661 = vmax.xlane.f32.xlu0 %v3993_v32 }
 0x168   :  { %v4002_v55 = vadd.f32 %v3311_v48, %v3776_v36  ;;  %v526_v61 = vpop.f32.mrb[57].mxu0  ;;  %663 = vmax.xlane.f32.xlu1 %v3998_v42 }
 0x169   :  { %v3312_v10 = vpop.f32.mrb[58].mxu0  ;;  %v4009_v13 = vadd.f32 %v3776_v36, %v526_v61 }
 0x16a   :  { %5814 = vst [vmem:[#allocation12_spill] sm:$0xff] %v4002_v55  ;;  %v4006_v16 = vadd.f32 %v3312_v10, %v3776_v36  ;;  %v529_v23 = vpop.f32.mrb[59].mxu0 }
 0x16b   :  { %5815 = vst [vmem:[#allocation13_spill] sm:$0xff] %v4009_v13  ;;  %673 = vmax.xlane.f32.xlu0 %v4002_v55  ;;  %v4014_v29 = vadd.f32 %v3776_v36, %v529_v23 }
 0x16c   :  { %675 = vmax.xlane.f32.xlu1 %v4006_v16 }
 0x16d   :  { %5816 = vst [vmem:[#allocation14_spill] sm:$0xff] %v4014_v29 }
 0x16f   :  { %v3315_v48 = vpop.f32.mrb[60].mxu0  ;;  %669 = vmax.xlane.f32.xlu0 %v4009_v13 }
 0x170   :  { %v4018_v42 = vadd.f32 %v3315_v48, %v3776_v36  ;;  %v542_v32 = vpop.f32.mrb[61].mxu0  ;;  %671 = vmax.xlane.f32.xlu1 %v4014_v29  ;;  %v5703_v48 = vlaneseq }
 0x171   :  { %v3316_v10 = vpop.f32.mrb[62].mxu0  ;;  %v4025_v55 = vadd.f32 %v3776_v36, %v542_v32 }
 0x172   :  { %v4022_v61 = vadd.f32 %v3316_v10, %v3776_v36  ;;  %v545_v26 = vpop.f32.mrb[63].mxu0  ;;  %v4035_v29 = vand.u32 127, %v5703_v48 }
 0x173   :  { %5818 = vst [vmem:[#allocation16_spill] sm:$0xff] %v4025_v55  ;;  %681 = vmax.xlane.f32.xlu0 %v4018_v42  ;;  %v4030_v23 = vadd.f32 %v3776_v36, %v545_v26 }
 0x174   :  { %5817 = vst [vmem:[#allocation15_spill] sm:$0xff] %v4022_v61  ;;  %683 = vmax.xlane.f32.xlu1 %v4022_v61  ;;  %5820 = vst [vmem:[#allocation18_spill] sm:$0xff] %v4035_v29 }
 0x175   :  { %5819 = vst [vmem:[#allocation17_spill] sm:$0xff] %v4030_v23 }
 0x177   :  { %677 = vmax.xlane.f32.xlu0 %v4025_v55 }
 0x178   :  { %679 = vmax.xlane.f32.xlu1 %v4030_v23 }
 0x187   :  { %v562_v10 = vpop.xlane.xlu1 %561 }
 0x188   :  { %vm689_vm1 = vcmp.ge.f32.partialorder %v3779_v38, %v562_v10  ;;  %v558_v32 = vpop.xlane.xlu0 %557 }
 0x189   :  { %v4039_v13 = vsel %vm689_vm1, %v4035_v29, 128  ;;  %vm687_vm2 = vcmp.ge.f32.partialorder %v3782_v40, %v558_v32 }
 0x18a   :  { %5821 = vst [vmem:[#allocation19_spill] sm:$0xff] %v4039_v13  ;;  %v4043_v36 = vsel %vm687_vm2, %v4035_v29, 128  ;;  %v844_v26 = vshra.s32 %v4039_v13, 16 }
 0x18b   :  { %5822 = vst [vmem:[#allocation20_spill] sm:$0xff] %v4043_v36  ;;  %v564_v55 = vpop.xlane.xlu1 %563  ;;  %v816_v61 = vshra.s32 %v4043_v36, 16 }
 0x18c   :  { %vm690_vm3 = vcmp.ge.f32.partialorder %v3787_v43, %v564_v55  ;;  %v560_v23 = vpop.xlane.xlu0 %559  ;;  %v4047_v48 = vcvt.s32.f32 %v844_v26 }
 0x18d   :  { %v4051_v38 = vsel %vm690_vm3, %v4035_v29, 128  ;;  %vm688_vm4 = vcmp.ge.f32.partialorder %v3790_v44, %v560_v23  ;;  %v4061_v43 = vcvt.s32.f32 %v816_v61 }
 0x18e   :  { %v4055_v40 = vsel %vm688_vm4, %v4035_v29, 128  ;;  %847 = vmin.xlane.f32.xlu0 %v4047_v48  ;;  %v858_v10 = vshra.s32 %v4051_v38, 16 }
 0x18f   :  { %5823 = vst [vmem:[#allocation21_spill] sm:$0xff] %v4055_v40  ;;  %5824 = vst [vmem:[#allocation22_spill] sm:$0xff] %v4061_v43  ;;  %v830_v55 = vshra.s32 %v4055_v40, 16 }
 0x190   :  { %v570_v32 = vpop.xlane.xlu0 %569  ;;  %v4059_v13 = vcvt.s32.f32 %v858_v10 }
 0x191   :  { %vm693_vm5 = vcmp.ge.f32.partialorder %v3795_v46, %v570_v32  ;;  %v572_v26 = vpop.xlane.xlu1 %571  ;;  %v4075_v10 = vcvt.s32.f32 %v830_v55 }
 0x192   :  { %v4066_v36 = vsel %vm693_vm5, %v4035_v29, 128  ;;  %vm694_vm6 = vcmp.ge.f32.partialorder %v3798_v49, %v572_v26  ;;  %861 = vmin.xlane.f32.xlu1 %v4059_v13  ;;  %819 = vmin.xlane.f32.xlu0 %v4061_v43 }
 0x193   :  { %v4072_v44 = vsel %vm694_vm6, %v4035_v29, 128  ;;  %v900_v61 = vshra.s32 %v4066_v36, 16 }
 0x194   :  { %5825 = vst [vmem:[#allocation23_spill] sm:$0xff] %v4072_v44  ;;  %v566_v23 = vpop.xlane.xlu0 %565  ;;  %v914_v46 = vshra.s32 %v4072_v44, 16 }
 0x195   :  { %vm691_vm7 = vcmp.ge.f32.partialorder %v3803_v51, %v566_v23  ;;  %v568_v32 = vpop.xlane.xlu1 %567  ;;  %v4079_v40 = vcvt.s32.f32 %v900_v61 }
 0x196   :  { %v4082_v49 = vsel %vm691_vm7, %v4035_v29, 128  ;;  %vm692_vm8 = vcmp.ge.f32.partialorder %v3806_v52, %v568_v32  ;;  %833 = vmin.xlane.f32.xlu1 %v4075_v10  ;;  %v4091_v43 = vcvt.s32.f32 %v914_v46 }
 0x197   :  { %5826 = vst [vmem:[#allocation24_spill] sm:$0xff] %v4079_v40  ;;  %v4087_v26 = vsel %vm692_vm8, %v4035_v29, 128  ;;  %903 = vmin.xlane.f32.xlu0 %v4079_v40  ;;  %v872_v55 = vshra.s32 %v4082_v49, 16 }
 0x198   :  { %5827 = vst [vmem:[#allocation25_spill] sm:$0xff] %v4087_v26  ;;  %v578_v44 = vpop.xlane.xlu0 %577  ;;  %v886_v51 = vshra.s32 %v4087_v26, 16 }
 0x199   :  { %vm697_vm9 = vcmp.ge.f32.partialorder %v3810_v54, %v578_v44  ;;  %v580_v61 = vpop.xlane.xlu1 %579  ;;  %v4095_v23 = vcvt.s32.f32 %v872_v55 }
 0x19a   :  { %v4098_v52 = vsel %vm697_vm9, %v4035_v29, 128  ;;  %vm698_vm10 = vcmp.ge.f32.partialorder %v3814_v57, %v580_v61  ;;  %917 = vmin.xlane.f32.xlu1 %v4091_v43  ;;  %v4107_v40 = vcvt.s32.f32 %v886_v51 }
 0x19b   :  { %5828 = vst [vmem:[#allocation26_spill] sm:$0xff] %v4095_v23  ;;  %v4103_v32 = vsel %vm698_vm10, %v4035_v29, 128  ;;  %875 = vmin.xlane.f32.xlu0 %v4095_v23  ;;  %v956_v46 = vshra.s32 %v4098_v52, 16 }
 0x19c   :  { %5829 = vst [vmem:[#allocation27_spill] sm:$0xff] %v4103_v32  ;;  %v574_v26 = vpop.xlane.xlu0 %573  ;;  %v970_v54 = vshra.s32 %v4103_v32, 16 }
 0x19d   :  { %vm695_vm11 = vcmp.ge.f32.partialorder %v3819_v59, %v574_v26  ;;  %v576_v44 = vpop.xlane.xlu1 %575  ;;  %v4111_v55 = vcvt.s32.f32 %v956_v46 }
 0x19e   :  { %v4114_v57 = vsel %vm695_vm11, %v4035_v29, 128  ;;  %vm696_vm12 = vcmp.ge.f32.partialorder %v3822_v60, %v576_v44  ;;  %889 = vmin.xlane.f32.xlu1 %v4107_v40  ;;  %v4123_v23 = vcvt.s32.f32 %v970_v54 }
 0x19f   :  { %5830 = vst [vmem:[#allocation28_spill] sm:$0xff] %v4111_v55  ;;  %v4119_v61 = vsel %vm696_vm12, %v4035_v29, 128  ;;  %959 = vmin.xlane.f32.xlu0 %v4111_v55  ;;  %v928_v51 = vshra.s32 %v4114_v57, 16 }
 0x1a0   :  { %5831 = vst [vmem:[#allocation29_spill] sm:$0xff] %v4119_v61  ;;  %v586_v32 = vpop.xlane.xlu0 %585  ;;  %v942_v59 = vshra.s32 %v4119_v61, 16 }
 0x1a1   :  { %vm701_vm13 = vcmp.ge.f32.partialorder %v3826_v62, %v586_v32  ;;  %v588_v26 = vpop.xlane.xlu1 %587  ;;  %v4127_v46 = vcvt.s32.f32 %v928_v51 }
 0x1a2   :  { %v4130_v60 = vsel %vm701_vm13, %v4035_v29, 128  ;;  %vm702_vm14 = vcmp.ge.f32.partialorder %v3830_v1, %v588_v26  ;;  %973 = vmin.xlane.f32.xlu1 %v4123_v23  ;;  %v4139_v55 = vcvt.s32.f32 %v942_v59 }
 0x1a3   :  { %5832 = vst [vmem:[#allocation30_spill] sm:$0xff] %v4127_v46  ;;  %v4135_v44 = vsel %vm702_vm14, %v4035_v29, 128  ;;  %931 = vmin.xlane.f32.xlu0 %v4127_v46  ;;  %v1012_v54 = vshra.s32 %v4130_v60, 16 }
 0x1a4   :  { %5833 = vst [vmem:[#allocation31_spill] sm:$0xff] %v4135_v44  ;;  %v582_v61 = vpop.xlane.xlu0 %581  ;;  %v1026_v62 = vshra.s32 %v4135_v44, 16 }
 0x1a5   :  { %vm699_vm15 = vcmp.ge.f32.partialorder %v3835_v3, %v582_v61  ;;  %v584_v32 = vpop.xlane.xlu1 %583  ;;  %v4143_v51 = vcvt.s32.f32 %v1012_v54 }
 0x1a6   :  { %v4146_v1 = vsel %vm699_vm15, %v4035_v29, 128  ;;  %vm700_vm1 = vcmp.ge.f32.partialorder %v3838_v4, %v584_v32  ;;  %945 = vmin.xlane.f32.xlu1 %v4139_v55  ;;  %v4155_v46 = vcvt.s32.f32 %v1026_v62 }
 0x1a7   :  { %5834 = vst [vmem:[#allocation32_spill] sm:$0xff] %v4143_v51  ;;  %v4151_v26 = vsel %vm700_vm1, %v4035_v29, 128  ;;  %1015 = vmin.xlane.f32.xlu0 %v4143_v51  ;;  %v984_v59 = vshra.s32 %v4146_v1, 16 }
 0x1a8   :  { %5835 = vst [vmem:[#allocation33_spill] sm:$0xff] %v4151_v26  ;;  %v594_v44 = vpop.xlane.xlu0 %593  ;;  %v998_v3 = vshra.s32 %v4151_v26, 16 }
 0x1a9   :  { %vm705_vm2 = vcmp.ge.f32.partialorder %v3842_v6, %v594_v44  ;;  %v596_v61 = vpop.xlane.xlu1 %595  ;;  %v4159_v54 = vcvt.s32.f32 %v984_v59 }
 0x1aa   :  { %v4162_v4 = vsel %vm705_vm2, %v4035_v29, 128  ;;  %vm706_vm3 = vcmp.ge.f32.partialorder %v3846_v9, %v596_v61  ;;  %1029 = vmin.xlane.f32.xlu1 %v4155_v46  ;;  %v4171_v51 = vcvt.s32.f32 %v998_v3 }
 0x1ab   :  { %5836 = vst [vmem:[#allocation34_spill] sm:$0xff] %v4159_v54  ;;  %v4167_v32 = vsel %vm706_vm3, %v4035_v29, 128  ;;  %987 = vmin.xlane.f32.xlu0 %v4159_v54  ;;  %v1068_v62 = vshra.s32 %v4162_v4, 16 }
 0x1ac   :  { %5837 = vst [vmem:[#allocation35_spill] sm:$0xff] %v4167_v32  ;;  %v590_v26 = vpop.xlane.xlu0 %589  ;;  %v1082_v6 = vshra.s32 %v4167_v32, 16 }
 0x1ad   :  { %vm703_vm4 = vcmp.ge.f32.partialorder %v3851_v11, %v590_v26  ;;  %v592_v44 = vpop.xlane.xlu1 %591  ;;  %v4175_v59 = vcvt.s32.f32 %v1068_v62 }
 0x1ae   :  { %v4178_v9 = vsel %vm703_vm4, %v4035_v29, 128  ;;  %vm704_vm5 = vcmp.ge.f32.partialorder %v3854_v12, %v592_v44  ;;  %1001 = vmin.xlane.f32.xlu1 %v4171_v51  ;;  %v4187_v54 = vcvt.s32.f32 %v1082_v6 }
 0x1af   :  { %5838 = vst [vmem:[#allocation36_spill] sm:$0xff] %v4175_v59  ;;  %v4183_v61 = vsel %vm704_vm5, %v4035_v29, 128  ;;  %1071 = vmin.xlane.f32.xlu0 %v4175_v59  ;;  %v1040_v3 = vshra.s32 %v4178_v9, 16 }
 0x1b0   :  { %5839 = vst [vmem:[#allocation37_spill] sm:$0xff] %v4183_v61  ;;  %v602_v32 = vpop.xlane.xlu0 %601  ;;  %v1054_v11 = vshra.s32 %v4183_v61, 16 }
 0x1b1   :  { %vm709_vm6 = vcmp.ge.f32.partialorder %v3858_v14, %v602_v32  ;;  %v604_v26 = vpop.xlane.xlu1 %603  ;;  %v4191_v62 = vcvt.s32.f32 %v1040_v3 }
 0x1b2   :  { %v4194_v12 = vsel %vm709_vm6, %v4035_v29, 128  ;;  %vm710_vm7 = vcmp.ge.f32.partialorder %v3862_v17, %v604_v26  ;;  %1085 = vmin.xlane.f32.xlu1 %v4187_v54  ;;  %v4203_v59 = vcvt.s32.f32 %v1054_v11 }
 0x1b3   :  { %5840 = vst [vmem:[#allocation38_spill] sm:$0xff] %v4191_v62  ;;  %v4199_v44 = vsel %vm710_vm7, %v4035_v29, 128  ;;  %1043 = vmin.xlane.f32.xlu0 %v4191_v62  ;;  %v1124_v6 = vshra.s32 %v4194_v12, 16 }
 0x1b4   :  { %5841 = vst [vmem:[#allocation39_spill] sm:$0xff] %v4199_v44  ;;  %v598_v61 = vpop.xlane.xlu0 %597  ;;  %v1138_v14 = vshra.s32 %v4199_v44, 16 }
 0x1b5   :  { %vm707_vm8 = vcmp.ge.f32.partialorder %v3867_v19, %v598_v61  ;;  %v600_v32 = vpop.xlane.xlu1 %599  ;;  %v4207_v3 = vcvt.s32.f32 %v1124_v6 }
 0x1b6   :  { %v4210_v17 = vsel %vm707_vm8, %v4035_v29, 128  ;;  %vm708_vm9 = vcmp.ge.f32.partialorder %v3870_v20, %v600_v32  ;;  %1057 = vmin.xlane.f32.xlu1 %v4203_v59  ;;  %v4219_v62 = vcvt.s32.f32 %v1138_v14 }
 0x1b7   :  { %5842 = vst [vmem:[#allocation40_spill] sm:$0xff] %v4207_v3  ;;  %v4215_v26 = vsel %vm708_vm9, %v4035_v29, 128  ;;  %1127 = vmin.xlane.f32.xlu0 %v4207_v3  ;;  %v1096_v11 = vshra.s32 %v4210_v17, 16 }
 0x1b8   :  { %5843 = vst [vmem:[#allocation41_spill] sm:$0xff] %v4215_v26  ;;  %v610_v44 = vpop.xlane.xlu0 %609  ;;  %v1110_v19 = vshra.s32 %v4215_v26, 16 }
 0x1b9   :  { %vm713_vm10 = vcmp.ge.f32.partialorder %v3874_v22, %v610_v44  ;;  %v612_v61 = vpop.xlane.xlu1 %611  ;;  %v4223_v6 = vcvt.s32.f32 %v1096_v11 }
 0x1ba   :  { %v4226_v20 = vsel %vm713_vm10, %v4035_v29, 128  ;;  %vm714_vm11 = vcmp.ge.f32.partialorder %v3878_v25, %v612_v61  ;;  %1141 = vmin.xlane.f32.xlu1 %v4219_v62  ;;  %v4235_v3 = vcvt.s32.f32 %v1110_v19 }
 0x1bb   :  { %5844 = vst [vmem:[#allocation42_spill] sm:$0xff] %v4223_v6  ;;  %v4231_v32 = vsel %vm714_vm11, %v4035_v29, 128  ;;  %1099 = vmin.xlane.f32.xlu0 %v4223_v6  ;;  %v1180_v14 = vshra.s32 %v4226_v20, 16 }
 0x1bc   :  { %5845 = vst [vmem:[#allocation43_spill] sm:$0xff] %v4231_v32  ;;  %v606_v26 = vpop.xlane.xlu0 %605  ;;  %v1194_v22 = vshra.s32 %v4231_v32, 16 }
 0x1bd   :  { %vm711_vm12 = vcmp.ge.f32.partialorder %v3883_v27, %v606_v26  ;;  %v608_v44 = vpop.xlane.xlu1 %607  ;;  %v4239_v11 = vcvt.s32.f32 %v1180_v14 }
 0x1be   :  { %v4242_v25 = vsel %vm711_vm12, %v4035_v29, 128  ;;  %vm712_vm13 = vcmp.ge.f32.partialorder %v3886_v28, %v608_v44  ;;  %1113 = vmin.xlane.f32.xlu1 %v4235_v3  ;;  %v4251_v6 = vcvt.s32.f32 %v1194_v22 }
 0x1bf   :  { %5846 = vst [vmem:[#allocation44_spill] sm:$0xff] %v4239_v11  ;;  %v4247_v61 = vsel %vm712_vm13, %v4035_v29, 128  ;;  %1183 = vmin.xlane.f32.xlu0 %v4239_v11  ;;  %v1152_v19 = vshra.s32 %v4242_v25, 16 }
 0x1c0   :  { %5847 = vst [vmem:[#allocation45_spill] sm:$0xff] %v4247_v61  ;;  %v618_v32 = vpop.xlane.xlu0 %617  ;;  %v1166_v27 = vshra.s32 %v4247_v61, 16 }
 0x1c1   :  { %vm717_vm14 = vcmp.ge.f32.partialorder %v3890_v30, %v618_v32  ;;  %v620_v26 = vpop.xlane.xlu1 %619  ;;  %v4255_v14 = vcvt.s32.f32 %v1152_v19 }
 0x1c2   :  { %v4258_v28 = vsel %vm717_vm14, %v4035_v29, 128  ;;  %vm718_vm15 = vcmp.ge.f32.partialorder %v3894_v33, %v620_v26  ;;  %1197 = vmin.xlane.f32.xlu1 %v4251_v6  ;;  %v4267_v11 = vcvt.s32.f32 %v1166_v27 }
 0x1c3   :  { %5848 = vst [vmem:[#allocation46_spill] sm:$0xff] %v4255_v14  ;;  %v4263_v44 = vsel %vm718_vm15, %v4035_v29, 128  ;;  %1155 = vmin.xlane.f32.xlu0 %v4255_v14  ;;  %v1236_v22 = vshra.s32 %v4258_v28, 16 }
 0x1c4   :  { %5849 = vst [vmem:[#allocation47_spill] sm:$0xff] %v4263_v44  ;;  %v614_v61 = vpop.xlane.xlu0 %613  ;;  %v1250_v30 = vshra.s32 %v4263_v44, 16 }
 0x1c5   :  { %vm715_vm1 = vcmp.ge.f32.partialorder %v3899_v35, %v614_v61  ;;  %v616_v32 = vpop.xlane.xlu1 %615  ;;  %v4271_v19 = vcvt.s32.f32 %v1236_v22 }
 0x1c6   :  { %v4274_v33 = vsel %vm715_vm1, %v4035_v29, 128  ;;  %vm716_vm2 = vcmp.ge.f32.partialorder %v3902_v37, %v616_v32  ;;  %1169 = vmin.xlane.f32.xlu1 %v4267_v11  ;;  %v4283_v14 = vcvt.s32.f32 %v1250_v30 }
 0x1c7   :  { %5850 = vst [vmem:[#allocation48_spill] sm:$0xff] %v4271_v19  ;;  %v4279_v26 = vsel %vm716_vm2, %v4035_v29, 128  ;;  %1239 = vmin.xlane.f32.xlu0 %v4271_v19  ;;  %v1208_v27 = vshra.s32 %v4274_v33, 16 }
 0x1c8   :  { %5851 = vst [vmem:[#allocation49_spill] sm:$0xff] %v4279_v26  ;;  %v626_v44 = vpop.xlane.xlu0 %625  ;;  %v1222_v35 = vshra.s32 %v4279_v26, 16 }
 0x1c9   :  { %vm721_vm3 = vcmp.ge.f32.partialorder %v3906_v41, %v626_v44  ;;  %v628_v61 = vpop.xlane.xlu1 %627  ;;  %v4287_v22 = vcvt.s32.f32 %v1208_v27 }
 0x1ca   :  { %v4290_v37 = vsel %vm721_vm3, %v4035_v29, 128  ;;  %vm722_vm4 = vcmp.ge.f32.partialorder %v3910_v47, %v628_v61  ;;  %1253 = vmin.xlane.f32.xlu1 %v4283_v14  ;;  %v4299_v19 = vcvt.s32.f32 %v1222_v35 }
 0x1cb   :  { %5852 = vst [vmem:[#allocation50_spill] sm:$0xff] %v4287_v22  ;;  %v4295_v32 = vsel %vm722_vm4, %v4035_v29, 128  ;;  %1211 = vmin.xlane.f32.xlu0 %v4287_v22  ;;  %v1292_v30 = vshra.s32 %v4290_v37, 16 }
 0x1cc   :  { %5853 = vst [vmem:[#allocation51_spill] sm:$0xff] %v4295_v32  ;;  %v622_v26 = vpop.xlane.xlu0 %621  ;;  %v1306_v41 = vshra.s32 %v4295_v32, 16 }
 0x1cd   :  { %vm719_vm5 = vcmp.ge.f32.partialorder %v3915_v50, %v622_v26  ;;  %v624_v44 = vpop.xlane.xlu1 %623  ;;  %v4303_v27 = vcvt.s32.f32 %v1292_v30 }
 0x1ce   :  { %v4306_v47 = vsel %vm719_vm5, %v4035_v29, 128  ;;  %vm720_vm6 = vcmp.ge.f32.partialorder %v3918_v53, %v624_v44  ;;  %1225 = vmin.xlane.f32.xlu1 %v4299_v19  ;;  %v4316_v26 = vcvt.s32.f32 %v1306_v41 }
 0x1cf   :  { %5854 = vst [vmem:[#allocation52_spill] sm:$0xff] %v4303_v27  ;;  %v1264_v61 = vshra.s32 %v4306_v47, 16  ;;  %v4312_v22 = vsel %vm720_vm6, %v4035_v29, 128  ;;  %1295 = vmin.xlane.f32.xlu0 %v4303_v27 }
 0x1d0   :  { %5855 = vst [vmem:[#allocation53_spill] sm:$0xff] %v4312_v22  ;;  %v1278_v35 = vshra.s32 %v4312_v22, 16  ;;  %v634_v50 = vpop.xlane.xlu0 %633 }
 0x1d1   :  { %vm725_vm7 = vcmp.ge.f32.partialorder %v3922_v56, %v634_v50  ;;  %v636_v30 = vpop.xlane.xlu1 %635  ;;  %v4319_v32 = vcvt.s32.f32 %v1264_v61 }
 0x1d2   :  { %v4322_v53 = vsel %vm725_vm7, %v4035_v29, 128  ;;  %vm726_vm8 = vcmp.ge.f32.partialorder %v3926_v63, %v636_v30  ;;  %1309 = vmin.xlane.f32.xlu1 %v4316_v26  ;;  %v4332_v50 = vcvt.s32.f32 %v1278_v35 }
 0x1d3   :  { %5856 = vst [vmem:[#allocation54_spill] sm:$0xff] %v4319_v32  ;;  %v1348_v44 = vshra.s32 %v4322_v53, 16  ;;  %v4328_v27 = vsel %vm726_vm8, %v4035_v29, 128  ;;  %1267 = vmin.xlane.f32.xlu0 %v4319_v32 }
 0x1d4   :  { %5857 = vst [vmem:[#allocation55_spill] sm:$0xff] %v4328_v27  ;;  %v1362_v41 = vshra.s32 %v4328_v27, 16  ;;  %v630_v56 = vpop.xlane.xlu0 %629 }
 0x1d5   :  { %vm723_vm9 = vcmp.ge.f32.partialorder %v3931_v2, %v630_v56  ;;  %v632_v61 = vpop.xlane.xlu1 %631  ;;  %v4335_v22 = vcvt.s32.f32 %v1348_v44 }
 0x1d6   :  { %v4338_v63 = vsel %vm723_vm9, %v4035_v29, 128  ;;  %vm724_vm10 = vcmp.ge.f32.partialorder %v3934_v5, %v632_v61  ;;  %1281 = vmin.xlane.f32.xlu1 %v4332_v50  ;;  %v4348_v56 = vcvt.s32.f32 %v1362_v41 }
 0x1d7   :  { %5858 = vst [vmem:[#allocation56_spill] sm:$0xff] %v4335_v22  ;;  %v1320_v30 = vshra.s32 %v4338_v63, 16  ;;  %v4344_v32 = vsel %vm724_vm10, %v4035_v29, 128  ;;  %1351 = vmin.xlane.f32.xlu0 %v4335_v22 }
 0x1d8   :  { %5859 = vst [vmem:[#allocation57_spill] sm:$0xff] %v4344_v32  ;;  %v1334_v35 = vshra.s32 %v4344_v32, 16  ;;  %v642_v2 = vpop.xlane.xlu0 %641 }
 0x1d9   :  { %vm729_vm11 = vcmp.ge.f32.partialorder %v3938_v8, %v642_v2  ;;  %v644_v44 = vpop.xlane.xlu1 %643  ;;  %v4351_v27 = vcvt.s32.f32 %v1320_v30 }
 0x1da   :  { %v4354_v5 = vsel %vm729_vm11, %v4035_v29, 128  ;;  %vm730_vm12 = vcmp.ge.f32.partialorder %v3942_v15, %v644_v44  ;;  %1365 = vmin.xlane.f32.xlu1 %v4348_v56  ;;  %v4364_v2 = vcvt.s32.f32 %v1334_v35 }
 0x1db   :  { %5860 = vst [vmem:[#allocation58_spill] sm:$0xff] %v4354_v5  ;;  %v1404_v61 = vshra.s32 %v4354_v5, 16  ;;  %v4360_v22 = vsel %vm730_vm12, %v4035_v29, 128  ;;  %1323 = vmin.xlane.f32.xlu0 %v4351_v27 }
 0x1dc   :  { %5861 = vst [vmem:[#allocation59_spill] sm:$0xff] %v4360_v22  ;;  %v1418_v41 = vshra.s32 %v4360_v22, 16  ;;  %v638_v8 = vpop.xlane.xlu0 %637 }
 0x1dd   :  { %vm727_vm13 = vcmp.ge.f32.partialorder %v3947_v18, %v638_v8  ;;  %v640_v30 = vpop.xlane.xlu1 %639  ;;  %v4367_v32 = vcvt.s32.f32 %v1404_v61 }
 0x1de   :  { %v4370_v15 = vsel %vm727_vm13, %v4035_v29, 128  ;;  %vm728_vm14 = vcmp.ge.f32.partialorder %v3950_v21, %v640_v30  ;;  %1337 = vmin.xlane.f32.xlu1 %v4364_v2  ;;  %v4380_v8 = vcvt.s32.f32 %v1418_v41 }
 0x1df   :  { %5862 = vst [vmem:[#allocation60_spill] sm:$0xff] %v4367_v32  ;;  %v1376_v44 = vshra.s32 %v4370_v15, 16  ;;  %v4376_v5 = vsel %vm728_vm14, %v4035_v29, 128  ;;  %1407 = vmin.xlane.f32.xlu0 %v4367_v32 }
 0x1e0   :  { %5863 = vst [vmem:[#allocation61_spill] sm:$0xff] %v4376_v5  ;;  %v1390_v35 = vshra.s32 %v4376_v5, 16  ;;  %v650_v18 = vpop.xlane.xlu0 %649  ;;  %5864 = vst [vmem:[#allocation62_spill] sm:$0xff] %v4380_v8 }
 0x1e1   :  { %vm733_vm15 = vcmp.ge.f32.partialorder %v3954_v24, %v650_v18  ;;  %v652_v61 = vpop.xlane.xlu1 %651  ;;  %v4383_v22 = vcvt.s32.f32 %v1376_v44 }
 0x1e2   :  { %v4386_v21 = vsel %vm733_vm15, %v4035_v29, 128  ;;  %vm734_vm1 = vcmp.ge.f32.partialorder %v3958_v31, %v652_v61  ;;  %1421 = vmin.xlane.f32.xlu1 %v4380_v8  ;;  %v4396_v18 = vcvt.s32.f32 %v1390_v35 }
 0x1e3   :  { %5865 = vst [vmem:[#allocation63_spill] sm:$0xff] %v4383_v22  ;;  %5866 = vst [vmem:[#allocation64_spill] sm:$0xff] %v4386_v21  ;;  %v1460_v30 = vshra.s32 %v4386_v21, 16  ;;  %v4392_v32 = vsel %vm734_vm1, %v4035_v29, 128  ;;  %1379 = vmin.xlane.f32.xlu0 %v4383_v22 }
 0x1e4   :  { %5867 = vst [vmem:[#allocation65_spill] sm:$0xff] %v4392_v32  ;;  %v1474_v41 = vshra.s32 %v4392_v32, 16  ;;  %v646_v24 = vpop.xlane.xlu0 %645  ;;  %5868 = vst [vmem:[#allocation66_spill] sm:$0xff] %v4396_v18 }
 0x1e5   :  { %vm731_vm2 = vcmp.ge.f32.partialorder %v3963_v34, %v646_v24  ;;  %v648_v44 = vpop.xlane.xlu1 %647  ;;  %v4399_v5 = vcvt.s32.f32 %v1460_v30 }
 0x1e6   :  { %v4402_v31 = vsel %vm731_vm2, %v4035_v29, 128  ;;  %vm732_vm3 = vcmp.ge.f32.partialorder %v3966_v39, %v648_v44  ;;  %1393 = vmin.xlane.f32.xlu1 %v4396_v18  ;;  %v4412_v24 = vcvt.s32.f32 %v1474_v41 }
 0x1e7   :  { %5869 = vst [vmem:[#allocation67_spill] sm:$0xff] %v4399_v5  ;;  %5870 = vst [vmem:[#allocation68_spill] sm:$0xff] %v4402_v31  ;;  %v1432_v61 = vshra.s32 %v4402_v31, 16  ;;  %v4408_v21 = vsel %vm732_vm3, %v4035_v29, 128  ;;  %1463 = vmin.xlane.f32.xlu0 %v4399_v5 }
 0x1e8   :  { %5871 = vst [vmem:[#allocation69_spill] sm:$0xff] %v4408_v21  ;;  %v1446_v35 = vshra.s32 %v4408_v21, 16  ;;  %v658_v34 = vpop.xlane.xlu0 %657  ;;  %5872 = vst [vmem:[#allocation70_spill] sm:$0xff] %v4412_v24 }
 0x1e9   :  { %vm737_vm4 = vcmp.ge.f32.partialorder %v3970_v45, %v658_v34  ;;  %v660_v30 = vpop.xlane.xlu1 %659  ;;  %v4415_v32 = vcvt.s32.f32 %v1432_v61 }
 0x1ea   :  { %v4418_v39 = vsel %vm737_vm4, %v4035_v29, 128  ;;  %vm738_vm5 = vcmp.ge.f32.partialorder %v3974_v58, %v660_v30  ;;  %1477 = vmin.xlane.f32.xlu1 %v4412_v24  ;;  %v4428_v34 = vcvt.s32.f32 %v1446_v35 }
 0x1eb   :  { %5873 = vst [vmem:[#allocation71_spill] sm:$0xff] %v4415_v32  ;;  %v1516_v44 = vshra.s32 %v4418_v39, 16  ;;  %v4424_v5 = vsel %vm738_vm5, %v4035_v29, 128  ;;  %1435 = vmin.xlane.f32.xlu0 %v4415_v32 }
 0x1ec   :  { %v1530_v41 = vshra.s32 %v4424_v5, 16  ;;  %v654_v45 = vpop.xlane.xlu0 %653  ;;  %5874 = vst [vmem:[#allocation72_spill] sm:$0xff] %v4428_v34 }
 0x1ed   :  { %vm735_vm6 = vcmp.ge.f32.partialorder %v3979_v0, %v654_v45  ;;  %v656_v61 = vpop.xlane.xlu1 %655  ;;  %v4431_v21 = vcvt.s32.f32 %v1516_v44  ;;  %v5876_v44 = vld [vmem:[#allocation8_spill] sm:$0xff] }
 0x1ee   :  { %v4434_v58 = vsel %vm735_vm6, %v4035_v29, 128  ;;  %vm736_vm7 = vcmp.ge.f32.partialorder %v3982_v7, %v656_v61  ;;  %1449 = vmin.xlane.f32.xlu1 %v4428_v34  ;;  %v4444_v45 = vcvt.s32.f32 %v1530_v41  ;;  %v5879_v61 = vld [vmem:[#allocation9_spill] sm:$0xff] }
 0x1ef   :  { %v1488_v30 = vshra.s32 %v4434_v58, 16  ;;  %v4440_v24 = vsel %vm736_vm7, %v4035_v29, 128  ;;  %1519 = vmin.xlane.f32.xlu0 %v4431_v21 }
 0x1f0   :  { %v1502_v35 = vshra.s32 %v4440_v24, 16  ;;  %v666_v0 = vpop.xlane.xlu0 %665  ;;  %5875 = vst [vmem:[#allocation73_spill] sm:$0xff] %v4444_v45 }
 0x1f1   :  { %vm741_vm8 = vcmp.ge.f32.partialorder %v5876_v44, %v666_v0  ;;  %v668_v32 = vpop.xlane.xlu1 %667  ;;  %v4447_v8 = vcvt.s32.f32 %v1488_v30  ;;  %v5881_v30 = vld [vmem:[#allocation10_spill] sm:$0xff] }
 0x1f2   :  { %v4450_v7 = vsel %vm741_vm8, %v4035_v29, 128  ;;  %vm742_vm9 = vcmp.ge.f32.partialorder %v5879_v61, %v668_v32  ;;  %1533 = vmin.xlane.f32.xlu1 %v4444_v45  ;;  %v4460_v44 = vcvt.s32.f32 %v1502_v35  ;;  %v5884_v61 = vld [vmem:[#allocation11_spill] sm:$0xff] }
 0x1f3   :  { %5877 = vst [vmem:[#allocation8_spill] sm:$0xff] %v4447_v8  ;;  %5878 = vst [vmem:[#allocation74_spill] sm:$0xff] %v4450_v7  ;;  %v1572_v34 = vshra.s32 %v4450_v7, 16  ;;  %v4456_v31 = vsel %vm742_vm9, %v4035_v29, 128  ;;  %1491 = vmin.xlane.f32.xlu0 %v4447_v8 }
 0x1f4   :  { %5880 = vst [vmem:[#allocation9_spill] sm:$0xff] %v4456_v31  ;;  %v1586_v41 = vshra.s32 %v4456_v31, 16  ;;  %v662_v0 = vpop.xlane.xlu0 %661 }
 0x1f5   :  { %vm739_vm10 = vcmp.ge.f32.partialorder %v5881_v30, %v662_v0  ;;  %v664_v18 = vpop.xlane.xlu1 %663  ;;  %v4463_v22 = vcvt.s32.f32 %v1572_v34  ;;  %v5887_v34 = vld [vmem:[#allocation12_spill] sm:$0xff] }
 0x1f6   :  { %v4466_v32 = vsel %vm739_vm10, %v4035_v29, 128  ;;  %vm740_vm11 = vcmp.ge.f32.partialorder %v5884_v61, %v664_v18  ;;  %1505 = vmin.xlane.f32.xlu1 %v4460_v44  ;;  %v4476_v30 = vcvt.s32.f32 %v1586_v41 }
 0x1f7   :  { %5882 = vst [vmem:[#allocation10_spill] sm:$0xff] %v4463_v22  ;;  %5883 = vst [vmem:[#allocation75_spill] sm:$0xff] %v4466_v32  ;;  %v1544_v7 = vshra.s32 %v4466_v32, 16  ;;  %v4472_v8 = vsel %vm740_vm11, %v4035_v29, 128  ;;  %1575 = vmin.xlane.f32.xlu0 %v4463_v22 }
 0x1f8   :  { %5885 = vst [vmem:[#allocation11_spill] sm:$0xff] %v4472_v8  ;;  %v1558_v35 = vshra.s32 %v4472_v8, 16  ;;  %v674_v0 = vpop.xlane.xlu0 %673  ;;  %5886 = vst [vmem:[#allocation76_spill] sm:$0xff] %v4476_v30 }
 0x1f9   :  { %vm745_vm12 = vcmp.ge.f32.partialorder %v5887_v34, %v674_v0  ;;  %v676_v31 = vpop.xlane.xlu1 %675  ;;  %v4479_v45 = vcvt.s32.f32 %v1544_v7  ;;  %v5891_v7 = vld [vmem:[#allocation13_spill] sm:$0xff] }
 0x1fa   :  { %v4482_v18 = vsel %vm745_vm12, %v4035_v29, 128  ;;  %vm746_vm13 = vcmp.ge.f32.partialorder %v4006_v16, %v676_v31  ;;  %1589 = vmin.xlane.f32.xlu1 %v4476_v30  ;;  %v4492_v34 = vcvt.s32.f32 %v1558_v35  ;;  %v5894_v31 = vld [vmem:[#allocation14_spill] sm:$0xff] }
 0x1fb   :  { %5888 = vst [vmem:[#allocation12_spill] sm:$0xff] %v4482_v18  ;;  %v1628_v61 = vshra.s32 %v4482_v18, 16  ;;  %v4488_v22 = vsel %vm746_vm13, %v4035_v29, 128  ;;  %1547 = vmin.xlane.f32.xlu0 %v4479_v45 }
 0x1fc   :  { %5889 = vst [vmem:[#allocation77_spill] sm:$0xff] %v4488_v22  ;;  %v1642_v41 = vshra.s32 %v4488_v22, 16  ;;  %v670_v0 = vpop.xlane.xlu0 %669  ;;  %5890 = vst [vmem:[#allocation78_spill] sm:$0xff] %v4492_v34 }
 0x1fd   :  { %vm743_vm14 = vcmp.ge.f32.partialorder %v5891_v7, %v670_v0  ;;  %v672_v8 = vpop.xlane.xlu1 %671  ;;  %v4495_v32 = vcvt.s32.f32 %v1628_v61 }
 0x1fe   :  { %v4498_v16 = vsel %vm743_vm14, %v4035_v29, 128  ;;  %vm744_vm15 = vcmp.ge.f32.partialorder %v5894_v31, %v672_v8  ;;  %1561 = vmin.xlane.f32.xlu1 %v4492_v34  ;;  %v4508_v7 = vcvt.s32.f32 %v1642_v41  ;;  %v5898_v31 = vld [vmem:[#allocation15_spill] sm:$0xff] }
 0x1ff   :  { %5892 = vst [vmem:[#allocation13_spill] sm:$0xff] %v4495_v32  ;;  %5893 = vst [vmem:[#allocation79_spill] sm:$0xff] %v4498_v16  ;;  %v1600_v18 = vshra.s32 %v4498_v16, 16  ;;  %v4504_v30 = vsel %vm744_vm15, %v4035_v29, 128  ;;  %1631 = vmin.xlane.f32.xlu0 %v4495_v32 }
 0x200   :  { %5895 = vst [vmem:[#allocation14_spill] sm:$0xff] %v4504_v30  ;;  %v1614_v35 = vshra.s32 %v4504_v30, 16  ;;  %v682_v0 = vpop.xlane.xlu0 %681  ;;  %5896 = vst [vmem:[#allocation80_spill] sm:$0xff] %v4508_v7 }
 0x201   :  { %vm749_vm1 = vcmp.ge.f32.partialorder %v4018_v42, %v682_v0  ;;  %v684_v61 = vpop.xlane.xlu1 %683  ;;  %v4511_v22 = vcvt.s32.f32 %v1600_v18  ;;  %v5900_v18 = vld [vmem:[#allocation16_spill] sm:$0xff] }
 0x202   :  { %v4514_v8 = vsel %vm749_vm1, %v4035_v29, 128  ;;  %vm750_vm2 = vcmp.ge.f32.partialorder %v5898_v31, %v684_v61  ;;  %1645 = vmin.xlane.f32.xlu1 %v4508_v7  ;;  %v4524_v0 = vcvt.s32.f32 %v1614_v35  ;;  %v5903_v31 = vld [vmem:[#allocation17_spill] sm:$0xff] }
 0x203   :  { %5897 = vst [vmem:[#allocation81_spill] sm:$0xff] %v4514_v8  ;;  %v1684_v16 = vshra.s32 %v4514_v8, 16  ;;  %v4520_v32 = vsel %vm750_vm2, %v4035_v29, 128  ;;  %1603 = vmin.xlane.f32.xlu0 %v4511_v22 }
 0x204   :  { %5899 = vst [vmem:[#allocation15_spill] sm:$0xff] %v4520_v32  ;;  %v1698_v41 = vshra.s32 %v4520_v32, 16  ;;  %v678_v42 = vpop.xlane.xlu0 %677 }
 0x205   :  { %vm747_vm3 = vcmp.ge.f32.partialorder %v5900_v18, %v678_v42  ;;  %v680_v30 = vpop.xlane.xlu1 %679  ;;  %v4527_v34 = vcvt.s32.f32 %v1684_v16  ;;  %v1903_v18 = vld [vmem:[%s5689_s2] sm:$0xff] }
 0x206   :  { %v4530_v61 = vsel %vm747_vm3, %v4035_v29, 128  ;;  %vm748_vm4 = vcmp.ge.f32.partialorder %v5903_v31, %v680_v30  ;;  %1617 = vmin.xlane.f32.xlu1 %v4524_v0  ;;  %v4540_v42 = vcvt.s32.f32 %v1698_v41  ;;  %v1904_v31 = vld [vmem:[%s5689_s2 + $0x8] sm:$0xff]  ;;  %v5908_v41 = vld [vmem:[#allocation19_spill] sm:$0xff] }
 0x207   :  { %5901 = vst [vmem:[#allocation16_spill] sm:$0xff] %v4527_v34  ;;  %5902 = vst [vmem:[#allocation82_spill] sm:$0xff] %v4530_v61  ;;  %v1656_v8 = vshra.s32 %v4530_v61, 16  ;;  %v4536_v7 = vsel %vm748_vm4, %v4035_v29, 128  ;;  %1687 = vmin.xlane.f32.xlu0 %v4527_v34  ;;  %v843_v29 = vand.u32 65535, %v5908_v41  ;;  %v5909_v34 = vld [vmem:[#allocation20_spill] sm:$0xff] }
 0x208   :  { %5904 = vst [vmem:[#allocation17_spill] sm:$0xff] %v4536_v7  ;;  %v1670_v35 = vshra.s32 %v4536_v7, 16  ;;  %5905 = vst [vmem:[#allocation83_spill] sm:$0xff] %v4540_v42  ;;  %v815_v32 = vand.u32 65535, %v5909_v34  ;;  %v1908_v34 = vld [vmem:[%s5689_s2 + $0x28] sm:$0xff] }
 0x209   :  { %v4542_v16 = vcvt.s32.f32 %v1656_v8  ;;  %v3445_v8 = vpack.c.bf16 %v1904_v31, %v1903_v18  ;;  %v845_v7 = vcvt.s32.f32 %v843_v29  ;;  %v1907_v31 = vld [vmem:[%s5689_s2 + $0x20] sm:$0xff] }
 0x20a   :  { %1701 = vmin.xlane.f32.xlu1 %v4540_v42  ;;  %v4546_v30 = vcvt.s32.f32 %v1670_v35  ;;  %v1905_v35 = vld [vmem:[%s5689_s2 + $0x10] sm:$0xff]  ;;  %v1906_v42 = vld [vmem:[%s5689_s2 + $0x18] sm:$0xff] }
 0x20b   :  { %5906 = vst [vmem:[#allocation84_spill] sm:$0xff] %v4542_v16  ;;  %1659 = vmin.xlane.f32.xlu0 %v4542_v16  ;;  %3446 = vmatprep.subr.bf16.mxu1 %v3445_v8  ;;  %v3449_v61 = vpack.c.bf16 %v1906_v42, %v1905_v35  ;;  %v899_v35 = vand.u32 65535, %v4066_v36  ;;  %v5913_v36 = vld [vmem:[#allocation23_spill] sm:$0xff] }
 0x20c   :  { %5907 = vst [vmem:[#allocation85_spill] sm:$0xff] %v4546_v30  ;;  %3448 = vmatpush3.bf16.msra.mxu1 %v3445_v8 }
 0x20d   :  { %3450 = vmatprep.subr.bf16.mxu1 %v3449_v61 }
 0x20e   :  { %1673 = vmin.xlane.f32.xlu1 %v4546_v30  ;;  %v857_v30 = vand.u32 65535, %v4051_v38  ;;  %v5911_v38 = vld [vmem:[#allocation21_spill] sm:$0xff] }
 0x20f   :  { %v829_v41 = vand.u32 65535, %v5911_v38  ;;  %v1909_v38 = vld [vmem:[%s5689_s2 + $0x30] sm:$0xff] }
 0x210   :  { %3452 = vmatpush3.bf16.msra.mxu1 %v3449_v61  ;;  %v859_v42 = vcvt.s32.f32 %v857_v30  ;;  %v5912_v61 = vld [vmem:[#allocation22_spill] sm:$0xff]  ;;  %v913_v30 = vand.u32 65535, %v5913_v36 }
 0x21b   :  { %v4564_v16 = vpop.xlane.xlu0 %847 }
 0x21c   :  { %5910 = vst [vmem:[#allocation19_spill] sm:$0xff] %v4564_v16  ;;  %vm849_vm5 = vcmp.eq.f32.partialorder %v4047_v48, %v4564_v16  ;;  %v817_v48 = vcvt.s32.f32 %v815_v32  ;;  %v1910_v32 = vld [vmem:[%s5689_s2 + $0x38] sm:$0xff] }
 0x21d   :  { %v850_v18 = vsel %vm849_vm5, %v845_v7, inf  ;;  %v3453_v7 = vpack.c.bf16 %v1908_v34, %v1907_v31  ;;  %v3457_v34 = vpack.c.bf16 %v1910_v32, %v1909_v38 }
 0x21e   :  { %851 = vmin.xlane.f32.xlu0 %v850_v18 }
 0x21f   :  { %v4575_v8 = vpop.xlane.xlu1 %861  ;;  %v4577_v29 = vpop.xlane.xlu0 %819  ;;  %3454 = vmatprep.subr.bf16.mxu1 %v3453_v7 }
 0x220   :  { %vm863_vm6 = vcmp.eq.f32.partialorder %v4059_v13, %v4575_v8  ;;  %vm821_vm7 = vcmp.eq.f32.partialorder %v5912_v61, %v4577_v29  ;;  %v831_v13 = vcvt.s32.f32 %v829_v41  ;;  %3456 = vmatpush3.bf16.msra.mxu1 %v3453_v7  ;;  %v1911_v41 = vld [vmem:[%s5689_s2 + $0x40] sm:$0xff]  ;;  %v5916_v7 = vld [vmem:[#allocation25_spill] sm:$0xff] }
 0x221   :  { %v864_v18 = vsel %vm863_vm6, %v859_v42, inf  ;;  %v822_v16 = vsel %vm821_vm7, %v817_v48, inf  ;;  %v871_v42 = vand.u32 65535, %v4082_v49  ;;  %3458 = vmatprep.subr.bf16.mxu1 %v3457_v34  ;;  %v1912_v49 = vld [vmem:[%s5689_s2 + $0x48] sm:$0xff]  ;;  %v885_v38 = vand.u32 65535, %v5916_v7 }
 0x222   :  { %865 = vmin.xlane.f32.xlu1 %v864_v18  ;;  %823 = vmin.xlane.f32.xlu0 %v822_v16  ;;  %v901_v16 = vcvt.s32.f32 %v899_v35  ;;  %v5915_v18 = vld [vmem:[#allocation24_spill] sm:$0xff]  ;;  %v3461_v35 = vpack.c.bf16 %v1912_v49, %v1911_v41 }
 0x223   :  { %v4591_v31 = vpop.xlane.xlu1 %833 }
 0x224   :  { %v4594_v48 = vpop.xlane.xlu0 %903  ;;  %vm835_vm8 = vcmp.eq.f32.partialorder %v4075_v10, %v4591_v31  ;;  %v915_v10 = vcvt.s32.f32 %v913_v30  ;;  %3460 = vmatpush3.bf16.msra.mxu1 %v3457_v34  ;;  %v1913_v30 = vld [vmem:[%s5689_s2 + $0x50] sm:$0xff]  ;;  %v5918_v34 = vld [vmem:[#allocation27_spill] sm:$0xff] }
 0x225   :  { %5914 = vst [vmem:[#allocation20_spill] sm:$0xff] %v4594_v48  ;;  %v836_v61 = vsel %vm835_vm8, %v831_v13, inf  ;;  %vm905_vm9 = vcmp.eq.f32.partialorder %v5915_v18, %v4594_v48  ;;  %v955_v13 = vand.u32 65535, %v4098_v52  ;;  %v5917_v48 = vld [vmem:[#allocation26_spill] sm:$0xff]  ;;  %3462 = vmatprep.subr.bf16.mxu1 %v3461_v35  ;;  %v1914_v52 = vld [vmem:[%s5689_s2 + $0x58] sm:$0xff] }
 0x226   :  { %837 = vmin.xlane.f32.xlu1 %v836_v61  ;;  %v906_v36 = vsel %vm905_vm9, %v901_v16, inf  ;;  %v873_v16 = vcvt.s32.f32 %v871_v42  ;;  %v3465_v42 = vpack.c.bf16 %v1914_v52, %v1913_v30  ;;  %v1011_v52 = vand.u32 65535, %v4130_v60  ;;  %v1918_v60 = vld [vmem:[%s5689_s2 + $0x78] sm:$0xff] }
 0x227   :  { %v4607_v32 = vpop.xlane.xlu1 %917  ;;  %907 = vmin.xlane.f32.xlu0 %v906_v36  ;;  %v969_v36 = vand.u32 65535, %v5918_v34 }
 0x228   :  { %v4610_v61 = vpop.xlane.xlu0 %875  ;;  %vm919_vm10 = vcmp.eq.f32.partialorder %v4091_v43, %v4607_v32  ;;  %v887_v43 = vcvt.s32.f32 %v885_v38  ;;  %3464 = vmatpush3.bf16.msra.mxu1 %v3461_v35  ;;  %v1915_v38 = vld [vmem:[%s5689_s2 + $0x60] sm:$0xff]  ;;  %v5920_v35 = vld [vmem:[#allocation29_spill] sm:$0xff] }
 0x229   :  { %v920_v18 = vsel %vm919_vm10, %v915_v10, inf  ;;  %vm877_vm11 = vcmp.eq.f32.partialorder %v5917_v48, %v4610_v61  ;;  %v927_v48 = vand.u32 65535, %v4114_v57  ;;  %v957_v10 = vcvt.s32.f32 %v955_v13  ;;  %3466 = vmatprep.subr.bf16.mxu1 %v3465_v42  ;;  %v1916_v57 = vld [vmem:[%s5689_s2 + $0x68] sm:$0xff] }
 0x22a   :  { %921 = vmin.xlane.f32.xlu1 %v920_v18  ;;  %v878_v7 = vsel %vm877_vm11, %v873_v16, inf  ;;  %v5919_v18 = vld [vmem:[#allocation28_spill] sm:$0xff]  ;;  %v3469_v13 = vpack.c.bf16 %v1916_v57, %v1915_v38  ;;  %v983_v57 = vand.u32 65535, %v4146_v1  ;;  %v1067_v1 = vand.u32 65535, %v4162_v4 }
 0x22b   :  { %v4623_v41 = vpop.xlane.xlu1 %889  ;;  %879 = vmin.xlane.f32.xlu0 %v878_v7  ;;  %v941_v7 = vand.u32 65535, %v5920_v35  ;;  %v1039_v4 = vand.u32 65535, %v4178_v9  ;;  %v1123_v9 = vand.u32 65535, %v4194_v12  ;;  %v1095_v12 = vand.u32 65535, %v4210_v17 }
 0x22c   :  { %v4626_v49 = vpop.xlane.xlu0 %959  ;;  %vm891_vm12 = vcmp.eq.f32.partialorder %v4107_v40, %v4623_v41  ;;  %v971_v40 = vcvt.s32.f32 %v969_v36  ;;  %3468 = vmatpush3.bf16.msra.mxu1 %v3465_v42  ;;  %v1917_v36 = vld [vmem:[%s5689_s2 + $0x70] sm:$0xff]  ;;  %v5923_v42 = vld [vmem:[#allocation31_spill] sm:$0xff]  ;;  %v1179_v17 = vand.u32 65535, %v4226_v20  ;;  %v1151_v20 = vand.u32 65535, %v4242_v25  ;;  %s3677_s2 = smov [#allocation5]  }
 0x22d   :  { %v892_v16 = vsel %vm891_vm12, %v887_v43, inf  ;;  %vm961_vm13 = vcmp.eq.f32.partialorder %v5919_v18, %v4626_v49  ;;  %v5922_v18 = vld [vmem:[#allocation30_spill] sm:$0xff]  ;;  %3470 = vmatprep.subr.bf16.mxu1 %v3469_v13  ;;  %v1235_v25 = vand.u32 65535, %v4258_v28  ;;  %v1207_v28 = vand.u32 65535, %v4274_v33  ;;  %s2812_s25 = sshll.u32 %s3677_s2, 4  ;;  %s2813_s25 = int_to_ptr.vmem [resolvable:$true] %s2812_s25 }
 0x22e   :  { %893 = vmin.xlane.f32.xlu1 %v892_v16  ;;  %v962_v34 = vsel %vm961_vm13, %v957_v10, inf  ;;  %v929_v10 = vcvt.s32.f32 %v927_v48  ;;  %v3473_v48 = vpack.c.bf16 %v1918_v60, %v1917_v36  ;;  %v5926_v60 = vld [vmem:[#allocation34_spill] sm:$0xff]  ;;  %v1291_v33 = vand.u32 65535, %v4290_v37  ;;  %s3646_s26 = scalar_lea.vmem %s2813_s25, 8192  ;;  %p3651_p9 = scmp.lt.s32.totalorder %s2813_s25, %s2813_s25 }
 0x22f   :  { %v4639_v30 = vpop.xlane.xlu1 %973  ;;  %963 = vmin.xlane.f32.xlu0 %v962_v34  ;;  %v1025_v34 = vand.u32 65535, %v5923_v42  ;;  %v1263_v37 = vand.u32 65535, %v4306_v47  ;;  %v1347_v47 = vand.u32 65535, %v4322_v53  ;;  %v1319_v53 = vand.u32 65535, %v4338_v63  ;;  %p3647_p8 = scmp.ne.s32.totalorder %s2813_s25, %s3646_s26  ;;  %p3652_p10 = scmp.lt.s32.totalorder %s3646_s26, %s3646_s26 }
 0x230   :  { %5921 = vst [vmem:[#allocation21_spill] sm:$0xff] %v4639_v30  ;;  %v4642_v43 = vpop.xlane.xlu0 %931  ;;  %vm975_vm14 = vcmp.eq.f32.partialorder %v4123_v23, %v4639_v30  ;;  %v943_v23 = vcvt.s32.f32 %v941_v7  ;;  %3472 = vmatpush3.bf16.msra.mxu1 %v3469_v13  ;;  %v5925_v30 = vld [vmem:[#allocation33_spill] sm:$0xff] }
 0x231   :  { %v976_v16 = vsel %vm975_vm14, %v971_v40, inf  ;;  %vm933_vm15 = vcmp.eq.f32.partialorder %v5922_v18, %v4642_v43  ;;  %v5924_v18 = vld [vmem:[#allocation32_spill] sm:$0xff]  ;;  %3474 = vmatprep.subr.bf16.mxu1 %v3473_v48  ;;  %v1027_v13 = vcvt.s32.f32 %v1025_v34  ;;  %p3653_p11 = por %p3652_p10, %p3651_p9 }
 0x232   :  { %977 = vmin.xlane.f32.xlu1 %v976_v16  ;;  %v934_v35 = vsel %vm933_vm15, %v929_v10, inf  ;;  %v1013_v10 = vcvt.s32.f32 %v1011_v52 }
 0x233   :  { %v4655_v38 = vpop.xlane.xlu1 %945  ;;  %935 = vmin.xlane.f32.xlu0 %v934_v35  ;;  %v997_v35 = vand.u32 65535, %v5925_v30  ;;  %v5927_v30 = vld [vmem:[#allocation35_spill] sm:$0xff]  ;;  %p3654_p12 = pnand %p3653_p11, %p3647_p8 }
 0x234   :  { %v4658_v40 = vpop.xlane.xlu0 %1015  ;;  %vm947_vm1 = vcmp.eq.f32.partialorder %v4139_v55, %v4655_v38  ;;  %3476 = vmatpush3.bf16.msra.mxu1 %v3473_v48  ;;  %v985_v55 = vcvt.s32.f32 %v983_v57 }
 0x235   :  { %v948_v16 = vsel %vm947_vm1, %v943_v23, inf  ;;  %vm1017_vm2 = vcmp.eq.f32.partialorder %v5924_v18, %v4658_v40  ;;  %v999_v34 = vcvt.s32.f32 %v997_v35  ;;  %v5928_v18 = vld [vmem:[#allocation36_spill] sm:$0xff] }
 0x236   :  { %949 = vmin.xlane.f32.xlu1 %v948_v16  ;;  %v1018_v42 = vsel %vm1017_vm2, %v1013_v10, inf  ;;  %v1081_v10 = vand.u32 65535, %v5927_v30 }
 0x237   :  { %v4665_v7 = vpop.xlane.xlu1 %1029  ;;  %1019 = vmin.xlane.f32.xlu0 %v1018_v42 }
 0x238   :  { %v4668_v36 = vpop.xlane.xlu0 %987  ;;  %vm1031_vm3 = vcmp.eq.f32.partialorder %v4155_v46, %v4665_v7  ;;  %v1069_v46 = vcvt.s32.f32 %v1067_v1  ;;  %v1083_v35 = vcvt.s32.f32 %v1081_v10 }
 0x239   :  { %v1032_v52 = vsel %vm1031_vm3, %v1027_v13, inf  ;;  %vm989_vm4 = vcmp.eq.f32.partialorder %v5926_v60, %v4668_v36  ;;  %v5929_v13 = vld [vmem:[#allocation37_spill] sm:$0xff] }
 0x23a   :  { %1033 = vmin.xlane.f32.xlu1 %v1032_v52  ;;  %v990_v23 = vsel %vm989_vm4, %v985_v55, inf  ;;  %v1053_v55 = vand.u32 65535, %v5929_v13 }
 0x23b   :  { %v4675_v16 = vpop.xlane.xlu1 %1001  ;;  %991 = vmin.xlane.f32.xlu0 %v990_v23  ;;  %v5930_v23 = vld [vmem:[#allocation38_spill] sm:$0xff] }
 0x23c   :  { %v4678_v48 = vpop.xlane.xlu0 %1071  ;;  %vm1003_vm5 = vcmp.eq.f32.partialorder %v4171_v51, %v4675_v16  ;;  %v1041_v51 = vcvt.s32.f32 %v1039_v4  ;;  %v1055_v10 = vcvt.s32.f32 %v1053_v55 }
 0x23d   :  { %v1004_v57 = vsel %vm1003_vm5, %v999_v34, inf  ;;  %vm1073_vm6 = vcmp.eq.f32.partialorder %v5928_v18, %v4678_v48  ;;  %v5931_v34 = vld [vmem:[#allocation39_spill] sm:$0xff] }
 0x23e   :  { %1005 = vmin.xlane.f32.xlu1 %v1004_v57  ;;  %v1074_v42 = vsel %vm1073_vm6, %v1069_v46, inf  ;;  %v1137_v46 = vand.u32 65535, %v5931_v34 }
 0x23f   :  { %v4685_v52 = vpop.xlane.xlu1 %1085  ;;  %1075 = vmin.xlane.f32.xlu0 %v1074_v42  ;;  %v5932_v42 = vld [vmem:[#allocation40_spill] sm:$0xff] }
 0x240   :  { %v4688_v60 = vpop.xlane.xlu0 %1043  ;;  %vm1087_vm7 = vcmp.eq.f32.partialorder %v4187_v54, %v4685_v52  ;;  %v1125_v54 = vcvt.s32.f32 %v1123_v9  ;;  %v1139_v55 = vcvt.s32.f32 %v1137_v46 }
 0x241   :  { %v1088_v1 = vsel %vm1087_vm7, %v1083_v35, inf  ;;  %vm1045_vm8 = vcmp.eq.f32.partialorder %v5930_v23, %v4688_v60  ;;  %v5933_v35 = vld [vmem:[#allocation41_spill] sm:$0xff] }
 0x242   :  { %1089 = vmin.xlane.f32.xlu1 %v1088_v1  ;;  %v1046_v30 = vsel %vm1045_vm8, %v1041_v51, inf  ;;  %v1109_v51 = vand.u32 65535, %v5933_v35 }
 0x243   :  { %v4695_v57 = vpop.xlane.xlu1 %1057  ;;  %1047 = vmin.xlane.f32.xlu0 %v1046_v30  ;;  %v5934_v30 = vld [vmem:[#allocation42_spill] sm:$0xff] }
 0x244   :  { %v4698_v18 = vpop.xlane.xlu0 %1127  ;;  %vm1059_vm9 = vcmp.eq.f32.partialorder %v4203_v59, %v4695_v57  ;;  %v1097_v59 = vcvt.s32.f32 %v1095_v12  ;;  %v1111_v46 = vcvt.s32.f32 %v1109_v51 }
 0x245   :  { %v1060_v4 = vsel %vm1059_vm9, %v1055_v10, inf  ;;  %vm1129_vm10 = vcmp.eq.f32.partialorder %v5932_v42, %v4698_v18  ;;  %v5935_v10 = vld [vmem:[#allocation43_spill] sm:$0xff] }
 0x246   :  { %1061 = vmin.xlane.f32.xlu1 %v1060_v4  ;;  %v1130_v13 = vsel %vm1129_vm10, %v1125_v54, inf  ;;  %v1193_v54 = vand.u32 65535, %v5935_v10 }
 0x247   :  { %v4705_v1 = vpop.xlane.xlu1 %1141  ;;  %1131 = vmin.xlane.f32.xlu0 %v1130_v13  ;;  %v5936_v13 = vld [vmem:[#allocation44_spill] sm:$0xff] }
 0x248   :  { %v4708_v23 = vpop.xlane.xlu0 %1099  ;;  %vm1143_vm11 = vcmp.eq.f32.partialorder %v4219_v62, %v4705_v1  ;;  %v1181_v62 = vcvt.s32.f32 %v1179_v17  ;;  %v1195_v51 = vcvt.s32.f32 %v1193_v54 }
 0x249   :  { %v1144_v9 = vsel %vm1143_vm11, %v1139_v55, inf  ;;  %vm1101_vm12 = vcmp.eq.f32.partialorder %v5934_v30, %v4708_v23  ;;  %v5937_v55 = vld [vmem:[#allocation45_spill] sm:$0xff] }
 0x24a   :  { %1145 = vmin.xlane.f32.xlu1 %v1144_v9  ;;  %v1102_v34 = vsel %vm1101_vm12, %v1097_v59, inf  ;;  %v1165_v59 = vand.u32 65535, %v5937_v55 }
 0x24b   :  { %v4715_v4 = vpop.xlane.xlu1 %1113  ;;  %1103 = vmin.xlane.f32.xlu0 %v1102_v34  ;;  %v5938_v34 = vld [vmem:[#allocation46_spill] sm:$0xff] }
 0x24c   :  { %v4718_v42 = vpop.xlane.xlu0 %1183  ;;  %vm1115_vm13 = vcmp.eq.f32.partialorder %v4235_v3, %v4715_v4  ;;  %v1153_v3 = vcvt.s32.f32 %v1151_v20  ;;  %v1167_v54 = vcvt.s32.f32 %v1165_v59 }
 0x24d   :  { %v1116_v12 = vsel %vm1115_vm13, %v1111_v46, inf  ;;  %vm1185_vm14 = vcmp.eq.f32.partialorder %v5936_v13, %v4718_v42  ;;  %v5939_v46 = vld [vmem:[#allocation47_spill] sm:$0xff] }
 0x24e   :  { %1117 = vmin.xlane.f32.xlu1 %v1116_v12  ;;  %v1186_v35 = vsel %vm1185_vm14, %v1181_v62, inf  ;;  %v1249_v62 = vand.u32 65535, %v5939_v46 }
 0x24f   :  { %v4725_v9 = vpop.xlane.xlu1 %1197  ;;  %1187 = vmin.xlane.f32.xlu0 %v1186_v35  ;;  %v5940_v35 = vld [vmem:[#allocation48_spill] sm:$0xff] }
 0x250   :  { %v4728_v30 = vpop.xlane.xlu0 %1155  ;;  %vm1199_vm15 = vcmp.eq.f32.partialorder %v4251_v6, %v4725_v9  ;;  %v1237_v6 = vcvt.s32.f32 %v1235_v25  ;;  %v1251_v59 = vcvt.s32.f32 %v1249_v62  ;;  %v5942_v25 = vld [vmem:[#allocation50_spill] sm:$0xff] }
 0x251   :  { %v1200_v17 = vsel %vm1199_vm15, %v1195_v51, inf  ;;  %vm1157_vm1 = vcmp.eq.f32.partialorder %v5938_v34, %v4728_v30  ;;  %v5941_v51 = vld [vmem:[#allocation49_spill] sm:$0xff] }
 0x252   :  { %1201 = vmin.xlane.f32.xlu1 %v1200_v17  ;;  %v1158_v10 = vsel %vm1157_vm1, %v1153_v3, inf  ;;  %v1221_v3 = vand.u32 65535, %v5941_v51 }
 0x253   :  { %v4735_v12 = vpop.xlane.xlu1 %1169  ;;  %1159 = vmin.xlane.f32.xlu0 %v1158_v10 }
 0x254   :  { %v4738_v13 = vpop.xlane.xlu0 %1239  ;;  %vm1171_vm2 = vcmp.eq.f32.partialorder %v4267_v11, %v4735_v12  ;;  %v1209_v11 = vcvt.s32.f32 %v1207_v28  ;;  %v1223_v62 = vcvt.s32.f32 %v1221_v3  ;;  %v5944_v28 = vld [vmem:[#allocation52_spill] sm:$0xff] }
 0x255   :  { %v1172_v20 = vsel %vm1171_vm2, %v1167_v54, inf  ;;  %vm1241_vm3 = vcmp.eq.f32.partialorder %v5940_v35, %v4738_v13  ;;  %v5943_v54 = vld [vmem:[#allocation51_spill] sm:$0xff] }
 0x256   :  { %1173 = vmin.xlane.f32.xlu1 %v1172_v20  ;;  %v1242_v55 = vsel %vm1241_vm3, %v1237_v6, inf  ;;  %v1305_v6 = vand.u32 65535, %v5943_v54 }
 0x257   :  { %v4745_v17 = vpop.xlane.xlu1 %1253  ;;  %1243 = vmin.xlane.f32.xlu0 %v1242_v55 }
 0x258   :  { %v4748_v34 = vpop.xlane.xlu0 %1211  ;;  %vm1255_vm4 = vcmp.eq.f32.partialorder %v4283_v14, %v4745_v17  ;;  %v1293_v14 = vcvt.s32.f32 %v1291_v33  ;;  %v1307_v3 = vcvt.s32.f32 %v1305_v6  ;;  %v1265_v33 = vcvt.s32.f32 %v1263_v37 }
 0x259   :  { %vm1213_vm5 = vcmp.eq.f32.partialorder %v5942_v25, %v4748_v34  ;;  %v1256_v10 = vsel %vm1255_vm4, %v1251_v59, inf  ;;  %v5945_v59 = vld [vmem:[#allocation53_spill] sm:$0xff]  ;;  %v1349_v37 = vcvt.s32.f32 %v1347_v47 }
 0x25a   :  { %1257 = vmin.xlane.f32.xlu1 %v1256_v10  ;;  %v1214_v46 = vsel %vm1213_vm5, %v1209_v11, inf  ;;  %v1277_v11 = vand.u32 65535, %v5945_v59  ;;  %v5946_v10 = vld [vmem:[#allocation54_spill] sm:$0xff] }
 0x25b   :  { %v4755_v20 = vpop.xlane.xlu1 %1225  ;;  %1215 = vmin.xlane.f32.xlu0 %v1214_v46 }
 0x25c   :  { %vm1227_vm6 = vcmp.eq.f32.partialorder %v4299_v19, %v4755_v20  ;;  %v4760_v35 = vpop.xlane.xlu0 %1295  ;;  %v1279_v6 = vcvt.s32.f32 %v1277_v11 }
 0x25d   :  { %vm1297_vm7 = vcmp.eq.f32.partialorder %v5944_v28, %v4760_v35  ;;  %v1228_v55 = vsel %vm1227_vm6, %v1223_v62, inf  ;;  %v5947_v62 = vld [vmem:[#allocation55_spill] sm:$0xff] }
 0x25e   :  { %1229 = vmin.xlane.f32.xlu1 %v1228_v55  ;;  %v1298_v51 = vsel %vm1297_vm7, %v1293_v14, inf  ;;  %v1361_v14 = vand.u32 65535, %v5947_v62  ;;  %v5948_v55 = vld [vmem:[#allocation56_spill] sm:$0xff] }
 0x25f   :  { %v4765_v25 = vpop.xlane.xlu1 %1309  ;;  %1299 = vmin.xlane.f32.xlu0 %v1298_v51 }
 0x260   :  { %vm1311_vm8 = vcmp.eq.f32.partialorder %v4316_v26, %v4765_v25  ;;  %v4770_v19 = vpop.xlane.xlu0 %1267  ;;  %v1363_v11 = vcvt.s32.f32 %v1361_v14 }
 0x261   :  { %vm1269_vm9 = vcmp.eq.f32.partialorder %v5946_v10, %v4770_v19  ;;  %v1312_v46 = vsel %vm1311_vm8, %v1307_v3, inf  ;;  %v5949_v3 = vld [vmem:[#allocation57_spill] sm:$0xff] }
 0x262   :  { %1313 = vmin.xlane.f32.xlu1 %v1312_v46  ;;  %v1270_v54 = vsel %vm1269_vm9, %v1265_v33, inf  ;;  %v1333_v33 = vand.u32 65535, %v5949_v3 }
 0x263   :  { %v4775_v28 = vpop.xlane.xlu1 %1281  ;;  %1271 = vmin.xlane.f32.xlu0 %v1270_v54 }
 0x264   :  { %vm1283_vm10 = vcmp.eq.f32.partialorder %v4332_v50, %v4775_v28  ;;  %v4780_v26 = vpop.xlane.xlu0 %1351  ;;  %v1321_v50 = vcvt.s32.f32 %v1319_v53  ;;  %v1335_v62 = vcvt.s32.f32 %v1333_v33  ;;  %v1487_v33 = vand.u32 65535, %v4434_v58 }
 0x265   :  { %vm1353_vm11 = vcmp.eq.f32.partialorder %v5948_v55, %v4780_v26  ;;  %v1284_v51 = vsel %vm1283_vm10, %v1279_v6, inf }
 0x266   :  { %1285 = vmin.xlane.f32.xlu1 %v1284_v51  ;;  %v1354_v59 = vsel %vm1353_vm11, %v1349_v37, inf  ;;  %v1515_v51 = vand.u32 65535, %v4418_v39  ;;  %v1489_v58 = vcvt.s32.f32 %v1487_v33 }
 0x267   :  { %v4785_v10 = vpop.xlane.xlu1 %1365  ;;  %1355 = vmin.xlane.f32.xlu0 %v1354_v59 }
 0x268   :  { %vm1367_vm12 = vcmp.eq.f32.partialorder %v4348_v56, %v4785_v10  ;;  %v4789_v63 = vpop.xlane.xlu0 %1323 }
 0x269   :  { %5950 = vst [vmem:[#allocation22_spill] sm:$0xff] %v4789_v63  ;;  %vm1325_vm13 = vcmp.eq.f32.partialorder %v4351_v27, %v4789_v63  ;;  %v1368_v47 = vsel %vm1367_vm12, %v1363_v11, inf }
 0x26a   :  { %1369 = vmin.xlane.f32.xlu1 %v1368_v47  ;;  %v1326_v46 = vsel %vm1325_vm13, %v1321_v50, inf  ;;  %v1517_v50 = vcvt.s32.f32 %v1515_v51  ;;  %v5959_v51 = vld [vmem:[#allocation8_spill] sm:$0xff] }
 0x26b   :  { %v4793_v54 = vpop.xlane.xlu1 %1337  ;;  %1327 = vmin.xlane.f32.xlu0 %v1326_v46  ;;  %v1501_v46 = vand.u32 65535, %v4440_v24 }
 0x26c   :  { %5951 = vst [vmem:[#allocation23_spill] sm:$0xff] %v4793_v54  ;;  %vm1339_vm14 = vcmp.eq.f32.partialorder %v4364_v2, %v4793_v54  ;;  %v4797_v14 = vpop.xlane.xlu0 %1407  ;;  %v1529_v2 = vand.u32 65535, %v4424_v5  ;;  %v5957_v5 = vld [vmem:[#allocation73_spill] sm:$0xff] }
 0x26d   :  { %5952 = vst [vmem:[#allocation24_spill] sm:$0xff] %v4797_v14  ;;  %v1340_v6 = vsel %vm1339_vm14, %v1335_v62, inf }
 0x26e   :  { %1341 = vmin.xlane.f32.xlu1 %v1340_v6  ;;  %v1531_v39 = vcvt.s32.f32 %v1529_v2  ;;  %v1375_v6 = vand.u32 65535, %v4370_v15  ;;  %v1503_v15 = vcvt.s32.f32 %v1501_v46 }
 0x26f   :  { %v4799_v56 = vpop.xlane.xlu1 %1421 }
 0x270   :  { %v4801_v53 = vpop.xlane.xlu0 %1379 }
 0x271   :  { %5953 = vst [vmem:[#allocation25_spill] sm:$0xff] %v4801_v53 }
 0x273   :  { %v4803_v37 = vpop.xlane.xlu1 %1393 }
 0x274   :  { %5954 = vst [vmem:[#allocation26_spill] sm:$0xff] %v4803_v37  ;;  %v4805_v27 = vpop.xlane.xlu0 %1463 }
 0x275   :  { %5955 = vst [vmem:[#allocation27_spill] sm:$0xff] %v4805_v27 }
 0x277   :  { %v4807_v55 = vpop.xlane.xlu1 %1477 }
 0x278   :  { %v4810_v59 = vpop.xlane.xlu0 %1435 }
 0x27b   :  { %v4813_v3 = vpop.xlane.xlu1 %1449 }
 0x27c   :  { %v4816_v11 = vpop.xlane.xlu0 %1519 }
 0x27d   :  { %5956 = vst [vmem:[#allocation28_spill] sm:$0xff] %v4816_v11  ;;  %vm1521_vm15 = vcmp.eq.f32.partialorder %v4431_v21, %v4816_v11  ;;  %v5961_v11 = vld [vmem:[#allocation63_spill] sm:$0xff] }
 0x27e   :  { %v1522_v47 = vsel %vm1521_vm15, %v1517_v50, inf  ;;  %v5960_v50 = vld [vmem:[#allocation61_spill] sm:$0xff]  ;;  %vm1381_vm3 = vcmp.eq.f32.partialorder %v5961_v11, %v4801_v53  ;;  %v5966_v53 = vld [vmem:[#allocation60_spill] sm:$0xff] }
 0x27f   :  { %v4821_v62 = vpop.xlane.xlu1 %1533  ;;  %1523 = vmin.xlane.f32.xlu0 %v1522_v47  ;;  %v1389_v24 = vand.u32 65535, %v5960_v50  ;;  %v5963_v47 = vld [vmem:[#allocation58_spill] sm:$0xff]  ;;  %v5965_v50 = vld [vmem:[#allocation59_spill] sm:$0xff]  ;;  %vm1409_vm6 = vcmp.eq.f32.partialorder %v5966_v53, %v4797_v14 }
 0x280   :  { %vm1535_vm1 = vcmp.eq.f32.partialorder %v5957_v5, %v4821_v62  ;;  %v4826_v54 = vpop.xlane.xlu0 %1491  ;;  %v1403_v5 = vand.u32 65535, %v5963_v47  ;;  %v1417_v11 = vand.u32 65535, %v5965_v50  ;;  %v5967_v47 = vld [vmem:[#allocation68_spill] sm:$0xff]  ;;  %v5971_v50 = vld [vmem:[#allocation71_spill] sm:$0xff] }
 0x281   :  { %5958 = vst [vmem:[#allocation29_spill] sm:$0xff] %v4826_v54  ;;  %vm1493_vm2 = vcmp.eq.f32.partialorder %v5959_v51, %v4826_v54  ;;  %v1536_v63 = vsel %vm1535_vm1, %v1531_v39, inf  ;;  %v1377_v51 = vcvt.s32.f32 %v1375_v6  ;;  %v5969_v54 = vld [vmem:[#allocation62_spill] sm:$0xff]  ;;  %vm1437_vm8 = vcmp.eq.f32.partialorder %v5971_v50, %v4810_v59 }
 0x282   :  { %1537 = vmin.xlane.f32.xlu1 %v1536_v63  ;;  %v1494_v21 = vsel %vm1493_vm2, %v1489_v58, inf  ;;  %v5964_v63 = vld [vmem:[#allocation66_spill] sm:$0xff]  ;;  %v1405_v6 = vcvt.s32.f32 %v1403_v5  ;;  %vm1423_vm7 = vcmp.eq.f32.partialorder %v5969_v54, %v4799_v56  ;;  %v5974_v5 = vld [vmem:[#allocation72_spill] sm:$0xff] }
 0x283   :  { %v4833_v2 = vpop.xlane.xlu1 %1505  ;;  %1495 = vmin.xlane.f32.xlu0 %v1494_v21  ;;  %vm1395_vm5 = vcmp.eq.f32.partialorder %v5964_v63, %v4803_v37  ;;  %v1382_v58 = vsel %vm1381_vm3, %v1377_v51, inf  ;;  %v1391_v21 = vcvt.s32.f32 %v1389_v24  ;;  %v1419_v24 = vcvt.s32.f32 %v1417_v11 }
 0x284   :  { %5962 = vst [vmem:[#allocation30_spill] sm:$0xff] %v4833_v2  ;;  %vm1507_vm4 = vcmp.eq.f32.partialorder %v4460_v44, %v4833_v2  ;;  %v4838_v33 = vpop.xlane.xlu0 %1575  ;;  %v1431_v44 = vand.u32 65535, %v5967_v47  ;;  %v1410_v51 = vsel %vm1409_vm6, %v1405_v6, inf  ;;  %vm1451_vm9 = vcmp.eq.f32.partialorder %v5974_v5, %v4813_v3  ;;  %v5976_v6 = vld [vmem:[#allocation11_spill] sm:$0xff] }
 0x285   :  { %v1508_v39 = vsel %vm1507_vm4, %v1503_v15, inf  ;;  %v1396_v15 = vsel %vm1395_vm5, %v1391_v21, inf  ;;  %v1424_v37 = vsel %vm1423_vm7, %v1419_v24, inf  ;;  %v5978_v24 = vld [vmem:[#allocation78_spill] sm:$0xff] }
 0x286   :  { %1509 = vmin.xlane.f32.xlu1 %v1508_v39  ;;  %v5970_v39 = vld [vmem:[#allocation69_spill] sm:$0xff]  ;;  %v1433_v14 = vcvt.s32.f32 %v1431_v44 }
 0x287   :  { %v4845_v46 = vpop.xlane.xlu1 %1589  ;;  %1383 = vmin.xlane.f32.xlu0 %v1382_v58  ;;  %v1445_v63 = vand.u32 65535, %v5970_v39  ;;  %v5973_v58 = vld [vmem:[#allocation75_spill] sm:$0xff] }
 0x288   :  { %v4848_v2 = vpop.xlane.xlu0 %1547  ;;  %v1543_v47 = vand.u32 65535, %v5973_v58  ;;  %v1438_v54 = vsel %vm1437_vm8, %v1433_v14, inf }
 0x289   :  { %5968 = vst [vmem:[#allocation31_spill] sm:$0xff] %v4848_v2  ;;  %vm1549_vm10 = vcmp.eq.f32.partialorder %v4479_v45, %v4848_v2  ;;  %v1447_v39 = vcvt.s32.f32 %v1445_v63 }
 0x28a   :  { %1397 = vmin.xlane.f32.xlu1 %v1396_v15  ;;  %v1557_v15 = vand.u32 65535, %v5976_v6  ;;  %v1545_v50 = vcvt.s32.f32 %v1543_v47  ;;  %v5980_v6 = vld [vmem:[#allocation67_spill] sm:$0xff] }
 0x28b   :  { %v4855_v53 = vpop.xlane.xlu1 %1561  ;;  %1411 = vmin.xlane.f32.xlu0 %v1410_v51  ;;  %v5977_v51 = vld [vmem:[#allocation64_spill] sm:$0xff]  ;;  %v1452_v44 = vsel %vm1451_vm9, %v1447_v39, inf  ;;  %vm1465_vm12 = vcmp.eq.f32.partialorder %v5980_v6, %v4805_v27  ;;  %v5982_v39 = vld [vmem:[#allocation70_spill] sm:$0xff] }
 0x28c   :  { %5972 = vst [vmem:[#allocation32_spill] sm:$0xff] %v4855_v53  ;;  %v4860_v21 = vpop.xlane.xlu0 %1631  ;;  %v1459_v11 = vand.u32 65535, %v5977_v51  ;;  %vm1563_vm11 = vcmp.eq.f32.partialorder %v5978_v24, %v4855_v53  ;;  %v1550_v5 = vsel %vm1549_vm10, %v1545_v50, inf  ;;  %v1559_v45 = vcvt.s32.f32 %v1557_v15 }
 0x28d   :  { %5975 = vst [vmem:[#allocation33_spill] sm:$0xff] %v4860_v21  ;;  %vm1479_vm13 = vcmp.eq.f32.partialorder %v5982_v39, %v4807_v55 }
 0x28e   :  { %1425 = vmin.xlane.f32.xlu1 %v1424_v37  ;;  %v5979_v37 = vld [vmem:[#allocation65_spill] sm:$0xff]  ;;  %v1461_v47 = vcvt.s32.f32 %v1459_v11  ;;  %v1564_v51 = vsel %vm1563_vm11, %v1559_v45, inf  ;;  %v5987_v11 = vld [vmem:[#allocation76_spill] sm:$0xff] }
 0x28f   :  { %1439 = vmin.xlane.f32.xlu0 %v1438_v54  ;;  %v4866_v58 = vpop.xlane.xlu1 %1645  ;;  %v1473_v14 = vand.u32 65535, %v5979_v37  ;;  %v5981_v54 = vld [vmem:[#allocation74_spill] sm:$0xff]  ;;  %vm1591_vm15 = vcmp.eq.f32.partialorder %v5987_v11, %v4845_v46  ;;  %v5992_v11 = vld [vmem:[#allocation13_spill] sm:$0xff] }
 0x290   :  { %v1571_v63 = vand.u32 65535, %v5981_v54  ;;  %v4874_v2 = vpop.xlane.xlu0 %1603  ;;  %v1466_v24 = vsel %vm1465_vm12, %v1461_v47, inf  ;;  %v5984_v37 = vld [vmem:[#allocation10_spill] sm:$0xff]  ;;  %vm1633_vm3 = vcmp.eq.f32.partialorder %v5992_v11, %v4860_v21 }
 0x291   :  { %vm1577_vm14 = vcmp.eq.f32.partialorder %v5984_v37, %v4838_v33  ;;  %v1475_v15 = vcvt.s32.f32 %v1473_v14  ;;  %vm1605_vm1 = vcmp.eq.f32.partialorder %v4511_v22, %v4874_v2 }
 0x292   :  { %1453 = vmin.xlane.f32.xlu1 %v1452_v44  ;;  %v5983_v44 = vld [vmem:[#allocation9_spill] sm:$0xff]  ;;  %v1573_v54 = vcvt.s32.f32 %v1571_v63 }
 0x293   :  { %1551 = vmin.xlane.f32.xlu0 %v1550_v5  ;;  %v1585_v50 = vand.u32 65535, %v5983_v44  ;;  %v4881_v53 = vpop.xlane.xlu1 %1617  ;;  %v5986_v5 = vld [vmem:[#allocation79_spill] sm:$0xff]  ;;  %v1480_v27 = vsel %vm1479_vm13, %v1475_v15, inf }
 0x294   :  { %5985 = vst [vmem:[#allocation34_spill] sm:$0xff] %v4881_v53  ;;  %v1599_v6 = vand.u32 65535, %v5986_v5  ;;  %v4886_v45 = vpop.xlane.xlu0 %1687  ;;  %v1578_v47 = vsel %vm1577_vm14, %v1573_v54, inf  ;;  %vm1619_vm2 = vcmp.eq.f32.partialorder %v4524_v0, %v4881_v53 }
 0x295   :  { %v1587_v44 = vcvt.s32.f32 %v1585_v50 }
 0x296   :  { %1565 = vmin.xlane.f32.xlu1 %v1564_v51  ;;  %v5988_v51 = vld [vmem:[#allocation14_spill] sm:$0xff]  ;;  %v1601_v37 = vcvt.s32.f32 %v1599_v6 }
 0x297   :  { %1467 = vmin.xlane.f32.xlu0 %v1466_v24  ;;  %v1613_v39 = vand.u32 65535, %v5988_v51  ;;  %v5989_v24 = vld [vmem:[#allocation12_spill] sm:$0xff]  ;;  %v4892_v5 = vpop.xlane.xlu1 %1701  ;;  %v1592_v63 = vsel %vm1591_vm15, %v1587_v44, inf }
 0x298   :  { %v1627_v14 = vand.u32 65535, %v5989_v24  ;;  %5990 = vst [vmem:[#allocation35_spill] sm:$0xff] %v4892_v5  ;;  %v1606_v15 = vsel %vm1605_vm1, %v1601_v37, inf  ;;  %v4900_v51 = vpop.xlane.xlu0 %1659  ;;  %v5995_v44 = vld [vmem:[#allocation80_spill] sm:$0xff] }
 0x299   :  { %v1615_v22 = vcvt.s32.f32 %v1613_v39  ;;  %5994 = vst [vmem:[#allocation36_spill] sm:$0xff] %v4900_v51  ;;  %vm1647_vm4 = vcmp.eq.f32.partialorder %v5995_v44, %v4866_v58  ;;  %v6001_v44 = vld [vmem:[#allocation16_spill] sm:$0xff] }
 0x29a   :  { %1481 = vmin.xlane.f32.xlu1 %v1480_v27  ;;  %v5991_v27 = vld [vmem:[#allocation77_spill] sm:$0xff]  ;;  %v1629_v6 = vcvt.s32.f32 %v1627_v14  ;;  %vm1689_vm7 = vcmp.eq.f32.partialorder %v6001_v44, %v4886_v45 }
 0x29b   :  { %1579 = vmin.xlane.f32.xlu0 %v1578_v47  ;;  %v1641_v54 = vand.u32 65535, %v5991_v27  ;;  %v5993_v47 = vld [vmem:[#allocation82_spill] sm:$0xff]  ;;  %v1620_v24 = vsel %vm1619_vm2, %v1615_v22, inf  ;;  %v5997_v27 = vld [vmem:[#allocation84_spill] sm:$0xff]  ;;  %v4907_v53 = vpop.xlane.xlu1 %1673  ;;  %v5999_v14 = vld [vmem:[#allocation85_spill] sm:$0xff] }
 0x29c   :  { %v1655_v50 = vand.u32 65535, %v5993_v47  ;;  %v1634_v0 = vsel %vm1633_vm3, %v1629_v6, inf  ;;  %vm1661_vm5 = vcmp.eq.f32.partialorder %v5997_v27, %v4900_v51  ;;  %vm1675_vm6 = vcmp.eq.f32.partialorder %v5999_v14, %v4907_v53 }
 0x29d   :  { %v1643_v39 = vcvt.s32.f32 %v1641_v54  ;;  %v6002_v54 = vld [vmem:[#allocation83_spill] sm:$0xff] }
 0x29e   :  { %1593 = vmin.xlane.f32.xlu1 %v1592_v63  ;;  %v5996_v63 = vld [vmem:[#allocation17_spill] sm:$0xff]  ;;  %v1657_v47 = vcvt.s32.f32 %v1655_v50  ;;  %vm1703_vm8 = vcmp.eq.f32.partialorder %v6002_v54, %v4892_v5  ;;  %v868_v54 = vcvt.f32.s32 %v4575_v8 }
 0x29f   :  { %1607 = vmin.xlane.f32.xlu0 %v1606_v15  ;;  %v1669_v37 = vand.u32 65535, %v5996_v63  ;;  %v5998_v15 = vld [vmem:[#allocation81_spill] sm:$0xff]  ;;  %v1648_v21 = vsel %vm1647_vm4, %v1643_v39, inf }
 0x2a0   :  { %v1683_v11 = vand.u32 65535, %v5998_v15  ;;  %v1662_v22 = vsel %vm1661_vm5, %v1657_v47, inf  ;;  %v6003_v47 = vld [vmem:[#allocation19_spill] sm:$0xff]  ;;  %v869_v8 = vshll.u32 %v868_v54, 16  ;;  %v924_v54 = vcvt.f32.s32 %v4607_v32 }
 0x2a1   :  { %v1671_v63 = vcvt.s32.f32 %v1669_v37  ;;  %v854_v14 = vcvt.f32.s32 %v6003_v47  ;;  %v840_v37 = vcvt.f32.s32 %v4591_v31  ;;  %v882_v47 = vcvt.f32.s32 %v4610_v61 }
 0x2a2   :  { %1621 = vmin.xlane.f32.xlu1 %v1620_v24  ;;  %v6000_v24 = vld [vmem:[#allocation15_spill] sm:$0xff]  ;;  %v1685_v27 = vcvt.s32.f32 %v1683_v11  ;;  %v3675_v31 = vmov 1.0   ;;  %v925_v32 = vshll.u32 %v924_v54, 16 }
 0x2a3   :  { %1635 = vmin.xlane.f32.xlu0 %v1634_v0  ;;  %v1697_v6 = vand.u32 65535, %v6000_v24  ;;  %v1676_v51 = vsel %vm1675_vm6, %v1671_v63, inf }
 0x2a4   :  { %v1690_v50 = vsel %vm1689_vm7, %v1685_v27, inf  ;;  %v855_v27 = vshll.u32 %v854_v14, 16  ;;  %v6005_v14 = vld [vmem:[#allocation20_spill] sm:$0xff] }
 0x2a5   :  { %v1699_v39 = vcvt.s32.f32 %v1697_v6  ;;  %v841_v6 = vshll.u32 %v840_v37, 16 }
 0x2a6   :  { %1649 = vmin.xlane.f32.xlu1 %v1648_v21  ;;  %v826_v21 = vcvt.f32.s32 %v4577_v29 }
 0x2a7   :  { %1663 = vmin.xlane.f32.xlu0 %v1662_v22  ;;  %v1704_v15 = vsel %vm1703_vm8, %v1699_v39, inf }
 0x2a8   :  { %v827_v22 = vshll.u32 %v826_v21, 16 }
 0x2aa   :  { %1677 = vmin.xlane.f32.xlu1 %v1676_v51 }
 0x2ab   :  { %1691 = vmin.xlane.f32.xlu0 %v1690_v50  ;;  %v852_v0 = vpop.xlane.xlu0 %851 }
 0x2ac   :  { %v853_v63 = vcvt.f32.s32 %v852_v0 }
 0x2ae   :  { %1705 = vmin.xlane.f32.xlu1 %v1704_v15  ;;  %v6004_v15 = vld [vmem:[#allocation18_spill] sm:$0xff]  ;;  %v4926_v21 = vadd.s32 %v855_v27, %v853_v63 }
 0x2af   :  { %v866_v24 = vpop.xlane.xlu1 %865  ;;  %v824_v44 = vpop.xlane.xlu0 %823 }
 0x2b0   :  { %v825_v11 = vcvt.f32.s32 %v824_v44  ;;  %v867_v5 = vcvt.f32.s32 %v866_v24  ;;  %v910_v24 = vcvt.f32.s32 %v6005_v14  ;;  %vm1713_vm11 = vcmp.eq.s32.totalorder %v6004_v15, %v4926_v21 }
 0x2b2   :  { %v4921_v51 = vadd.s32 %v827_v22, %v825_v11  ;;  %v896_v22 = vcvt.f32.s32 %v4623_v41  ;;  %v4936_v37 = vadd.s32 %v869_v8, %v867_v5  ;;  %v883_v11 = vshll.u32 %v882_v47, 16 }
 0x2b3   :  { %v838_v50 = vpop.xlane.xlu1 %837  ;;  %v911_v41 = vshll.u32 %v910_v24, 16  ;;  %v938_v8 = vcvt.f32.s32 %v4642_v43  ;;  %v966_v43 = vcvt.f32.s32 %v4626_v49  ;;  %v6006_v49 = vld [vmem:[#allocation21_spill] sm:$0xff] }
 0x2b4   :  { %v839_v29 = vcvt.f32.s32 %v838_v50  ;;  %v908_v39 = vpop.xlane.xlu0 %907  ;;  %vm1711_vm9 = vcmp.eq.s32.totalorder %v6004_v15, %v4921_v51  ;;  %vm1714_vm12 = vcmp.eq.s32.totalorder %v6004_v15, %v4936_v37 }
 0x2b5   :  { %3349 = vmatprep.mubr.msk.f32.mxu1 %vm1711_vm9, %v3675_v31  ;;  %v909_v63 = vcvt.f32.s32 %v908_v39 }
 0x2b6   :  { %v4932_v0 = vadd.s32 %v841_v6, %v839_v29  ;;  %v897_v6 = vshll.u32 %v896_v22, 16  ;;  %v952_v22 = vcvt.f32.s32 %v4655_v38  ;;  %v967_v38 = vshll.u32 %v966_v43, 16 }
 0x2b7   :  { %v922_v44 = vpop.xlane.xlu1 %921  ;;  %v4956_v14 = vadd.s32 %v911_v41, %v909_v63  ;;  %v939_v63 = vshll.u32 %v938_v8, 16  ;;  %v980_v41 = vcvt.f32.s32 %v6006_v49 }
 0x2b8   :  { %vm1712_vm10 = vcmp.eq.s32.totalorder %v6004_v15, %v4932_v0  ;;  %v880_v61 = vpop.xlane.xlu0 %879  ;;  %v923_v29 = vcvt.f32.s32 %v922_v44 }
 0x2b9   :  { %v881_v27 = vcvt.f32.s32 %v880_v61  ;;  %3350 = vmatmul.mubr.msk.f32.vlgmr.msra.gmra.mrb[0].mxu1 %vm1712_vm10, %v3675_v31  ;;  %vm1717_vm15 = vcmp.eq.s32.totalorder %v6004_v15, %v4956_v14  ;;  %v981_v43 = vshll.u32 %v980_v41, 16 }
 0x2ba   :  { %3352 = vmatprep.mubr.msk.f32.mxu1 %vm1713_vm11, %v3675_v31  ;;  %v4972_v61 = vadd.s32 %v925_v32, %v923_v29  ;;  %v953_v29 = vshll.u32 %v952_v22, 16  ;;  %v994_v32 = vcvt.f32.s32 %v4668_v36  ;;  %v1022_v36 = vcvt.f32.s32 %v4658_v40 }
 0x2bb   :  { %v4951_v5 = vadd.s32 %v883_v11, %v881_v27  ;;  %v894_v50 = vpop.xlane.xlu1 %893  ;;  %v1036_v40 = vcvt.f32.s32 %v4665_v7 }
 0x2bc   :  { %v895_v39 = vcvt.f32.s32 %v894_v50  ;;  %v964_v47 = vpop.xlane.xlu0 %963  ;;  %vm1718_vm1 = vcmp.eq.s32.totalorder %v6004_v15, %v4972_v61  ;;  %v995_v49 = vshll.u32 %v994_v32, 16 }
 0x2bd   :  { %3353 = vmatmul.mubr.msk.f32.gmra.mrb[2].mxu1 %vm1714_vm12, %v3675_v31  ;;  %vm1715_vm13 = vcmp.eq.s32.totalorder %v6004_v15, %v4951_v5  ;;  %v965_v27 = vcvt.f32.s32 %v964_v47  ;;  %v1037_v7 = vshll.u32 %v1036_v40, 16 }
 0x2be   :  { %v4964_v24 = vadd.s32 %v897_v6, %v895_v39  ;;  %3355 = vmatprep.mubr.msk.f32.mxu1 %vm1715_vm13, %v3675_v31 }
 0x2bf   :  { %v978_v44 = vpop.xlane.xlu1 %977 }
 0x2c0   :  { %v936_v11 = vpop.xlane.xlu0 %935  ;;  %vm1716_vm14 = vcmp.eq.s32.totalorder %v6004_v15, %v4964_v24  ;;  %v979_v39 = vcvt.f32.s32 %v978_v44 }
 0x2c1   :  { %v937_v54 = vcvt.f32.s32 %v936_v11  ;;  %3356 = vmatmul.mubr.msk.f32.gmra.mrb[4].mxu1 %vm1716_vm14, %v3675_v31  ;;  %v4992_v11 = vadd.s32 %v967_v38, %v965_v27 }
 0x2c2   :  { %3358 = vmatprep.mubr.msk.f32.mxu1 %vm1717_vm15, %v3675_v31  ;;  %v5008_v27 = vadd.s32 %v981_v43, %v979_v39  ;;  %v1050_v43 = vcvt.f32.s32 %v4688_v60  ;;  %v1078_v60 = vcvt.f32.s32 %v4678_v48 }
 0x2c3   :  { %v4987_v50 = vadd.s32 %v939_v63, %v937_v54  ;;  %v950_v6 = vpop.xlane.xlu1 %949  ;;  %v1008_v63 = vcvt.f32.s32 %v4675_v16  ;;  %vm5809_vm4 = vcmp.eq.s32.totalorder %v6004_v15, %v4992_v11  ;;  %v1023_v16 = vshll.u32 %v1022_v36, 16 }
 0x2c4   :  { %v951_v47 = vcvt.f32.s32 %v950_v6  ;;  %v1020_v8 = vpop.xlane.xlu0 %1019  ;;  %vm5808_vm5 = vcmp.eq.s32.totalorder %v6004_v15, %v5008_v27  ;;  %v1092_v36 = vcvt.f32.s32 %v4685_v52  ;;  %v1051_v52 = vshll.u32 %v1050_v43, 16 }
 0x2c5   :  { %3359 = vmatmul.mubr.msk.f32.gmra.mrb[6].mxu1 %vm1718_vm1, %v3675_v31  ;;  %vm1719_vm2 = vcmp.eq.s32.totalorder %v6004_v15, %v4987_v50  ;;  %v1021_v41 = vcvt.f32.s32 %v1020_v8  ;;  %v1009_v39 = vshll.u32 %v1008_v63, 16 }
 0x2c6   :  { %v5000_v22 = vadd.s32 %v953_v29, %v951_v47  ;;  %3361 = vmatprep.mubr.msk.f32.mxu1 %vm1719_vm2, %v3675_v31  ;;  %v1093_v48 = vshll.u32 %v1092_v36, 16 }
 0x2c7   :  { %v1034_v44 = vpop.xlane.xlu1 %1033 }
 0x2c8   :  { %v992_v54 = vpop.xlane.xlu0 %991  ;;  %vm1720_vm3 = vcmp.eq.s32.totalorder %v6004_v15, %v5000_v22  ;;  %v1035_v47 = vcvt.f32.s32 %v1034_v44 }
 0x2c9   :  { %v993_v38 = vcvt.f32.s32 %v992_v54  ;;  %3362 = vmatmul.mubr.msk.f32.gmra.mrb[8].mxu1 %vm1720_vm3, %v3675_v31  ;;  %v5028_v54 = vadd.s32 %v1023_v16, %v1021_v41 }
 0x2ca   :  { %3364 = vmatprep.mubr.msk.f32.mxu1 %vm5809_vm4, %v3675_v31  ;;  %v5045_v41 = vadd.s32 %v1037_v7, %v1035_v47  ;;  %vm3479_vm4 = vmpackc.low %vm1712_vm10, %vm1711_vm9 }
 0x2cb   :  { %v5023_v6 = vadd.s32 %v995_v49, %v993_v38  ;;  %v1006_v29 = vpop.xlane.xlu1 %1005  ;;  %v1064_v49 = vcvt.f32.s32 %v4695_v57  ;;  %vm5804_vm8 = vcmp.eq.s32.totalorder %v6004_v15, %v5028_v54  ;;  %v1079_v57 = vshll.u32 %v1078_v60, 16 }
 0x2cc   :  { %v1007_v8 = vcvt.f32.s32 %v1006_v29  ;;  %v1076_v32 = vpop.xlane.xlu0 %1075  ;;  %vm5806_vm0 = vcmp.eq.s32.totalorder %v6004_v15, %v5045_v41  ;;  %v5071_v60 = vcvt.s32.f32 %v6004_v15 }
 0x2cd   :  { %3365 = vmatmul.mubr.msk.f32.gmra.mrb[10].mxu1 %vm5808_vm5, %v3675_v31  ;;  %vm5807_vm6 = vcmp.eq.s32.totalorder %v6004_v15, %v5023_v6  ;;  %v1077_v40 = vcvt.f32.s32 %v1076_v32 }
 0x2ce   :  { %v5037_v44 = vadd.s32 %v1009_v39, %v1007_v8  ;;  %3367 = vmatprep.mubr.msk.f32.mxu1 %vm5807_vm6, %v3675_v31  ;;  %v1065_v8 = vshll.u32 %v1064_v49, 16  ;;  %v1134_v49 = vcvt.f32.s32 %v4698_v18  ;;  %3209 = vmatprep.mubr.f32.mxu0 %v5071_v60  ;;  %v1148_v18 = vcvt.f32.s32 %v4705_v1 }
 0x2cf   :  { %v1090_v63 = vpop.xlane.xlu1 %1089 }
 0x2d0   :  { %v1091_v38 = vcvt.f32.s32 %v1090_v63  ;;  %v1048_v16 = vpop.xlane.xlu0 %1047  ;;  %vm5805_vm7 = vcmp.eq.s32.totalorder %v6004_v15, %v5037_v44  ;;  %v1106_v63 = vcvt.f32.s32 %v4708_v23  ;;  %v1120_v23 = vcvt.f32.s32 %v4715_v4 }
 0x2d1   :  { %v1049_v29 = vcvt.f32.s32 %v1048_v16  ;;  %3368 = vmatmul.mubr.msk.f32.gmra.mrb[12].mxu1 %vm5805_vm7, %v3675_v31  ;;  %v1080_v16 = vadd.s32 %v1079_v57, %v1077_v40  ;;  %v3676_v4 = vmov 1.0|1.0   ;;  %v1135_v57 = vshll.u32 %v1134_v49, 16 }
 0x2d2   :  { %3370 = vmatprep.mubr.msk.f32.mxu1 %vm5804_vm8, %v3675_v31  ;;  %v1094_v32 = vadd.s32 %v1093_v48, %v1091_v38  ;;  %v1107_v40 = vshll.u32 %v1106_v63, 16  ;;  %v1121_v1 = vshll.u32 %v1120_v23, 16  ;;  %v1149_v63 = vshll.u32 %v1148_v18, 16 }
 0x2d3   :  { %v1052_v39 = vadd.s32 %v1051_v52, %v1049_v29  ;;  %v1062_v47 = vpop.xlane.xlu1 %1061  ;;  %vm1729_vm6 = vcmp.eq.s32.totalorder %v6004_v15, %v1080_v16 }
 0x2d4   :  { %v1063_v43 = vcvt.f32.s32 %v1062_v47  ;;  %v1132_v7 = vpop.xlane.xlu0 %1131 }
 0x2d5   :  { %3371 = vmatmul.mubr.msk.f32.gmra.mrb[14].mxu1 %vm5806_vm0, %v3675_v31  ;;  %vm1727_vm8 = vcmp.eq.s32.totalorder %v6004_v15, %v1052_v39  ;;  %vm1730_vm0 = vcmp.eq.s32.totalorder %v6004_v15, %v1094_v32  ;;  %v1133_v29 = vcvt.f32.s32 %v1132_v7 }
 0x2d6   :  { %v1066_v36 = vadd.s32 %v1065_v8, %v1063_v43  ;;  %3373 = vmatprep.mubr.msk.f32.mxu1 %vm1727_vm8, %v3675_v31  ;;  %v1162_v43 = vcvt.f32.s32 %v4728_v30 }
 0x2d7   :  { %v1146_v38 = vpop.xlane.xlu1 %1145  ;;  %v1136_v7 = vadd.s32 %v1135_v57, %v1133_v29  ;;  %v1204_v29 = vcvt.f32.s32 %v4725_v9  ;;  %v1218_v57 = vcvt.f32.s32 %v4748_v34  ;;  %v1232_v34 = vcvt.f32.s32 %v4755_v20 }
 0x2d8   :  { %v1104_v52 = vpop.xlane.xlu0 %1103  ;;  %vm1728_vm7 = vcmp.eq.s32.totalorder %v6004_v15, %v1066_v36  ;;  %v1147_v39 = vcvt.f32.s32 %v1146_v38  ;;  %v1190_v36 = vcvt.f32.s32 %v4718_v42  ;;  %v1176_v38 = vcvt.f32.s32 %v4735_v12 }
 0x2d9   :  { %v1105_v48 = vcvt.f32.s32 %v1104_v52  ;;  %3374 = vmatmul.mubr.msk.f32.gmra.mrb[16].mxu1 %vm1728_vm7, %v3675_v31  ;;  %vm3477_vm5 = vmpackc.low %vm1728_vm7, %vm1727_vm8  ;;  %v1163_v52 = vshll.u32 %v1162_v43, 16 }
 0x2da   :  { %3376 = vmatprep.mubr.msk.f32.mxu1 %vm1729_vm6, %v3675_v31  ;;  %3478 = vmatprep.subr.msk.bf16.mxu0 %vm3477_vm5, %v3676_v4  ;;  %vm3481_vm7 = vmpackc.low %vm1730_vm0, %vm1729_vm6  ;;  %v1150_v23 = vadd.s32 %v1149_v63, %v1147_v39  ;;  %v1191_v42 = vshll.u32 %v1190_v36, 16  ;;  %v1177_v9 = vshll.u32 %v1176_v38, 16  ;;  %v1246_v39 = vcvt.f32.s32 %v4738_v13 }
 0x2db   :  { %v1108_v47 = vadd.s32 %v1107_v40, %v1105_v48  ;;  %v1118_v8 = vpop.xlane.xlu1 %1117  ;;  %3480 = vmatpush3.bf16.xpose.msk.msra.mxu0 %vm3479_vm4, %v3676_v4  ;;  %vm3483_vm4 = vmpackc.low %vm1714_vm12, %vm1713_vm11  ;;  %v1219_v63 = vshll.u32 %v1218_v57, 16  ;;  %v1260_v13 = vcvt.f32.s32 %v4745_v17  ;;  %v1316_v38 = vcvt.f32.s32 %v4765_v25 }
 0x2dc   :  { %v1119_v51 = vcvt.f32.s32 %v1118_v8  ;;  %3482 = vmatprep.subr.msk.bf16.mxu0 %vm3481_vm7, %v3676_v4  ;;  %v1188_v0 = vpop.xlane.xlu0 %1187  ;;  %vm1734_vm11 = vcmp.eq.s32.totalorder %v6004_v15, %v1150_v23  ;;  %vm3487_vm7 = vmpackc.low %vm1716_vm14, %vm1715_vm13  ;;  %v1247_v20 = vshll.u32 %v1246_v39, 16  ;;  %v1233_v17 = vshll.u32 %v1232_v34, 16 }
 0x2dd   :  { %3377 = vmatmul.mubr.msk.f32.gmra.mrb[18].mxu1 %vm1730_vm0, %v3675_v31  ;;  %vm1731_vm9 = vcmp.eq.s32.totalorder %v6004_v15, %v1108_v47  ;;  %v1189_v32 = vcvt.f32.s32 %v1188_v0  ;;  %vm1733_vm0 = vcmp.eq.s32.totalorder %v6004_v15, %v1136_v7  ;;  %v1205_v47 = vshll.u32 %v1204_v29, 16 }
 0x2de   :  { %v1122_v16 = vadd.s32 %v1121_v1, %v1119_v51  ;;  %3379 = vmatprep.mubr.msk.f32.mxu1 %vm1731_vm9, %v3675_v31  ;;  %v1274_v25 = vcvt.f32.s32 %v4770_v19  ;;  %v1261_v7 = vshll.u32 %v1260_v13, 16  ;;  %v1288_v19 = vcvt.f32.s32 %v4775_v28 }
 0x2df   :  { %v1202_v49 = vpop.xlane.xlu1 %1201  ;;  %v5126_v8 = vadd.s32 %v1191_v42, %v1189_v32  ;;  %v1317_v42 = vshll.u32 %v1316_v38, 16  ;;  %v1358_v28 = vcvt.f32.s32 %v4780_v26  ;;  %v6012_v38 = vld [vmem:[#allocation23_spill] sm:$0xff] }
 0x2e0   :  { %v1160_v30 = vpop.xlane.xlu0 %1159  ;;  %vm1732_vm10 = vcmp.eq.s32.totalorder %v6004_v15, %v1122_v16  ;;  %v1203_v18 = vcvt.f32.s32 %v1202_v49  ;;  %v1302_v49 = vcvt.f32.s32 %v4760_v35  ;;  %v1275_v57 = vshll.u32 %v1274_v25, 16  ;;  %v3560_v25 = vld [vmem:[#allocation2 + $0x8] sm:$0xff] }
 0x2e1   :  { %v1161_v40 = vcvt.f32.s32 %v1160_v30  ;;  %3380 = vmatmul.mubr.msk.f32.gmra.mrb[20].mxu1 %vm1732_vm10, %v3675_v31  ;;  %vm3485_vm5 = vmpackc.low %vm1732_vm10, %vm1731_vm9  ;;  %vm1737_vm8 = vcmp.eq.s32.totalorder %v6004_v15, %v5126_v8  ;;  %v1289_v34 = vshll.u32 %v1288_v19, 16 }
 0x2e2   :  { %3382 = vmatprep.mubr.msk.f32.mxu1 %vm1733_vm0, %v3675_v31  ;;  %v5139_v0 = vadd.s32 %v1205_v47, %v1203_v18  ;;  %vm3489_vm9 = vmpackc.low %vm1734_vm11, %vm1733_vm0  ;;  %v1303_v23 = vshll.u32 %v1302_v49, 16 }
 0x2e3   :  { %v5118_v12 = vadd.s32 %v1163_v52, %v1161_v40  ;;  %v1174_v48 = vpop.xlane.xlu1 %1173  ;;  %3484 = vmatpush3.bf16.xpose.msk.msra.mxu0 %vm3483_vm4, %v3676_v4 }
 0x2e4   :  { %v1175_v21 = vcvt.f32.s32 %v1174_v48  ;;  %3486 = vmatprep.subr.msk.bf16.mxu0 %vm3485_vm5, %v3676_v4  ;;  %v1244_v37 = vpop.xlane.xlu0 %1243  ;;  %vm1738_vm13 = vcmp.eq.s32.totalorder %v6004_v15, %v5139_v0  ;;  %vm3491_vm5 = vmpackc.low %vm1718_vm1, %vm1717_vm15 }
 0x2e5   :  { %3383 = vmatmul.mubr.msk.f32.gmra.mrb[22].mxu1 %vm1734_vm11, %v3675_v31  ;;  %vm1735_vm12 = vcmp.eq.s32.totalorder %v6004_v15, %v5118_v12  ;;  %v1245_v16 = vcvt.f32.s32 %v1244_v37  ;;  %v1582_v12 = vcvt.f32.s32 %v4838_v33 }
 0x2e6   :  { %v1178_v1 = vadd.s32 %v1177_v9, %v1175_v21  ;;  %3385 = vmatprep.mubr.msk.f32.mxu1 %vm1735_vm12, %v3675_v31 }
 0x2e7   :  { %v1258_v51 = vpop.xlane.xlu1 %1257  ;;  %v5169_v32 = vadd.s32 %v1247_v20, %v1245_v16  ;;  %v1583_v33 = vshll.u32 %v1582_v12, 16 }
 0x2e8   :  { %v1216_v43 = vpop.xlane.xlu0 %1215  ;;  %vm1736_vm6 = vcmp.eq.s32.totalorder %v6004_v15, %v1178_v1  ;;  %v1259_v35 = vcvt.f32.s32 %v1258_v51  ;;  %v1359_v1 = vshll.u32 %v1358_v28, 16 }
 0x2e9   :  { %v1217_v36 = vcvt.f32.s32 %v1216_v43  ;;  %3386 = vmatmul.mubr.msk.f32.gmra.mrb[24].mxu1 %vm1736_vm6, %v3675_v31  ;;  %vm1741_vm0 = vcmp.eq.s32.totalorder %v6004_v15, %v5169_v32  ;;  %v1372_v43 = vcvt.f32.s32 %v4785_v10  ;;  %vm3493_vm11 = vmpackc.low %vm1736_vm6, %vm1735_vm12  ;;  %v6009_v10 = vld [vmem:[#allocation22_spill] sm:$0xff] }
 0x2ea   :  { %3388 = vmatprep.mubr.msk.f32.mxu1 %vm1737_vm8, %v3675_v31  ;;  %v5180_v9 = vadd.s32 %v1261_v7, %v1259_v35  ;;  %v1330_v61 = vcvt.f32.s32 %v6009_v10 }
 0x2eb   :  { %v1220_v30 = vadd.s32 %v1219_v63, %v1217_v36  ;;  %v1230_v52 = vpop.xlane.xlu1 %1229  ;;  %3488 = vmatpush3.bf16.xpose.msk.msra.mxu0 %vm3487_vm7, %v3676_v4  ;;  %v1373_v49 = vshll.u32 %v1372_v43, 16 }
 0x2ec   :  { %v1231_v5 = vcvt.f32.s32 %v1230_v52  ;;  %3490 = vmatprep.subr.msk.bf16.mxu0 %vm3489_vm9, %v3676_v4  ;;  %v1300_v24 = vpop.xlane.xlu0 %1299  ;;  %vm1742_vm15 = vcmp.eq.s32.totalorder %v6004_v15, %v5180_v9 }
 0x2ed   :  { %v1301_v40 = vcvt.f32.s32 %v1300_v24  ;;  %3389 = vmatmul.mubr.msk.f32.gmra.mrb[26].mxu1 %vm1738_vm13, %v3675_v31  ;;  %vm1739_vm14 = vcmp.eq.s32.totalorder %v6004_v15, %v1220_v30  ;;  %v1344_v30 = vcvt.f32.s32 %v6012_v38  ;;  %v1428_v38 = vcvt.f32.s32 %v4799_v56 }
 0x2ee   :  { %v1234_v29 = vadd.s32 %v1233_v17, %v1231_v5  ;;  %3391 = vmatprep.mubr.msk.f32.mxu1 %vm1739_vm14, %v3675_v31  ;;  %v1331_v5 = vshll.u32 %v1330_v61, 16 }
 0x2ef   :  { %v1314_v48 = vpop.xlane.xlu1 %1313  ;;  %v1304_v18 = vadd.s32 %v1303_v23, %v1301_v40  ;;  %v1345_v50 = vshll.u32 %v1344_v30, 16 }
 0x2f0   :  { %v1315_v21 = vcvt.f32.s32 %v1314_v48  ;;  %v1272_v37 = vpop.xlane.xlu0 %1271  ;;  %vm1740_vm10 = vcmp.eq.s32.totalorder %v6004_v15, %v1234_v29 }
 0x2f1   :  { %v1273_v47 = vcvt.f32.s32 %v1272_v37  ;;  %3392 = vmatmul.mubr.msk.f32.gmra.mrb[28].mxu1 %vm1740_vm10, %v3675_v31  ;;  %vm5188_vm4 = vmpackc.low %vm1740_vm10, %vm1739_vm14  ;;  %vm1745_vm1 = vcmp.eq.s32.totalorder %v6004_v15, %v1304_v18  ;;  %v6024_v18 = vld [vmem:[#allocation29_spill] sm:$0xff] }
 0x2f2   :  { %v1318_v51 = vadd.s32 %v1317_v42, %v1315_v21  ;;  %3394 = vmatprep.mubr.msk.f32.mxu1 %vm1741_vm0, %v3675_v31  ;;  %vm3495_vm10 = vmpackc.low %vm1720_vm3, %vm1719_vm2  ;;  %v6021_v42 = vld [vmem:[#allocation28_spill] sm:$0xff]  ;;  %v1498_v21 = vcvt.f32.s32 %v6024_v18 }
 0x2f3   :  { %v1276_v63 = vadd.s32 %v1275_v57, %v1273_v47  ;;  %v1286_v16 = vpop.xlane.xlu1 %1285  ;;  %3492 = vmatpush3.bf16.xpose.msk.msra.mxu0 %vm3491_vm5, %v3676_v4  ;;  %vm3497_vm5 = vmpackc.low %vm1738_vm13, %vm1737_vm8  ;;  %v1526_v19 = vcvt.f32.s32 %v6021_v42 }
 0x2f4   :  { %v1287_v26 = vcvt.f32.s32 %v1286_v16  ;;  %3494 = vmatprep.subr.msk.bf16.mxu0 %vm3493_vm11, %v3676_v4  ;;  %v1356_v14 = vpop.xlane.xlu0 %1355  ;;  %vm1746_vm7 = vcmp.eq.s32.totalorder %v6004_v15, %v1318_v51  ;;  %v6026_v51 = vld [vmem:[#allocation25_spill] sm:$0xff]  ;;  %v1499_v43 = vshll.u32 %v1498_v21, 16 }
 0x2f5   :  { %v1357_v36 = vcvt.f32.s32 %v1356_v14  ;;  %3395 = vmatmul.mubr.msk.f32.gmra.mrb[30].mxu1 %vm1742_vm15, %v3675_v31  ;;  %vm1743_vm12 = vcmp.eq.s32.totalorder %v6004_v15, %v1276_v63  ;;  %vm5225_vm6 = vmpackc.low %vm1746_vm7, %vm1745_vm1  ;;  %v1386_v9 = vcvt.f32.s32 %v6026_v51  ;;  %v6029_v63 = vld [vmem:[#allocation26_spill] sm:$0xff] }
 0x2f6   :  { %v1290_v13 = vadd.s32 %v1289_v34, %v1287_v26  ;;  %3397 = vmatprep.mubr.msk.f32.mxu1 %vm1743_vm12, %v3675_v31  ;;  %v1400_v16 = vcvt.f32.s32 %v6029_v63  ;;  %v1484_v63 = vcvt.f32.s32 %v4807_v55  ;;  %v3561_v55 = vld [vmem:[#allocation2] sm:$0xff] }
 0x2f7   :  { %v1370_v20 = vpop.xlane.xlu1 %1369  ;;  %v1360_v52 = vadd.s32 %v1359_v1, %v1357_v36  ;;  %v1387_v1 = vshll.u32 %v1386_v9, 16 }
 0x2f8   :  { %v1371_v17 = vcvt.f32.s32 %v1370_v20  ;;  %v1328_v35 = vpop.xlane.xlu0 %1327  ;;  %vm1744_vm9 = vcmp.eq.s32.totalorder %v6004_v15, %v1290_v13 }
 0x2f9   :  { %v1329_v24 = vcvt.f32.s32 %v1328_v35  ;;  %3398 = vmatmul.mubr.msk.f32.gmra.mrb[32].mxu1 %vm1744_vm9, %v3675_v31  ;;  %vm5237_vm14 = vmpackc.low %vm1744_vm9, %vm1743_vm12  ;;  %vm1749_vm2 = vcmp.eq.s32.totalorder %v6004_v15, %v1360_v52  ;;  %vm6020_vm12 = vcmp.eq.s32.totalorder %v6004_v15, %v5008_v27 }
 0x2fa   :  { %v1374_v40 = vadd.s32 %v1373_v49, %v1371_v17  ;;  %3400 = vmatprep.mubr.msk.f32.mxu1 %vm1745_vm1, %v3675_v31  ;;  %v1401_v17 = vshll.u32 %v1400_v16, 16 }
 0x2fb   :  { %v1332_v7 = vadd.s32 %v1331_v5, %v1329_v24  ;;  %v1342_v23 = vpop.xlane.xlu1 %1341  ;;  %3496 = vmatpush3.bf16.xpose.msk.msra.mxu0 %vm3495_vm10, %v3676_v4  ;;  %vm6022_vm10 = vcmp.eq.s32.totalorder %v6004_v15, %v5023_v6  ;;  %v1527_v6 = vshll.u32 %v1526_v19, 16 }
 0x2fc   :  { %v1343_v29 = vcvt.f32.s32 %v1342_v23  ;;  %3498 = vmatprep.subr.msk.bf16.mxu0 %vm3497_vm5, %v3676_v4  ;;  %vm1750_vm3 = vcmp.eq.s32.totalorder %v6004_v15, %v1374_v40  ;;  %vm6023_vm5 = vcmp.eq.s32.totalorder %v6004_v15, %v5037_v44  ;;  %v6025_v44 = vld [vmem:[#allocation30_spill] sm:$0xff]  ;;  %v1442_v40 = vcvt.f32.s32 %v4810_v59 }
 0x2fd   :  { %3401 = vmatmul.mubr.msk.f32.gmra.mrb[34].mxu1 %vm1746_vm7, %v3675_v31  ;;  %vm1747_vm11 = vcmp.eq.s32.totalorder %v6004_v15, %v1332_v7  ;;  %vm5264_vm1 = vmpackc.low %vm1750_vm3, %vm1749_vm2  ;;  %vm6019_vm7 = vcmp.eq.s32.totalorder %v6004_v15, %v4992_v11  ;;  %v1540_v11 = vcvt.f32.s32 %v4821_v62  ;;  %v1512_v37 = vcvt.f32.s32 %v6025_v44  ;;  %v6036_v44 = vld [vmem:[#allocation32_spill] sm:$0xff] }
 0x2fe   :  { %v1346_v8 = vadd.s32 %v1345_v50, %v1343_v29  ;;  %3403 = vmatprep.mubr.msk.f32.mxu1 %vm1747_vm11, %v3675_v31  ;;  %vm3499_vm9 = vmpackc.low %vm6020_vm12, %vm6019_vm7  ;;  %v1429_v59 = vshll.u32 %v1428_v38, 16  ;;  %v1456_v29 = vcvt.f32.s32 %v4813_v3  ;;  %v1443_v19 = vshll.u32 %v1442_v40, 16  ;;  %v6035_v3 = vld [vmem:[#allocation31_spill] sm:$0xff] }
 0x2ff   :  { %v1541_v47 = vshll.u32 %v1540_v11, 16  ;;  %v1513_v26 = vshll.u32 %v1512_v37, 16  ;;  %v1568_v37 = vcvt.f32.s32 %v6036_v44 }
 0x300   :  { %vm1748_vm8 = vcmp.eq.s32.totalorder %v6004_v15, %v1346_v8  ;;  %v1457_v21 = vshll.u32 %v1456_v29, 16 }
 0x301   :  { %3404 = vmatmul.mubr.msk.f32.gmra.mrb[36].mxu1 %vm1748_vm8, %v3675_v31  ;;  %vm5271_vm13 = vmpackc.low %vm1748_vm8, %vm1747_vm11 }
 0x302   :  { %3406 = vmatprep.mubr.msk.f32.mxu1 %vm1749_vm2, %v3675_v31  ;;  %vm3503_vm11 = vmpackc.low %vm6023_vm5, %vm6022_vm10 }
 0x303   :  { %3500 = vmatpush3.bf16.xpose.msk.msra.mxu0 %vm3499_vm9, %v3676_v4 }
 0x304   :  { %3502 = vmatprep.subr.msk.bf16.mxu0 %vm5188_vm4, %v3676_v4  ;;  %vm3505_vm4 = vmpackc.low %vm1742_vm15, %vm1741_vm0  ;;  %vm6027_vm0 = vcmp.eq.s32.totalorder %v6004_v15, %v5028_v54  ;;  %vm6028_vm15 = vcmp.eq.s32.totalorder %v6004_v15, %v5045_v41  ;;  %v6030_v54 = vld [vmem:[#allocation24_spill] sm:$0xff] }
 0x305   :  { %3407 = vmatmul.mubr.msk.f32.gmra.mrb[38].mxu1 %vm1750_vm3, %v3675_v31  ;;  %vm3507_vm2 = vmpackc.low %vm6028_vm15, %vm6027_vm0  ;;  %v1414_v41 = vcvt.f32.s32 %v6030_v54 }
 0x307   :  { %v1415_v24 = vshll.u32 %v1414_v41, 16 }
 0x30b   :  { %3504 = vmatpush3.bf16.xpose.msk.msra.mxu0 %vm3503_vm11, %v3676_v4 }
 0x30c   :  { %3506 = vmatprep.subr.msk.bf16.mxu0 %vm3505_vm4, %v3676_v4  ;;  %v1524_v27 = vpop.xlane.xlu0 %1523 }
 0x30d   :  { %v1525_v48 = vcvt.f32.s32 %v1524_v27  ;;  %v1554_v27 = vcvt.f32.s32 %v6035_v3 }
 0x30f   :  { %v1538_v57 = vpop.xlane.xlu1 %1537  ;;  %v5305_v39 = vadd.s32 %v1527_v6, %v1525_v48 }
 0x310   :  { %v1539_v32 = vcvt.f32.s32 %v1538_v57  ;;  %v1496_v28 = vpop.xlane.xlu0 %1495 }
 0x311   :  { %v1497_v34 = vcvt.f32.s32 %v1496_v28  ;;  %vm1761_vm3 = vcmp.eq.s32.totalorder %v6004_v15, %v5305_v39 }
 0x312   :  { %v5314_v62 = vadd.s32 %v1541_v47, %v1539_v32  ;;  %v6037_v32 = vld [vmem:[#allocation27_spill] sm:$0xff] }
 0x313   :  { %v1510_v14 = vpop.xlane.xlu1 %1509  ;;  %3508 = vmatpush3.bf16.xpose.msk.msra.mxu0 %vm3507_vm2, %v3676_v4  ;;  %v5318_v10 = vadd.s32 %v1499_v43, %v1497_v34  ;;  %v1470_v28 = vcvt.f32.s32 %v6037_v32  ;;  %v1555_v34 = vshll.u32 %v1554_v27, 16 }
 0x314   :  { %v1511_v61 = vcvt.f32.s32 %v1510_v14  ;;  %v1384_v36 = vpop.xlane.xlu0 %1383  ;;  %vm1762_vm8 = vcmp.eq.s32.totalorder %v6004_v15, %v5314_v62 }
 0x315   :  { %v1385_v13 = vcvt.f32.s32 %v1384_v36  ;;  %vm5331_vm7 = vmpackc.low %vm1762_vm8, %vm1761_vm3  ;;  %vm1759_vm12 = vcmp.eq.s32.totalorder %v6004_v15, %v5318_v10  ;;  %v1471_v54 = vshll.u32 %v1470_v28, 16  ;;  %v6046_v10 = vld [vmem:[#allocation36_spill] sm:$0xff] }
 0x316   :  { %v5335_v20 = vadd.s32 %v1513_v26, %v1511_v61  ;;  %v1569_v26 = vshll.u32 %v1568_v37, 16  ;;  %v1666_v44 = vcvt.f32.s32 %v6046_v10  ;;  %v3567_v10 = vld [vmem:[#allocation2 + $0x30] sm:$0xff] }
 0x317   :  { %v1388_v30 = vadd.s32 %v1387_v1, %v1385_v13  ;;  %v1398_v52 = vpop.xlane.xlu1 %1397  ;;  %v1485_v13 = vshll.u32 %v1484_v63, 16 }
 0x318   :  { %v1399_v35 = vcvt.f32.s32 %v1398_v52  ;;  %v1412_v5 = vpop.xlane.xlu0 %1411  ;;  %vm1760_vm9 = vcmp.eq.s32.totalorder %v6004_v15, %v5335_v20  ;;  %v1680_v20 = vcvt.f32.s32 %v4907_v53  ;;  %v1694_v53 = vcvt.f32.s32 %v4886_v45 }
 0x319   :  { %v1413_v7 = vcvt.f32.s32 %v1412_v5  ;;  %vm1751_vm10 = vcmp.eq.s32.totalorder %v6004_v15, %v1388_v30  ;;  %vm3509_vm5 = vmpackc.low %vm1760_vm9, %vm1759_vm12  ;;  %v1596_v30 = vcvt.f32.s32 %v4845_v46  ;;  %v1610_v46 = vcvt.f32.s32 %v4874_v2 }
 0x31a   :  { %v1402_v56 = vadd.s32 %v1401_v17, %v1399_v35  ;;  %3409 = vmatprep.mubr.msk.f32.mxu1 %vm1751_vm10, %v3675_v31  ;;  %3510 = vmatprep.subr.msk.bf16.mxu1 %vm3509_vm5, %v3676_v4  ;;  %v1667_v22 = vshll.u32 %v1666_v44, 16  ;;  %v1681_v62 = vshll.u32 %v1680_v20, 16 }
 0x31b   :  { %v1416_v23 = vadd.s32 %v1415_v24, %v1413_v7  ;;  %v1426_v50 = vpop.xlane.xlu1 %1425  ;;  %3512 = vmatpush3.bf16.xpose.msk.msra.mxu1 %vm5237_vm14, %v3676_v4  ;;  %3210 = vmatmul.mubr.f32.vlgmr.msra.gmra.mrb[64].mxu0 %v5071_v60  ;;  %v6042_v24 = vld [vmem:[#allocation34_spill] sm:$0xff] }
 0x31c   :  { %v1427_v8 = vcvt.f32.s32 %v1426_v50  ;;  %3514 = vmatprep.subr.msk.bf16.mxu1 %vm5331_vm7, %v3676_v4  ;;  %v1440_v42 = vpop.xlane.xlu0 %1439  ;;  %vm1752_vm11 = vcmp.eq.s32.totalorder %v6004_v15, %v1402_v56  ;;  %v1624_v40 = vcvt.f32.s32 %v6042_v24  ;;  %v1597_v56 = vshll.u32 %v1596_v30, 16 }
 0x31d   :  { %v1441_v11 = vcvt.f32.s32 %v1440_v42  ;;  %3410 = vmatmul.mubr.msk.f32.gmra.mrb[40].mxu1 %vm1752_vm11, %v3675_v31  ;;  %vm5366_vm14 = vmpackc.low %vm1752_vm11, %vm1751_vm10  ;;  %vm1753_vm4 = vcmp.eq.s32.totalorder %v6004_v15, %v1416_v23 }
 0x31e   :  { %v1430_v48 = vadd.s32 %v1429_v59, %v1427_v8  ;;  %3412 = vmatprep.mubr.msk.f32.mxu1 %vm1753_vm4, %v3675_v31  ;;  %v6045_v8 = vld [vmem:[#allocation33_spill] sm:$0xff]  ;;  %v1625_v3 = vshll.u32 %v1624_v40, 16 }
 0x31f   :  { %v1444_v6 = vadd.s32 %v1443_v19, %v1441_v11  ;;  %v1454_v18 = vpop.xlane.xlu1 %1453  ;;  %v1638_v42 = vcvt.f32.s32 %v6045_v8  ;;  %v1611_v19 = vshll.u32 %v1610_v46, 16  ;;  %v1652_v11 = vcvt.f32.s32 %v4866_v58  ;;  %v3565_v8 = vld [vmem:[#allocation2 + $0x20] sm:$0xff] }
 0x320   :  { %v1455_v57 = vcvt.f32.s32 %v1454_v18  ;;  %v1552_v47 = vpop.xlane.xlu0 %1551  ;;  %vm1754_vm0 = vcmp.eq.s32.totalorder %v6004_v15, %v1430_v48 }
 0x321   :  { %v1553_v51 = vcvt.f32.s32 %v1552_v47  ;;  %3413 = vmatmul.mubr.msk.f32.gmra.mrb[42].mxu1 %vm1754_vm0, %v3675_v31  ;;  %vm5377_vm15 = vmpackc.low %vm1754_vm0, %vm1753_vm4  ;;  %vm1755_vm2 = vcmp.eq.s32.totalorder %v6004_v15, %v1444_v6  ;;  %v1639_v58 = vshll.u32 %v1638_v42, 16 }
 0x322   :  { %v1458_v43 = vadd.s32 %v1457_v21, %v1455_v57  ;;  %3415 = vmatprep.mubr.msk.f32.mxu1 %vm1755_vm2, %v3675_v31  ;;  %v1653_v57 = vshll.u32 %v1652_v11, 16 }
 0x323   :  { %v1566_v16 = vpop.xlane.xlu1 %1565  ;;  %3516 = vmatpush3.bf16.xpose.msk.msra.mxu1 %vm5225_vm6, %v3676_v4  ;;  %v5389_v14 = vadd.s32 %v1555_v34, %v1553_v51 }
 0x324   :  { %v1567_v61 = vcvt.f32.s32 %v1566_v16  ;;  %v1468_v36 = vpop.xlane.xlu0 %1467  ;;  %vm1756_vm7 = vcmp.eq.s32.totalorder %v6004_v15, %v1458_v43  ;;  %v6047_v43 = vld [vmem:[#allocation35_spill] sm:$0xff] }
 0x325   :  { %v1469_v41 = vcvt.f32.s32 %v1468_v36  ;;  %3416 = vmatmul.mubr.msk.f32.gmra.mrb[44].mxu1 %vm1756_vm7, %v3675_v31  ;;  %vm5395_vm10 = vmpackc.low %vm1756_vm7, %vm1755_vm2  ;;  %vm1763_vm6 = vcmp.eq.s32.totalorder %v6004_v15, %v5389_v14  ;;  %v1708_v63 = vcvt.f32.s32 %v6047_v43  ;;  %v1695_v14 = vshll.u32 %v1694_v53, 16 }
 0x326   :  { %v5400_v1 = vadd.s32 %v1569_v26, %v1567_v61 }
 0x327   :  { %v1472_v49 = vadd.s32 %v1471_v54, %v1469_v41  ;;  %v1482_v38 = vpop.xlane.xlu1 %1481  ;;  %v1709_v41 = vshll.u32 %v1708_v63, 16 }
 0x328   :  { %v1483_v52 = vcvt.f32.s32 %v1482_v38  ;;  %v1580_v17 = vpop.xlane.xlu0 %1579  ;;  %vm1764_vm5 = vcmp.eq.s32.totalorder %v6004_v15, %v5400_v1 }
 0x329   :  { %v1581_v35 = vcvt.f32.s32 %v1580_v17  ;;  %vm1757_vm11 = vcmp.eq.s32.totalorder %v6004_v15, %v1472_v49  ;;  %vm3517_vm4 = vmpackc.low %vm1764_vm5, %vm1763_vm6 }
 0x32a   :  { %v1486_v5 = vadd.s32 %v1485_v13, %v1483_v52  ;;  %3418 = vmatprep.mubr.msk.f32.mxu1 %vm1757_vm11, %v3675_v31  ;;  %3518 = vmatprep.subr.msk.bf16.mxu1 %vm3517_vm4, %v3676_v4 }
 0x32b   :  { %v1594_v7 = vpop.xlane.xlu1 %1593  ;;  %3520 = vmatpush3.bf16.xpose.msk.msra.mxu1 %vm5271_vm13, %v3676_v4  ;;  %v1584_v23 = vadd.s32 %v1583_v33, %v1581_v35 }
 0x32c   :  { %v1595_v50 = vcvt.f32.s32 %v1594_v7  ;;  %v1608_v59 = vpop.xlane.xlu0 %1607  ;;  %vm1758_vm0 = vcmp.eq.s32.totalorder %v6004_v15, %v1486_v5  ;;  %v3563_v5 = vld [vmem:[#allocation2 + $0x10] sm:$0xff] }
 0x32d   :  { %v1609_v2 = vcvt.f32.s32 %v1608_v59  ;;  %3419 = vmatmul.mubr.msk.f32.gmra.mrb[46].mxu1 %vm1758_vm0, %v3675_v31  ;;  %vm5427_vm2 = vmpackc.low %vm1758_vm0, %vm1757_vm11  ;;  %vm1765_vm13 = vcmp.eq.s32.totalorder %v6004_v15, %v1584_v23 }
 0x32e   :  { %v1598_v0 = vadd.s32 %v1597_v56, %v1595_v50  ;;  %3421 = vmatprep.mubr.msk.f32.mxu1 %vm1759_vm12, %v3675_v31  ;;  %v3564_v50 = vld [vmem:[#allocation2 + $0x28] sm:$0xff] }
 0x32f   :  { %v1622_v27 = vpop.xlane.xlu1 %1621  ;;  %v1612_v48 = vadd.s32 %v1611_v19, %v1609_v2 }
 0x330   :  { %v1623_v6 = vcvt.f32.s32 %v1622_v27  ;;  %v1636_v18 = vpop.xlane.xlu0 %1635  ;;  %vm1766_vm7 = vcmp.eq.s32.totalorder %v6004_v15, %v1598_v0 }
 0x331   :  { %v1637_v21 = vcvt.f32.s32 %v1636_v18  ;;  %3422 = vmatmul.mubr.msk.f32.gmra.mrb[48].mxu1 %vm1760_vm9, %v3675_v31  ;;  %vm3521_vm12 = vmpackc.low %vm1766_vm7, %vm1765_vm13  ;;  %vm1767_vm9 = vcmp.eq.s32.totalorder %v6004_v15, %v1612_v48 }
 0x332   :  { %v1626_v37 = vadd.s32 %v1625_v3, %v1623_v6  ;;  %3424 = vmatprep.mubr.msk.f32.mxu1 %vm1761_vm3, %v3675_v31  ;;  %3522 = vmatprep.subr.msk.bf16.mxu1 %vm3521_vm12, %v3676_v4  ;;  %v3566_v6 = vld [vmem:[#allocation2 + $0x38] sm:$0xff] }
 0x333   :  { %v1650_v47 = vpop.xlane.xlu1 %1649  ;;  %3524 = vmatpush3.bf16.xpose.msk.msra.mxu1 %vm5264_vm1, %v3676_v4  ;;  %v1640_v32 = vadd.s32 %v1639_v58, %v1637_v21 }
 0x334   :  { %v1651_v28 = vcvt.f32.s32 %v1650_v47  ;;  %v1664_v51 = vpop.xlane.xlu0 %1663  ;;  %vm1768_vm11 = vcmp.eq.s32.totalorder %v6004_v15, %v1626_v37 }
 0x335   :  { %v1665_v34 = vcvt.f32.s32 %v1664_v51  ;;  %3425 = vmatmul.mubr.msk.f32.gmra.mrb[50].mxu1 %vm1762_vm8, %v3675_v31  ;;  %vm3525_vm3 = vmpackc.low %vm1768_vm11, %vm1767_vm9  ;;  %vm1769_vm1 = vcmp.eq.s32.totalorder %v6004_v15, %v1640_v32  ;;  %v3568_v51 = vld [vmem:[#allocation2 + $0x48] sm:$0xff] }
 0x336   :  { %v1654_v39 = vadd.s32 %v1653_v57, %v1651_v28  ;;  %3427 = vmatprep.mubr.msk.f32.mxu1 %vm1763_vm6, %v3675_v31  ;;  %3526 = vmatprep.subr.msk.bf16.mxu1 %vm3525_vm3, %v3676_v4 }
 0x337   :  { %v1678_v16 = vpop.xlane.xlu1 %1677  ;;  %v1668_v26 = vadd.s32 %v1667_v22, %v1665_v34 }
 0x338   :  { %v1679_v61 = vcvt.f32.s32 %v1678_v16  ;;  %v1692_v36 = vpop.xlane.xlu0 %1691  ;;  %vm1770_vm8 = vcmp.eq.s32.totalorder %v6004_v15, %v1654_v39  ;;  %v3569_v39 = vld [vmem:[#allocation2 + $0x40] sm:$0xff] }
 0x339   :  { %v1693_v45 = vcvt.f32.s32 %v1692_v36  ;;  %3428 = vmatmul.mubr.msk.f32.gmra.mrb[52].mxu1 %vm1764_vm5, %v3675_v31  ;;  %vm3529_vm6 = vmpackc.low %vm1770_vm8, %vm1769_vm1  ;;  %vm1771_vm5 = vcmp.eq.s32.totalorder %v6004_v15, %v1668_v26 }
 0x33a   :  { %v1682_v54 = vadd.s32 %v1681_v62, %v1679_v61  ;;  %3430 = vmatprep.mubr.msk.f32.mxu1 %vm1765_vm13, %v3675_v31 }
 0x33b   :  { %v1706_v12 = vpop.xlane.xlu1 %1705  ;;  %3528 = vmatpush3.bf16.xpose.msk.msra.mxu1 %vm5366_vm14, %v3676_v4  ;;  %v1696_v13 = vadd.s32 %v1695_v14, %v1693_v45  ;;  %v3570_v45 = vld [vmem:[#allocation2 + $0x58] sm:$0xff] }
 0x33c   :  { %v1707_v1 = vcvt.f32.s32 %v1706_v12  ;;  %3530 = vmatprep.subr.msk.bf16.mxu1 %vm3529_vm6, %v3676_v4  ;;  %vm1772_vm4 = vcmp.eq.s32.totalorder %v6004_v15, %v1682_v54  ;;  %v3571_v12 = vld [vmem:[#allocation2 + $0x50] sm:$0xff] }
 0x33d   :  { %3431 = vmatmul.mubr.msk.f32.gmra.mrb[54].mxu1 %vm1766_vm7, %v3675_v31  ;;  %vm3533_vm0 = vmpackc.low %vm1772_vm4, %vm1771_vm5  ;;  %vm1773_vm13 = vcmp.eq.s32.totalorder %v6004_v15, %v1696_v13 }
 0x33e   :  { %v1710_v49 = vadd.s32 %v1709_v41, %v1707_v1  ;;  %3433 = vmatprep.mubr.msk.f32.mxu1 %vm1767_vm9, %v3675_v31 }
 0x340   :  { %vm1774_vm14 = vcmp.eq.s32.totalorder %v6004_v15, %v1710_v49 }
 0x341   :  { %3434 = vmatmul.mubr.msk.f32.gmra.mrb[56].mxu1 %vm1768_vm11, %v3675_v31  ;;  %vm3537_vm12 = vmpackc.low %vm1774_vm14, %vm1773_vm13 }
 0x342   :  { %3436 = vmatprep.mubr.msk.f32.mxu1 %vm1769_vm1, %v3675_v31 }
 0x343   :  { %3532 = vmatpush3.bf16.xpose.msk.msra.mxu1 %vm5377_vm15, %v3676_v4  ;;  %vm6048_vm15 = vcmask 523264  }
 0x344   :  { %3534 = vmatprep.subr.msk.bf16.mxu1 %vm3533_vm0, %v3676_v4  ;;  %vm6049_vm7 = vmmov %vm6048_vm15 }
 0x345   :  { %3437 = vmatmul.mubr.msk.f32.gmra.mrb[58].mxu1 %vm1770_vm8, %v3675_v31  ;;  %vm6051_vm9 = vmmov %vm6049_vm7 }
 0x346   :  { %3439 = vmatprep.mubr.msk.f32.mxu1 %vm1771_vm5, %v3675_v31 }
 0x349   :  { %3440 = vmatmul.mubr.msk.f32.gmra.mrb[60].mxu1 %vm1772_vm4, %v3675_v31 }
 0x34a   :  { %3442 = vmatprep.mubr.msk.f32.mxu1 %vm1773_vm13, %v3675_v31 }
 0x34b   :  { %3536 = vmatpush3.bf16.xpose.msk.msra.mxu1 %vm5395_vm10, %v3676_v4  ;;  %vm6050_vm10 = vmmov %vm6049_vm7 }
 0x34c   :  { %3538 = vmatprep.subr.msk.bf16.mxu1 %vm3537_vm12, %v3676_v4 }
 0x34d   :  { %3443 = vmatmul.mubr.msk.f32.gmra.mrb[62].mxu1 %vm1774_vm14, %v3675_v31 }
 0x34e   :  { %3243 = vmatprep.mubr.f32.mxu1 %v5071_v60 }
 0x353   :  { %3540 = vmatpush3.bf16.xpose.msk.msra.mxu1 %vm5427_vm2, %v3676_v4  ;;  %v3562_v4 = vld [vmem:[#allocation2 + $0x18] sm:$0xff]  ;;  %vm6052_vm2 = vmmov %vm6049_vm7 }
 0x354   :  { %vm6053_vm11 = vmmov %vm6052_vm2 }
 0x355   :  { %vm6054_vm3 = vmmov %vm6052_vm2 }
 0x356   :  { %vm6055_vm1 = vmmov %vm6052_vm2 }
 0x357   :  { %vm6056_vm8 = vmmov %vm6055_vm1 }
 0x358   :  { %vm6057_vm6 = vmmov %vm6055_vm1 }
 0x359   :  { %vm6058_vm5 = vmmov %vm6055_vm1 }
 0x35a   :  { %3244 = vmatmul.mubr.f32.vlgmr.msra.gmra.mrb[64].mxu1 %v5071_v60  ;;  %vm6059_vm4 = vmmov %vm6055_vm1 }
 0x35b   :  { %vm6060_vm0 = vmmov %vm6055_vm1 }
 0x35c   :  { %vm6061_vm14 = vmmov %vm6060_vm0 }
 0x35d   :  { %vm6062_vm13 = vmmov %vm6060_vm0 }
 0x35e   :  { %vm6063_vm12 = vmmov %vm6060_vm0 }
 0x38c   :  { %v3351_v15 = vpop.f32.mrb[0].mxu1 }
 0x38d   :  { %2481 = vst.msk [vmem:[#allocation5 + $0x8] sm:$0xff] %vm6048_vm15, %v3351_v15  ;;  %v2545_v9 = vsub.f32 %v3351_v15, %v3560_v25  ;;  %v1985_v38 = vpop.f32.mrb[1].mxu1  ;;  %vm6064_vm15 = vmmov %vm6060_vm0 }
 0x38e   :  { %2480 = vst.msk [vmem:[#allocation5] sm:$0xff] %vm6049_vm7, %v1985_v38  ;;  %v2544_v30 = vsub.f32 %v1985_v38, %v3561_v55  ;;  %vm6065_vm7 = vmmov %vm6060_vm0  ;;  %v3572_v55 = vld [vmem:[#allocation2 + $0x68] sm:$0xff] }
 0x38f   :  { %v2609_v52 = vmul.f32 %v2545_v9, %v2545_v9 }
 0x390   :  { %v2608_v31 = vmul.f32 %v2544_v30, %v2544_v30  ;;  %v3354_v17 = vpop.f32.mrb[2].mxu1 }
 0x391   :  { %v2673_v35 = vsel %vm6050_vm10, %v2609_v52, 0.0  ;;  %2483 = vst.msk [vmem:[#allocation5 + $0x18] sm:$0xff] %vm6051_vm9, %v3354_v17  ;;  %v2547_v33 = vsub.f32 %v3354_v17, %v3562_v4  ;;  %v1995_v60 = vpop.f32.mrb[3].mxu1  ;;  %vm6066_vm10 = vmmov %vm6060_vm0  ;;  %v3573_v17 = vld [vmem:[#allocation2 + $0x60] sm:$0xff] }
 0x392   :  { %v2672_v46 = vsel %vm6052_vm2, %v2608_v31, 0.0  ;;  %2482 = vst.msk [vmem:[#allocation5 + $0x10] sm:$0xff] %vm6053_vm11, %v1995_v60  ;;  %v2546_v24 = vsub.f32 %v1995_v60, %v3563_v5  ;;  %vm6067_vm9 = vmmov %vm6060_vm0 }
 0x393   :  { %v2674_v40 = vadd.f32 %v2673_v35, %v2672_v46  ;;  %v2611_v7 = vmul.f32 %v2547_v33, %v2547_v33  ;;  %vm6068_vm2 = vmmov %vm6060_vm0 }
 0x394   :  { %v2610_v56 = vmul.f32 %v2546_v24, %v2546_v24  ;;  %v3357_v23 = vpop.f32.mrb[4].mxu1  ;;  %vm6069_vm11 = vmmov %vm6060_vm0 }
 0x395   :  { %2485 = vst.msk [vmem:[#allocation5 + $0x28] sm:$0xff] %vm6054_vm3, %v3357_v23  ;;  %v2549_v59 = vsub.f32 %v3357_v23, %v3564_v50  ;;  %v2005_v2 = vpop.f32.mrb[5].mxu1  ;;  %v2677_v0 = vsel %vm6057_vm6, %v2611_v7, 0.0  ;;  %vm6070_vm3 = vmmov %vm6060_vm0  ;;  %v3575_v50 = vld [vmem:[#allocation2 + $0x70] sm:$0xff] }
 0x396   :  { %v2675_v29 = vsel %vm6055_vm1, %v2610_v56, 0.0  ;;  %2484 = vst.msk [vmem:[#allocation5 + $0x20] sm:$0xff] %vm6056_vm8, %v2005_v2  ;;  %v2548_v42 = vsub.f32 %v2005_v2, %v3565_v8  ;;  %vm6071_vm1 = vmmov %vm6060_vm0 }
 0x397   :  { %v2676_v19 = vadd.f32 %v2675_v29, %v2674_v40  ;;  %v2613_v11 = vmul.f32 %v2549_v59, %v2549_v59  ;;  %vm6072_vm8 = vmmov %vm6060_vm0  ;;  %v3574_v40 = vld [vmem:[#allocation2 + $0x78] sm:$0xff] }
 0x398   :  { %v2612_v3 = vmul.f32 %v2548_v42, %v2548_v42  ;;  %v3360_v27 = vpop.f32.mrb[6].mxu1  ;;  %vm6073_vm6 = vmmov %vm6060_vm0 }
 0x399   :  { %v2678_v48 = vadd.f32 %v2677_v0, %v2676_v19  ;;  %2487 = vst.msk [vmem:[#allocation5 + $0x38] sm:$0xff] %vm6058_vm5, %v3360_v27  ;;  %v2551_v18 = vsub.f32 %v3360_v27, %v3566_v6  ;;  %v2015_v21 = vpop.f32.mrb[7].mxu1  ;;  %v2681_v57 = vsel %vm6061_vm14, %v2613_v11, 0.0  ;;  %vm6074_vm5 = vmmov %vm6060_vm0  ;;  %v3576_v11 = vld [vmem:[#allocation2 + $0x88] sm:$0xff]  ;;  %v3577_v6 = vld [vmem:[#allocation2 + $0x80] sm:$0xff] }
 0x39a   :  { %v2679_v58 = vsel %vm6059_vm4, %v2612_v3, 0.0  ;;  %2486 = vst.msk [vmem:[#allocation5 + $0x30] sm:$0xff] %vm6060_vm0, %v2015_v21  ;;  %v2550_v44 = vsub.f32 %v2015_v21, %v3567_v10  ;;  %vm6075_vm4 = vmmov %vm6060_vm0 }
 0x39b   :  { %v2680_v37 = vadd.f32 %v2679_v58, %v2678_v48  ;;  %v2615_v20 = vmul.f32 %v2551_v18, %v2551_v18  ;;  %vm6076_vm14 = vmmov %vm6060_vm0 }
 0x39c   :  { %v2614_v47 = vmul.f32 %v2550_v44, %v2550_v44  ;;  %v3363_v32 = vpop.f32.mrb[8].mxu1 }
 0x39d   :  { %v2682_v28 = vadd.f32 %v2681_v57, %v2680_v37  ;;  %2489 = vst.msk [vmem:[#allocation5 + $0x48] sm:$0xff] %vm6062_vm13, %v3363_v32  ;;  %v2553_v34 = vsub.f32 %v3363_v32, %v3568_v51  ;;  %v2025_v53 = vpop.f32.mrb[9].mxu1  ;;  %v2685_v62 = vsel %vm6065_vm7, %v2615_v20, 0.0  ;;  %vm6077_vm13 = vmmov %vm6060_vm0  ;;  %v3578_v20 = vld [vmem:[#allocation2 + $0x98] sm:$0xff]  ;;  %v3579_v51 = vld [vmem:[#allocation2 + $0x90] sm:$0xff] }
 0x39e   :  { %v2683_v22 = vsel %vm6063_vm12, %v2614_v47, 0.0  ;;  %2488 = vst.msk [vmem:[#allocation5 + $0x40] sm:$0xff] %vm6064_vm15, %v2025_v53  ;;  %v2552_v43 = vsub.f32 %v2025_v53, %v3569_v39  ;;  %vm6078_vm12 = vmmov %vm6060_vm0 }
 0x39f   :  { %v2684_v63 = vadd.f32 %v2683_v22, %v2682_v28  ;;  %v2617_v16 = vmul.f32 %v2553_v34, %v2553_v34  ;;  %vm6079_vm15 = vmmov %vm6060_vm0 }
 0x3a0   :  { %v2616_v26 = vmul.f32 %v2552_v43, %v2552_v43  ;;  %v3366_v61 = vpop.f32.mrb[10].mxu1  ;;  %vm6080_vm7 = vmmov %vm6060_vm0 }
 0x3a1   :  { %v2686_v36 = vadd.f32 %v2685_v62, %v2684_v63  ;;  %2491 = vst.msk [vmem:[#allocation5 + $0x58] sm:$0xff] %vm6066_vm10, %v3366_v61  ;;  %v2555_v14 = vsub.f32 %v3366_v61, %v3570_v45  ;;  %v2035_v54 = vpop.f32.mrb[11].mxu1  ;;  %v2689_v49 = vsel %vm6069_vm11, %v2617_v16, 0.0  ;;  %vm6081_vm10 = vmmov %vm6060_vm0  ;;  %v3580_v16 = vld [vmem:[#allocation2 + $0xa8] sm:$0xff]  ;;  %v3581_v45 = vld [vmem:[#allocation2 + $0xa0] sm:$0xff] }
 0x3a2   :  { %v2687_v41 = vsel %vm6067_vm9, %v2616_v26, 0.0  ;;  %2490 = vst.msk [vmem:[#allocation5 + $0x50] sm:$0xff] %vm6068_vm2, %v2035_v54  ;;  %v2554_v13 = vsub.f32 %v2035_v54, %v3571_v12  ;;  %vm6082_vm9 = vmmov %vm6060_vm0 }
 0x3a3   :  { %v2688_v1 = vadd.f32 %v2687_v41, %v2686_v36  ;;  %v2619_v15 = vmul.f32 %v2555_v14, %v2555_v14  ;;  %vm6083_vm2 = vmmov %vm6060_vm0 }
 0x3a4   :  { %v2618_v25 = vmul.f32 %v2554_v13, %v2554_v13  ;;  %v3369_v9 = vpop.f32.mrb[12].mxu1  ;;  %vm6084_vm11 = vmmov %vm6060_vm0 }
 0x3a5   :  { %v2690_v38 = vadd.f32 %v2689_v49, %v2688_v1  ;;  %2493 = vst.msk [vmem:[#allocation5 + $0x68] sm:$0xff] %vm6070_vm3, %v3369_v9  ;;  %v2557_v30 = vsub.f32 %v3369_v9, %v3572_v55  ;;  %v2045_v52 = vpop.f32.mrb[13].mxu1  ;;  %v2693_v33 = vsel %vm6073_vm6, %v2619_v15, 0.0  ;;  %vm6085_vm3 = vmmov %vm6060_vm0  ;;  %v3582_v15 = vld [vmem:[#allocation2 + $0xb8] sm:$0xff]  ;;  %v3583_v55 = vld [vmem:[#allocation2 + $0xb0] sm:$0xff] }
 0x3a6   :  { %v2691_v31 = vsel %vm6071_vm1, %v2618_v25, 0.0  ;;  %2492 = vst.msk [vmem:[#allocation5 + $0x60] sm:$0xff] %vm6072_vm8, %v2045_v52  ;;  %v2556_v35 = vsub.f32 %v2045_v52, %v3573_v17  ;;  %vm6086_vm1 = vmmov %vm6060_vm0 }
 0x3a7   :  { %v2692_v4 = vadd.f32 %v2691_v31, %v2690_v38  ;;  %v2621_v60 = vmul.f32 %v2557_v30, %v2557_v30  ;;  %vm6087_vm8 = vmmov %vm6060_vm0 }
 0x3a8   :  { %v2620_v46 = vmul.f32 %v2556_v35, %v2556_v35  ;;  %v3372_v5 = vpop.f32.mrb[14].mxu1  ;;  %vm6088_vm6 = vmmov %vm6060_vm0 }
 0x3a9   :  { %v2694_v24 = vadd.f32 %v2693_v33, %v2692_v4  ;;  %2495 = vst.msk [vmem:[#allocation5 + $0x78] sm:$0xff] %vm6074_vm5, %v3372_v5  ;;  %v2559_v7 = vsub.f32 %v3372_v5, %v3574_v40  ;;  %v2055_v56 = vpop.f32.mrb[15].mxu1  ;;  %v2697_v29 = vsel %vm6076_vm14, %v2621_v60, 0.0  ;;  %vm6089_vm5 = vmmov %vm6060_vm0  ;;  %v3584_v60 = vld [vmem:[#allocation2 + $0xc8] sm:$0xff]  ;;  %v3585_v40 = vld [vmem:[#allocation2 + $0xc0] sm:$0xff] }
 0x3aa   :  { %v2695_v23 = vsel %vm6075_vm4, %v2620_v46, 0.0  ;;  %2494 = vst.msk [vmem:[#allocation5 + $0x70] sm:$0xff] %vm6060_vm0, %v2055_v56  ;;  %v2558_v59 = vsub.f32 %v2055_v56, %v3575_v50  ;;  %vm6090_vm4 = vmmov %vm6060_vm0 }
 0x3ab   :  { %v2696_v2 = vadd.f32 %v2695_v23, %v2694_v24  ;;  %v2623_v8 = vmul.f32 %v2559_v7, %v2559_v7  ;;  %vm6091_vm14 = vmmov %vm6060_vm0 }
 0x3ac   :  { %v2622_v42 = vmul.f32 %v2558_v59, %v2558_v59  ;;  %v3375_v19 = vpop.f32.mrb[16].mxu1 }
 0x3ad   :  { %v2698_v0 = vadd.f32 %v2697_v29, %v2696_v2  ;;  %2497 = vst.msk [vmem:[#allocation5 + $0x88] sm:$0xff] %vm6077_vm13, %v3375_v19  ;;  %v2561_v3 = vsub.f32 %v3375_v19, %v3576_v11  ;;  %v2065_v27 = vpop.f32.mrb[17].mxu1  ;;  %v2701_v58 = vsel %vm6080_vm7, %v2623_v8, 0.0  ;;  %vm6092_vm13 = vmmov %vm6060_vm0  ;;  %v3586_v8 = vld [vmem:[#allocation2 + $0xd8] sm:$0xff]  ;;  %v3587_v11 = vld [vmem:[#allocation2 + $0xd0] sm:$0xff] }
 0x3ae   :  { %v2699_v48 = vsel %vm6078_vm12, %v2622_v42, 0.0  ;;  %2496 = vst.msk [vmem:[#allocation5 + $0x80] sm:$0xff] %vm6079_vm15, %v2065_v27  ;;  %v2560_v18 = vsub.f32 %v2065_v27, %v3577_v6  ;;  %vm6093_vm12 = vmmov %vm6060_vm0 }
 0x3af   :  { %v2700_v21 = vadd.f32 %v2699_v48, %v2698_v0  ;;  %v2625_v10 = vmul.f32 %v2561_v3, %v2561_v3  ;;  %vm6094_vm15 = vmmov %vm6060_vm0 }
 0x3b0   :  { %v2624_v44 = vmul.f32 %v2560_v18, %v2560_v18  ;;  %v3378_v37 = vpop.f32.mrb[18].mxu1  ;;  %vm6095_vm7 = vmmov %vm6060_vm0 }
 0x3b1   :  { %v2702_v57 = vadd.f32 %v2701_v58, %v2700_v21  ;;  %2499 = vst.msk [vmem:[#allocation5 + $0x98] sm:$0xff] %vm6081_vm10, %v3378_v37  ;;  %v2563_v47 = vsub.f32 %v3378_v37, %v3578_v20  ;;  %v2075_v32 = vpop.f32.mrb[19].mxu1  ;;  %v2705_v22 = vsel %vm6084_vm11, %v2625_v10, 0.0  ;;  %vm6096_vm10 = vmmov %vm6060_vm0  ;;  %v3588_v10 = vld [vmem:[#allocation2 + $0xe8] sm:$0xff]  ;;  %v3589_v20 = vld [vmem:[#allocation2 + $0xe0] sm:$0xff] }
 0x3b2   :  { %v2703_v28 = vsel %vm6082_vm9, %v2624_v44, 0.0  ;;  %2498 = vst.msk [vmem:[#allocation5 + $0x90] sm:$0xff] %vm6083_vm2, %v2075_v32  ;;  %v2562_v34 = vsub.f32 %v2075_v32, %v3579_v51  ;;  %vm6097_vm9 = vmmov %vm6060_vm0 }
 0x3b3   :  { %v2704_v53 = vadd.f32 %v2703_v28, %v2702_v57  ;;  %v2627_v39 = vmul.f32 %v2563_v47, %v2563_v47  ;;  %vm6098_vm2 = vmmov %vm6060_vm0 }
 0x3b4   :  { %v2626_v43 = vmul.f32 %v2562_v34, %v2562_v34  ;;  %v3381_v63 = vpop.f32.mrb[20].mxu1  ;;  %vm6099_vm11 = vmmov %vm6060_vm0 }
 0x3b5   :  { %v2706_v62 = vadd.f32 %v2705_v22, %v2704_v53  ;;  %2501 = vst.msk [vmem:[#allocation5 + $0xa8] sm:$0xff] %vm6085_vm3, %v3381_v63  ;;  %v2565_v26 = vsub.f32 %v3381_v63, %v3580_v16  ;;  %v2085_v61 = vpop.f32.mrb[21].mxu1  ;;  %v2709_v41 = vsel %vm6088_vm6, %v2627_v39, 0.0  ;;  %vm6100_vm3 = vmmov %vm6060_vm0  ;;  %v3590_v39 = vld [vmem:[#allocation2 + $0xf8] sm:$0xff]  ;;  %v3591_v16 = vld [vmem:[#allocation2 + $0xf0] sm:$0xff] }
 0x3b6   :  { %v2707_v36 = vsel %vm6086_vm1, %v2626_v43, 0.0  ;;  %2500 = vst.msk [vmem:[#allocation5 + $0xa0] sm:$0xff] %vm6087_vm8, %v2085_v61  ;;  %v2564_v14 = vsub.f32 %v2085_v61, %v3581_v45  ;;  %vm6101_vm1 = vmmov %vm6060_vm0 }
 0x3b7   :  { %v2708_v54 = vadd.f32 %v2707_v36, %v2706_v62  ;;  %v2629_v12 = vmul.f32 %v2565_v26, %v2565_v26  ;;  %vm6102_vm8 = vmmov %vm6060_vm0 }
 0x3b8   :  { %v2628_v13 = vmul.f32 %v2564_v14, %v2564_v14  ;;  %v3384_v1 = vpop.f32.mrb[22].mxu1  ;;  %vm6103_vm6 = vmmov %vm6060_vm0 }
 0x3b9   :  { %v2710_v49 = vadd.f32 %v2709_v41, %v2708_v54  ;;  %2503 = vst.msk [vmem:[#allocation5 + $0xb8] sm:$0xff] %vm6089_vm5, %v3384_v1  ;;  %v2567_v25 = vsub.f32 %v3384_v1, %v3582_v15  ;;  %v2095_v9 = vpop.f32.mrb[23].mxu1  ;;  %v2713_v31 = vsel %vm6091_vm14, %v2629_v12, 0.0  ;;  %vm6104_vm5 = vmmov %vm6060_vm0  ;;  %v3592_v12 = vld [vmem:[#allocation2 + $0x108] sm:$0xff]  ;;  %v3593_v15 = vld [vmem:[#allocation2 + $0x100] sm:$0xff] }
 0x3ba   :  { %v2711_v38 = vsel %vm6090_vm4, %v2628_v13, 0.0  ;;  %2502 = vst.msk [vmem:[#allocation5 + $0xb0] sm:$0xff] %vm6060_vm0, %v2095_v9  ;;  %v2566_v30 = vsub.f32 %v2095_v9, %v3583_v55  ;;  %vm6105_vm4 = vmmov %vm6060_vm0 }
 0x3bb   :  { %v2712_v52 = vadd.f32 %v2711_v38, %v2710_v49  ;;  %v2631_v17 = vmul.f32 %v2567_v25, %v2567_v25  ;;  %vm6106_vm14 = vmmov %vm6060_vm0 }
 0x3bc   :  { %v2630_v35 = vmul.f32 %v2566_v30, %v2566_v30  ;;  %v3387_v4 = vpop.f32.mrb[24].mxu1 }
 0x3bd   :  { %v2714_v33 = vadd.f32 %v2713_v31, %v2712_v52  ;;  %2505 = vst.msk [vmem:[#allocation5 + $0xc8] sm:$0xff] %vm6092_vm13, %v3387_v4  ;;  %v2569_v46 = vsub.f32 %v3387_v4, %v3584_v60  ;;  %v2105_v5 = vpop.f32.mrb[25].mxu1  ;;  %v2717_v23 = vsel %vm6095_vm7, %v2631_v17, 0.0  ;;  %vm6107_vm13 = vmmov %vm6060_vm0  ;;  %v3594_v17 = vld [vmem:[#allocation2 + $0x118] sm:$0xff]  ;;  %v3595_v60 = vld [vmem:[#allocation2 + $0x110] sm:$0xff] }
 0x3be   :  { %v2715_v24 = vsel %vm6093_vm12, %v2630_v35, 0.0  ;;  %2504 = vst.msk [vmem:[#allocation5 + $0xc0] sm:$0xff] %vm6094_vm15, %v2105_v5  ;;  %v2568_v7 = vsub.f32 %v2105_v5, %v3585_v40  ;;  %vm6108_vm12 = vmmov %vm6060_vm0 }
 0x3bf   :  { %v2716_v56 = vadd.f32 %v2715_v24, %v2714_v33  ;;  %v2633_v50 = vmul.f32 %v2569_v46, %v2569_v46  ;;  %vm6109_vm15 = vmmov %vm6060_vm0 }
 0x3c0   :  { %v2632_v59 = vmul.f32 %v2568_v7, %v2568_v7  ;;  %v3390_v2 = vpop.f32.mrb[26].mxu1  ;;  %vm6110_vm7 = vmmov %vm6060_vm0 }
 0x3c1   :  { %v2718_v29 = vadd.f32 %v2717_v23, %v2716_v56  ;;  %2507 = vst.msk [vmem:[#allocation5 + $0xd8] sm:$0xff] %vm6096_vm10, %v3390_v2  ;;  %v2571_v42 = vsub.f32 %v3390_v2, %v3586_v8  ;;  %v2115_v19 = vpop.f32.mrb[27].mxu1  ;;  %v2721_v48 = vsel %vm6099_vm11, %v2633_v50, 0.0  ;;  %vm6111_vm10 = vmmov %vm6060_vm0  ;;  %v3596_v50 = vld [vmem:[#allocation2 + $0x128] sm:$0xff]  ;;  %v3597_v8 = vld [vmem:[#allocation2 + $0x120] sm:$0xff] }
 0x3c2   :  { %v2719_v0 = vsel %vm6097_vm9, %v2632_v59, 0.0  ;;  %2506 = vst.msk [vmem:[#allocation5 + $0xd0] sm:$0xff] %vm6098_vm2, %v2115_v19  ;;  %v2570_v3 = vsub.f32 %v2115_v19, %v3587_v11  ;;  %vm6112_vm9 = vmmov %vm6060_vm0 }
 0x3c3   :  { %v2720_v27 = vadd.f32 %v2719_v0, %v2718_v29  ;;  %v2635_v6 = vmul.f32 %v2571_v42, %v2571_v42  ;;  %vm6113_vm2 = vmmov %vm6060_vm0 }
 0x3c4   :  { %v2634_v18 = vmul.f32 %v2570_v3, %v2570_v3  ;;  %v3393_v21 = vpop.f32.mrb[28].mxu1  ;;  %vm6114_vm11 = vmmov %vm6060_vm0 }
 0x3c5   :  { %v2722_v58 = vadd.f32 %v2721_v48, %v2720_v27  ;;  %2509 = vst.msk [vmem:[#allocation5 + $0xe8] sm:$0xff] %vm6100_vm3, %v3393_v21  ;;  %v2573_v44 = vsub.f32 %v3393_v21, %v3588_v10  ;;  %v2125_v37 = vpop.f32.mrb[29].mxu1  ;;  %v2725_v28 = vsel %vm6103_vm6, %v2635_v6, 0.0  ;;  %vm6115_vm3 = vmmov %vm6060_vm0  ;;  %v3598_v6 = vld [vmem:[#allocation2 + $0x138] sm:$0xff]  ;;  %v3599_v10 = vld [vmem:[#allocation2 + $0x130] sm:$0xff] }
 0x3c6   :  { %v2723_v57 = vsel %vm6101_vm1, %v2634_v18, 0.0  ;;  %2508 = vst.msk [vmem:[#allocation5 + $0xe0] sm:$0xff] %vm6102_vm8, %v2125_v37  ;;  %v2572_v47 = vsub.f32 %v2125_v37, %v3589_v20  ;;  %vm6116_vm1 = vmmov %vm6060_vm0 }
 0x3c7   :  { %v2724_v32 = vadd.f32 %v2723_v57, %v2722_v58  ;;  %v2637_v51 = vmul.f32 %v2573_v44, %v2573_v44  ;;  %vm6117_vm8 = vmmov %vm6060_vm0 }
 0x3c8   :  { %v2636_v34 = vmul.f32 %v2572_v47, %v2572_v47  ;;  %v3396_v53 = vpop.f32.mrb[30].mxu1  ;;  %vm6118_vm6 = vmmov %vm6060_vm0 }
 0x3c9   :  { %v2726_v22 = vadd.f32 %v2725_v28, %v2724_v32  ;;  %2511 = vst.msk [vmem:[#allocation5 + $0xf8] sm:$0xff] %vm6104_vm5, %v3396_v53  ;;  %v2575_v43 = vsub.f32 %v3396_v53, %v3590_v39  ;;  %v2135_v63 = vpop.f32.mrb[31].mxu1  ;;  %v2729_v36 = vsel %vm6106_vm14, %v2637_v51, 0.0  ;;  %vm6119_vm5 = vmmov %vm6060_vm0 }
 0x3ca   :  { %v2727_v62 = vsel %vm6105_vm4, %v2636_v34, 0.0  ;;  %2510 = vst.msk [vmem:[#allocation5 + $0xf0] sm:$0xff] %vm6060_vm0, %v2135_v63  ;;  %v2574_v26 = vsub.f32 %v2135_v63, %v3591_v16  ;;  %vm6120_vm4 = vmmov %vm6060_vm0  ;;  %v3600_v16 = vld [vmem:[#allocation2 + $0x148] sm:$0xff] }
 0x3cb   :  { %v2728_v61 = vadd.f32 %v2727_v62, %v2726_v22  ;;  %v2639_v45 = vmul.f32 %v2575_v43, %v2575_v43  ;;  %vm6121_vm14 = vmmov %vm6060_vm0 }
 0x3cc   :  { %v2638_v14 = vmul.f32 %v2574_v26, %v2574_v26  ;;  %v3399_v54 = vpop.f32.mrb[32].mxu1 }
 0x3cd   :  { %v2730_v41 = vadd.f32 %v2729_v36, %v2728_v61  ;;  %2513 = vst.msk [vmem:[#allocation5 + $0x108] sm:$0xff] %vm6107_vm13, %v3399_v54  ;;  %v2577_v13 = vsub.f32 %v3399_v54, %v3592_v12  ;;  %v2145_v1 = vpop.f32.mrb[33].mxu1  ;;  %v2733_v38 = vsel %vm6110_vm7, %v2639_v45, 0.0  ;;  %vm6122_vm13 = vmmov %vm6060_vm0  ;;  %v3601_v45 = vld [vmem:[#allocation2 + $0x140] sm:$0xff] }
 0x3ce   :  { %v2731_v49 = vsel %vm6108_vm12, %v2638_v14, 0.0  ;;  %2512 = vst.msk [vmem:[#allocation5 + $0x100] sm:$0xff] %vm6109_vm15, %v2145_v1  ;;  %v2576_v25 = vsub.f32 %v2145_v1, %v3593_v15  ;;  %vm6123_vm12 = vmmov %vm6060_vm0 }
 0x3cf   :  { %v2732_v9 = vadd.f32 %v2731_v49, %v2730_v41  ;;  %v2641_v55 = vmul.f32 %v2577_v13, %v2577_v13  ;;  %vm6124_vm15 = vmmov %vm6060_vm0  ;;  %v3602_v49 = vld [vmem:[#allocation2 + $0x158] sm:$0xff] }
 0x3d0   :  { %v2640_v30 = vmul.f32 %v2576_v25, %v2576_v25  ;;  %v3402_v52 = vpop.f32.mrb[34].mxu1  ;;  %vm6125_vm7 = vmmov %vm6060_vm0 }
 0x3d1   :  { %v2734_v31 = vadd.f32 %v2733_v38, %v2732_v9  ;;  %2515 = vst.msk [vmem:[#allocation5 + $0x118] sm:$0xff] %vm6111_vm10, %v3402_v52  ;;  %v2579_v35 = vsub.f32 %v3402_v52, %v3594_v17  ;;  %v2155_v4 = vpop.f32.mrb[35].mxu1  ;;  %v2737_v24 = vsel %vm6114_vm11, %v2641_v55, 0.0  ;;  %vm6126_vm10 = vmmov %vm6060_vm0  ;;  %v3603_v38 = vld [vmem:[#allocation2 + $0x150] sm:$0xff] }
 0x3d2   :  { %v2735_v33 = vsel %vm6112_vm9, %v2640_v30, 0.0  ;;  %2514 = vst.msk [vmem:[#allocation5 + $0x110] sm:$0xff] %vm6113_vm2, %v2155_v4  ;;  %v2578_v46 = vsub.f32 %v2155_v4, %v3595_v60  ;;  %vm6127_vm9 = vmmov %vm6060_vm0 }
 0x3d3   :  { %v2736_v5 = vadd.f32 %v2735_v33, %v2734_v31  ;;  %v2643_v40 = vmul.f32 %v2579_v35, %v2579_v35  ;;  %vm6128_vm2 = vmmov %vm6060_vm0  ;;  %v3604_v33 = vld [vmem:[#allocation2 + $0x168] sm:$0xff] }
 0x3d4   :  { %v2642_v7 = vmul.f32 %v2578_v46, %v2578_v46  ;;  %v3405_v56 = vpop.f32.mrb[36].mxu1  ;;  %vm6129_vm11 = vmmov %vm6060_vm0 }
 0x3d5   :  { %v2738_v23 = vadd.f32 %v2737_v24, %v2736_v5  ;;  %2517 = vst.msk [vmem:[#allocation5 + $0x128] sm:$0xff] %vm6115_vm3, %v3405_v56  ;;  %v2581_v59 = vsub.f32 %v3405_v56, %v3596_v50  ;;  %v2165_v2 = vpop.f32.mrb[37].mxu1  ;;  %v2741_v0 = vsel %vm6118_vm6, %v2643_v40, 0.0  ;;  %vm6130_vm3 = vmmov %vm6060_vm0  ;;  %v3605_v24 = vld [vmem:[#allocation2 + $0x160] sm:$0xff] }
 0x3d6   :  { %v2739_v29 = vsel %vm6116_vm1, %v2642_v7, 0.0  ;;  %2516 = vst.msk [vmem:[#allocation5 + $0x120] sm:$0xff] %vm6117_vm8, %v2165_v2  ;;  %v2580_v42 = vsub.f32 %v2165_v2, %v3597_v8  ;;  %vm6131_vm1 = vmmov %vm6060_vm0 }
 0x3d7   :  { %v2740_v19 = vadd.f32 %v2739_v29, %v2738_v23  ;;  %v2645_v11 = vmul.f32 %v2581_v59, %v2581_v59  ;;  %vm6132_vm8 = vmmov %vm6060_vm0 }
 0x3d8   :  { %v2644_v3 = vmul.f32 %v2580_v42, %v2580_v42  ;;  %v3408_v27 = vpop.f32.mrb[38].mxu1  ;;  %vm6133_vm6 = vmmov %vm6060_vm0 }
 0x3d9   :  { %v2742_v48 = vadd.f32 %v2741_v0, %v2740_v19  ;;  %2519 = vst.msk [vmem:[#allocation5 + $0x138] sm:$0xff] %vm6119_vm5, %v3408_v27  ;;  %v2583_v18 = vsub.f32 %v3408_v27, %v3598_v6  ;;  %v2175_v21 = vpop.f32.mrb[39].mxu1  ;;  %v2745_v57 = vsel %vm6121_vm14, %v2645_v11, 0.0  ;;  %vm6134_vm5 = vmmov %vm6060_vm0  ;;  %v3606_v19 = vld [vmem:[#allocation2 + $0x178] sm:$0xff]  ;;  %v3607_v27 = vld [vmem:[#allocation2 + $0x170] sm:$0xff] }
 0x3da   :  { %v2743_v58 = vsel %vm6120_vm4, %v2644_v3, 0.0  ;;  %2518 = vst.msk [vmem:[#allocation5 + $0x130] sm:$0xff] %vm6060_vm0, %v2175_v21  ;;  %v2582_v44 = vsub.f32 %v2175_v21, %v3599_v10  ;;  %vm6135_vm4 = vmmov %vm6060_vm0 }
 0x3db   :  { %v2744_v37 = vadd.f32 %v2743_v58, %v2742_v48  ;;  %v2647_v20 = vmul.f32 %v2583_v18, %v2583_v18  ;;  %vm6136_vm14 = vmmov %vm6060_vm0  ;;  %v3608_v58 = vld [vmem:[#allocation2 + $0x188] sm:$0xff] }
 0x3dc   :  { %v2646_v47 = vmul.f32 %v2582_v44, %v2582_v44 }
 0x3dd   :  { %v2746_v32 = vadd.f32 %v2745_v57, %v2744_v37  ;;  %v2749_v34 = vsel %vm6123_vm12, %v2647_v20, 0.0  ;;  %vm6138_vm12 = vmmov %vm6060_vm0  ;;  %v3609_v57 = vld [vmem:[#allocation2 + $0x180] sm:$0xff] }
 0x3de   :  { %v2747_v28 = vsel %vm6122_vm13, %v2646_v47, 0.0  ;;  %vm6137_vm13 = vmmov %vm6060_vm0 }
 0x3df   :  { %v2748_v51 = vadd.f32 %v2747_v28, %v2746_v32 }
 0x3e1   :  { %v2750_v53 = vadd.f32 %v2749_v34, %v2748_v51 }
 0x3ee   :  { %v2371_v22 = vpop.f32.mrb[64].mxu0 }
 0x3ef   :  { %v3541_v39 = vtrunc.f32 %v2371_v22  ;;  %v2373_v43 = vpop.f32.mrb[65].mxu0  ;;  %v3610_v22 = vld [vmem:[#allocation2 + $0x198] sm:$0xff] }
 0x3f0   :  { %v3411_v63 = vpop.f32.mrb[40].mxu1  ;;  %v3543_v62 = vtrunc.f32 %v2373_v43 }
 0x3f1   :  { %2521 = vst.msk [vmem:[#allocation5 + $0x148] sm:$0xff] %vm6124_vm15, %v3411_v63  ;;  %v2585_v26 = vsub.f32 %v3411_v63, %v3600_v16  ;;  %v2185_v61 = vpop.f32.mrb[41].mxu1  ;;  %v5608_v36 = vcvt.f32.s32 %v3541_v39  ;;  %vm6139_vm15 = vmmov %vm6060_vm0 }
 0x3f2   :  { %2520 = vst.msk [vmem:[#allocation5 + $0x140] sm:$0xff] %vm6125_vm7, %v2185_v61  ;;  %v2584_v14 = vsub.f32 %v2185_v61, %v3601_v45  ;;  %v5611_v54 = vcvt.f32.s32 %v3543_v62  ;;  %vm6140_vm7 = vmmov %vm6060_vm0  ;;  %v3611_v62 = vld [vmem:[#allocation2 + $0x190] sm:$0xff] }
 0x3f3   :  { %v2649_v41 = vmul.f32 %v2585_v26, %v2585_v26 }
 0x3f4   :  { %v2648_v12 = vmul.f32 %v2584_v14, %v2584_v14  ;;  %v3414_v13 = vpop.f32.mrb[42].mxu1  ;;  %v2451_v1 = vcombine.low %v5608_v36, %v5611_v54 }
 0x3f5   :  { %2523 = vst.msk [vmem:[#allocation5 + $0x158] sm:$0xff] %vm6126_vm10, %v3414_v13  ;;  %v2587_v15 = vsub.f32 %v3414_v13, %v3602_v49  ;;  %v2195_v25 = vpop.f32.mrb[43].mxu1  ;;  %v2753_v52 = vsel %vm6129_vm11, %v2649_v41, 0.0  ;;  %vm6141_vm10 = vmmov %vm6060_vm0  ;;  %v3612_v13 = vld [vmem:[#allocation2 + $0x1a8] sm:$0xff] }
 0x3f6   :  { %v2751_v9 = vsel %vm6127_vm9, %v2648_v12, 0.0  ;;  %2522 = vst.msk [vmem:[#allocation5 + $0x150] sm:$0xff] %vm6128_vm2, %v2195_v25  ;;  %v2586_v55 = vsub.f32 %v2195_v25, %v3603_v38  ;;  %vm6142_vm9 = vmmov %vm6060_vm0 }
 0x3f7   :  { %v2752_v30 = vadd.f32 %v2751_v9, %v2750_v53  ;;  %v2651_v31 = vmul.f32 %v2587_v15, %v2587_v15  ;;  %vm6143_vm2 = vmmov %vm6060_vm0  ;;  %v3613_v9 = vld [vmem:[#allocation2 + $0x1a0] sm:$0xff] }
 0x3f8   :  { %v2650_v17 = vmul.f32 %v2586_v55, %v2586_v55  ;;  %v3417_v35 = vpop.f32.mrb[44].mxu1  ;;  %vm6144_vm11 = vmmov %vm6060_vm0 }
 0x3f9   :  { %v2754_v4 = vadd.f32 %v2753_v52, %v2752_v30  ;;  %2525 = vst.msk [vmem:[#allocation5 + $0x168] sm:$0xff] %vm6130_vm3, %v3417_v35  ;;  %v2589_v60 = vsub.f32 %v3417_v35, %v3604_v33  ;;  %v2205_v46 = vpop.f32.mrb[45].mxu1  ;;  %v2757_v56 = vsel %vm6133_vm6, %v2651_v31, 0.0  ;;  %vm6145_vm3 = vmmov %vm6060_vm0 }
 0x3fa   :  { %v2755_v5 = vsel %vm6131_vm1, %v2650_v17, 0.0  ;;  %2524 = vst.msk [vmem:[#allocation5 + $0x160] sm:$0xff] %vm6132_vm8, %v2205_v46  ;;  %v2588_v40 = vsub.f32 %v2205_v46, %v3605_v24  ;;  %vm6146_vm1 = vmmov %vm6060_vm0 }
 0x3fb   :  { %v2756_v7 = vadd.f32 %v2755_v5, %v2754_v4  ;;  %v2653_v23 = vmul.f32 %v2589_v60, %v2589_v60  ;;  %vm6147_vm8 = vmmov %vm6060_vm0  ;;  %v3614_v4 = vld [vmem:[#allocation2 + $0x1b8] sm:$0xff]  ;;  %v3615_v5 = vld [vmem:[#allocation2 + $0x1b0] sm:$0xff] }
 0x3fc   :  { %v2652_v50 = vmul.f32 %v2588_v40, %v2588_v40  ;;  %vm6148_vm6 = vmmov %vm6060_vm0 }
 0x3fd   :  { %v2758_v59 = vadd.f32 %v2757_v56, %v2756_v7  ;;  %v2761_v8 = vsel %vm6135_vm4, %v2653_v23, 0.0  ;;  %vm6150_vm4 = vmmov %vm6060_vm0 }
 0x3fe   :  { %v2759_v2 = vsel %vm6134_vm5, %v2652_v50, 0.0  ;;  %vm6149_vm5 = vmmov %vm6060_vm0 }
 0x3ff   :  { %v2760_v29 = vadd.f32 %v2759_v2, %v2758_v59  ;;  %v3616_v2 = vld [vmem:[#allocation2 + $0x1c8] sm:$0xff] }
 0x400   :  { %v3420_v42 = vpop.f32.mrb[46].mxu1 }
 0x401   :  { %2527 = vst.msk [vmem:[#allocation5 + $0x178] sm:$0xff] %vm6060_vm0, %v3420_v42  ;;  %v2591_v0 = vsub.f32 %v3420_v42, %v3606_v19  ;;  %v2215_v11 = vpop.f32.mrb[47].mxu1  ;;  %v2762_v3 = vadd.f32 %v2761_v8, %v2760_v29  ;;  %v3617_v19 = vld [vmem:[#allocation2 + $0x1c0] sm:$0xff] }
 0x402   :  { %2526 = vst.msk [vmem:[#allocation5 + $0x170] sm:$0xff] %vm6136_vm14, %v2215_v11  ;;  %v2590_v48 = vsub.f32 %v2215_v11, %v3607_v27  ;;  %vm6151_vm14 = vmmov %vm6060_vm0 }
 0x403   :  { %v2655_v6 = vmul.f32 %v2591_v0, %v2591_v0 }
 0x404   :  { %v2654_v18 = vmul.f32 %v2590_v48, %v2590_v48  ;;  %v3423_v21 = vpop.f32.mrb[48].mxu1 }
 0x405   :  { %2529 = vst.msk [vmem:[#allocation5 + $0x188] sm:$0xff] %vm6137_vm13, %v3423_v21  ;;  %v2593_v10 = vsub.f32 %v3423_v21, %v3608_v58  ;;  %v2225_v44 = vpop.f32.mrb[49].mxu1  ;;  %v2765_v32 = vsel %vm6140_vm7, %v2655_v6, 0.0  ;;  %vm6152_vm13 = vmmov %vm6060_vm0  ;;  %v3618_v21 = vld [vmem:[#allocation2 + $0x1d8] sm:$0xff] }
 0x406   :  { %v2763_v37 = vsel %vm6138_vm12, %v2654_v18, 0.0  ;;  %2528 = vst.msk [vmem:[#allocation5 + $0x180] sm:$0xff] %vm6139_vm15, %v2225_v44  ;;  %v2592_v20 = vsub.f32 %v2225_v44, %v3609_v57  ;;  %vm6153_vm12 = vmmov %vm6060_vm0 }
 0x407   :  { %v2764_v47 = vadd.f32 %v2763_v37, %v2762_v3  ;;  %v2657_v28 = vmul.f32 %v2593_v10, %v2593_v10  ;;  %vm6154_vm15 = vmmov %vm6060_vm0  ;;  %v3619_v37 = vld [vmem:[#allocation2 + $0x1d0] sm:$0xff] }
 0x408   :  { %v2656_v51 = vmul.f32 %v2592_v20, %v2592_v20  ;;  %v3426_v34 = vpop.f32.mrb[50].mxu1  ;;  %vm6155_vm7 = vmmov %vm6060_vm0 }
 0x409   :  { %v2766_v53 = vadd.f32 %v2765_v32, %v2764_v47  ;;  %2531 = vst.msk [vmem:[#allocation5 + $0x198] sm:$0xff] %vm6141_vm10, %v3426_v34  ;;  %v2595_v39 = vsub.f32 %v3426_v34, %v3610_v22  ;;  %v2235_v43 = vpop.f32.mrb[51].mxu1  ;;  %v2769_v61 = vsel %vm6144_vm11, %v2657_v28, 0.0  ;;  %vm6156_vm10 = vmmov %vm6060_vm0 }
 0x40a   :  { %v2767_v63 = vsel %vm6142_vm9, %v2656_v51, 0.0  ;;  %2530 = vst.msk [vmem:[#allocation5 + $0x190] sm:$0xff] %vm6143_vm2, %v2235_v43  ;;  %v2594_v16 = vsub.f32 %v2235_v43, %v3611_v62  ;;  %vm6157_vm9 = vmmov %vm6060_vm0 }
 0x40b   :  { %v2768_v26 = vadd.f32 %v2767_v63, %v2766_v53  ;;  %v2659_v45 = vmul.f32 %v2595_v39, %v2595_v39  ;;  %vm6158_vm2 = vmmov %vm6060_vm0  ;;  %v3620_v53 = vld [vmem:[#allocation2 + $0x1e8] sm:$0xff]  ;;  %v3621_v63 = vld [vmem:[#allocation2 + $0x1e0] sm:$0xff] }
 0x40c   :  { %v2658_v14 = vmul.f32 %v2594_v16, %v2594_v16  ;;  %v3429_v41 = vpop.f32.mrb[52].mxu1  ;;  %vm6159_vm11 = vmmov %vm6060_vm0 }
 0x40d   :  { %v2770_v12 = vadd.f32 %v2769_v61, %v2768_v26  ;;  %2533 = vst.msk [vmem:[#allocation5 + $0x1a8] sm:$0xff] %vm6145_vm3, %v3429_v41  ;;  %v2597_v49 = vsub.f32 %v3429_v41, %v3612_v13  ;;  %v2245_v15 = vpop.f32.mrb[53].mxu1  ;;  %v2773_v30 = vsel %vm6148_vm6, %v2659_v45, 0.0  ;;  %vm6160_vm3 = vmmov %vm6060_vm0 }
 0x40e   :  { %v2771_v25 = vsel %vm6146_vm1, %v2658_v14, 0.0  ;;  %2532 = vst.msk [vmem:[#allocation5 + $0x1a0] sm:$0xff] %vm6147_vm8, %v2245_v15  ;;  %v2596_v38 = vsub.f32 %v2245_v15, %v3613_v9  ;;  %vm6161_vm1 = vmmov %vm6060_vm0 }
 0x40f   :  { %v2772_v55 = vadd.f32 %v2771_v25, %v2770_v12  ;;  %v2661_v52 = vmul.f32 %v2597_v49, %v2597_v49  ;;  %vm6162_vm8 = vmmov %vm6060_vm0  ;;  %v3622_v12 = vld [vmem:[#allocation2 + $0x1f8] sm:$0xff]  ;;  %v3623_v25 = vld [vmem:[#allocation2 + $0x1f0] sm:$0xff] }
 0x410   :  { %v2660_v31 = vmul.f32 %v2596_v38, %v2596_v38  ;;  %v3432_v17 = vpop.f32.mrb[54].mxu1  ;;  %vm6163_vm6 = vmmov %vm6060_vm0 }
 0x411   :  { %v2774_v35 = vadd.f32 %v2773_v30, %v2772_v55  ;;  %2535 = vst.msk [vmem:[#allocation5 + $0x1b8] sm:$0xff] %vm6149_vm5, %v3432_v17  ;;  %v2599_v33 = vsub.f32 %v3432_v17, %v3614_v4  ;;  %v2255_v60 = vpop.f32.mrb[55].mxu1  ;;  %v2777_v7 = vsel %vm6151_vm14, %v2661_v52, 0.0  ;;  %vm6164_vm5 = vmmov %vm6060_vm0 }
 0x412   :  { %v2775_v46 = vsel %vm6150_vm4, %v2660_v31, 0.0  ;;  %2534 = vst.msk [vmem:[#allocation5 + $0x1b0] sm:$0xff] %vm6060_vm0, %v2255_v60  ;;  %v2598_v24 = vsub.f32 %v2255_v60, %v3615_v5  ;;  %vm6165_vm4 = vmmov %vm6060_vm0 }
 0x413   :  { %v2776_v40 = vadd.f32 %v2775_v46, %v2774_v35  ;;  %v2663_v56 = vmul.f32 %v2599_v33, %v2599_v33 }
 0x414   :  { %v2662_v23 = vmul.f32 %v2598_v24, %v2598_v24  ;;  %v3435_v50 = vpop.f32.mrb[56].mxu1 }
 0x415   :  { %v2778_v59 = vadd.f32 %v2777_v7, %v2776_v40  ;;  %2537 = vst.msk [vmem:[#allocation5 + $0x1c8] sm:$0xff] %vm6152_vm13, %v3435_v50  ;;  %v2601_v29 = vsub.f32 %v3435_v50, %v3616_v2  ;;  %v2265_v8 = vpop.f32.mrb[57].mxu1  ;;  %v2781_v3 = vsel %vm6155_vm7, %v2663_v56, 0.0 }
 0x416   :  { %v2779_v42 = vsel %vm6153_vm12, %v2662_v23, 0.0  ;;  %2536 = vst.msk [vmem:[#allocation5 + $0x1c0] sm:$0xff] %vm6154_vm15, %v2265_v8  ;;  %v2600_v0 = vsub.f32 %v2265_v8, %v3617_v19 }
 0x417   :  { %v2780_v11 = vadd.f32 %v2779_v42, %v2778_v59  ;;  %v2665_v27 = vmul.f32 %v2601_v29, %v2601_v29 }
 0x418   :  { %v2664_v48 = vmul.f32 %v2600_v0, %v2600_v0  ;;  %v3438_v6 = vpop.f32.mrb[58].mxu1 }
 0x419   :  { %v2782_v18 = vadd.f32 %v2781_v3, %v2780_v11  ;;  %2539 = vst.msk [vmem:[#allocation5 + $0x1d8] sm:$0xff] %vm6156_vm10, %v3438_v6  ;;  %v2603_v58 = vsub.f32 %v3438_v6, %v3618_v21  ;;  %v2275_v10 = vpop.f32.mrb[59].mxu1  ;;  %v2785_v47 = vsel %vm6159_vm11, %v2665_v27, 0.0 }
 0x41a   :  { %v2783_v44 = vsel %vm6157_vm9, %v2664_v48, 0.0  ;;  %2538 = vst.msk [vmem:[#allocation5 + $0x1d0] sm:$0xff] %vm6158_vm2, %v2275_v10  ;;  %v2602_v57 = vsub.f32 %v2275_v10, %v3619_v37 }
 0x41b   :  { %v2784_v20 = vadd.f32 %v2783_v44, %v2782_v18  ;;  %v2667_v32 = vmul.f32 %v2603_v58, %v2603_v58 }
 0x41c   :  { %v2666_v28 = vmul.f32 %v2602_v57, %v2602_v57  ;;  %v3441_v51 = vpop.f32.mrb[60].mxu1 }
 0x41d   :  { %v2786_v34 = vadd.f32 %v2785_v47, %v2784_v20  ;;  %2541 = vst.msk [vmem:[#allocation5 + $0x1e8] sm:$0xff] %vm6160_vm3, %v3441_v51  ;;  %v2605_v22 = vsub.f32 %v3441_v51, %v3620_v53  ;;  %v2285_v39 = vpop.f32.mrb[61].mxu1  ;;  %v2789_v26 = vsel %vm6163_vm6, %v2667_v32, 0.0 }
 0x41e   :  { %v2787_v43 = vsel %vm6161_vm1, %v2666_v28, 0.0  ;;  %2540 = vst.msk [vmem:[#allocation5 + $0x1e0] sm:$0xff] %vm6162_vm8, %v2285_v39  ;;  %v2604_v62 = vsub.f32 %v2285_v39, %v3621_v63 }
 0x41f   :  { %v2788_v16 = vadd.f32 %v2787_v43, %v2786_v34  ;;  %v2669_v61 = vmul.f32 %v2605_v22, %v2605_v22 }
 0x420   :  { %v2668_v45 = vmul.f32 %v2604_v62, %v2604_v62  ;;  %v3444_v14 = vpop.f32.mrb[62].mxu1 }
 0x421   :  { %v2790_v41 = vadd.f32 %v2789_v26, %v2788_v16  ;;  %2543 = vst.msk [vmem:[#allocation5 + $0x1f8] sm:$0xff] %vm6164_vm5, %v3444_v14  ;;  %v2607_v13 = vsub.f32 %v3444_v14, %v3622_v12  ;;  %v2295_v49 = vpop.f32.mrb[63].mxu1 }
 0x422   :  { %v2791_v15 = vsel %vm6165_vm4, %v2668_v45, 0.0  ;;  %2542 = vst.msk [vmem:[#allocation5 + $0x1f0] sm:$0xff] %vm6060_vm0, %v2295_v49  ;;  %v2606_v9 = vsub.f32 %v2295_v49, %v3623_v25 }
 0x423   :  { %v2792_v38 = vadd.f32 %v2791_v15, %v2790_v41 }
 0x424   :  { %3657 = shalt.err (!%p3654_p12)
}
 0x425   :  { %s3658_s29 = scalar_lea.hbm %s5691_s4, 8192 }
 0x426   :  { %p3659_p13 = scmp.ne.s32.totalorder %s5691_s4, %s3658_s29  ;;  %p3662_p0 = scmp.lt.u32.totalorder %s3658_s29, %s5691_s4 }
 0x428   :  { %p3664_p1 = pnand %p3662_p0, %p3659_p13 }
 0x42a   :  { %3667 = shalt.err (!%p3664_p1)
}
 0x42b   :  { %2818 = dma.vmem_to_hbm [thread:$0]  %s2813_s25, 8192, %s5691_s4, [#allocation4], %s3673_s7, %s3673_s7, %s3674_s8   ;;  %vm6166_vm14 = vmmov %vm6060_vm0  ;;  %v2671_v30 = vmul.f32 %v2607_v13, %v2607_v13  ;;  %v2670_v52 = vmul.f32 %v2606_v9, %v2606_v9  ;;  %v3678_v4 = vmov 1966171168   ;;  %v6169_v40 = vlaneseq }
 0x42c   :  { %v2793_v55 = vsel %vm6166_vm14, %v2669_v61, 0.0  ;;  %vm6167_vm13 = vmmov %vm6060_vm0  ;;  %v2454_v33 = vunpack.c.l.s4 %v3678_v4  ;;  %vm2805_vm15 = vcmask 516096  }
 0x42d   :  { %v2794_v31 = vadd.f32 %v2793_v55, %v2792_v38  ;;  %v2795_v17 = vsel %vm6167_vm13, %v2670_v52, 0.0  ;;  %vm6168_vm12 = vmmov %vm6060_vm0  ;;  %v2457_v7 = vshrl.u32 %v6169_v40, 7  ;;  %v2442_v23 = vpop.f32.mrb[64].mxu1  ;;  %vm2477_vm7 = vcmp.lt.s32.totalorder %v6169_v40, 512 }
 0x42e   :  { %v2797_v60 = vsel %vm6168_vm12, %v2671_v30, 0.0  ;;  %v2455_v24 = vunpack.c.0.s8 %v2454_v33  ;;  %v3545_v50 = vtrunc.f32 %v2442_v23  ;;  %v2444_v59 = vpop.f32.mrb[65].mxu1 }
 0x42f   :  { %v2796_v35 = vadd.f32 %v2795_v17, %v2794_v31  ;;  %v3547_v8 = vtrunc.f32 %v2444_v59 }
 0x430   :  { %v2458_v29 = vsub.s32 %v2455_v24, %v2457_v7  ;;  %v3546_v42 = vcvt.f32.s32 %v3545_v50 }
 0x431   :  { %v2798_v46 = vadd.f32 %v2797_v60, %v2796_v35  ;;  %v3548_v0 = vcvt.f32.s32 %v3547_v8 }
 0x432   :  { %v2459_v3 = vrot.slane %v2451_v1, %v2458_v29 }
 0x433   :  { %v2799_v5 = vrot.slane %v2798_v46, 4  ;;  %v2452_v27 = vcombine.low %v3546_v42, %v3548_v0 }
 0x435   :  { %v2800_v56 = vadd.f32 %v2799_v5, %v2798_v46  ;;  %v2466_v6 = vrot.slane %v2452_v27, %v2458_v29 }
 0x437   :  { %v2801_v2 = vrot.slane %v2800_v56, 2  ;;  %v2467_v18 = vcombine.low %v2459_v3, %v2466_v6 }
 0x439   :  { %v2802_v19 = vadd.f32 %v2801_v2, %v2800_v56  ;;  %v2474_v21 = vrot.slane %v2467_v18, %v2458_v29 }
 0x43b   :  { %v2803_v11 = vrot.slane %v2802_v19, 1  ;;  %2479 = vst.msk [vmem:[%s5692_s5] sm:$0xf] %vm2477_vm7, %v2474_v21 }
 0x43d   :  { %v2804_v48 = vadd.f32 %v2803_v11, %v2802_v19 }
 0x43f   :  { %2806 = vst.msk [vmem:[%s5693_s6] sm:$0x1] %vm2805_vm15, %v2804_v48 }
 0x440   :  { %3670 = dma.done.wait [#allocation4], 8192  }
 0x441   :  { %3671 = vsyncadd [#allocation4], 4294959104 }
 0x442   :  { %2830 = vsyncpa [#allocation3], 1 }
 0x443   :  { %2831 = vsyncpa [#allocation4], 1 }

</bundles_post_ra>
